<compile_context>
chip_gen: v7x
topology: tpu7x:2x2x1
jax: 0.10.0
libtpu: 0.0.40
codegen_flags: <defaults>
</compile_context>

<pallas_src>
import math

import jax
import jax.numpy as jnp
from jax import lax
from jax.experimental import pallas as pl
from jax.experimental.pallas import tpu as pltpu

LANE = 128
_VMEM_LIMIT = 32 * 1024 * 1024


def _cpad(c):
    return ((c + LANE - 1) // LANE) * LANE


def _row_tile(m):
    """Largest tile dividing m exactly with at least 2 grid steps (or None)."""
    for t in (512, 256, 128, 64, 32, 16, 8):
        if m % t == 0 and m // t >= 2:
            return t
    return None


# ------------------------------ Pallas kernels ------------------------------

def _bn_relu_matmul_kernel(x_ref, s_ref, b_ref, w_ref, ob_ref, o_ref):
    # y = relu(x * scale + bias) @ W + out_bias   (bf16 MXU operands, f32 acc)
    a = jnp.maximum(x_ref[...] * s_ref[...] + b_ref[...], 0.0)
    o_ref[...] = (jnp.dot(a.astype(jnp.bfloat16), w_ref[...],
                          preferred_element_type=jnp.float32)
                  + ob_ref[...])


def _tap_matmul_kernel(a_ref, w_ref, o_ref, acc_ref):
    # out = sum_t a[t] @ w[t], accumulated in VMEM over the (arbitrary) tap axis
    t = pl.program_id(1)

    @pl.when(t == 0)
    def _():
        acc_ref[...] = jnp.zeros_like(acc_ref)

    acc_ref[...] += jnp.dot(a_ref[0], w_ref[0],
                            preferred_element_type=jnp.float32)

    @pl.when(t == pl.num_programs(1) - 1)
    def _():
        o_ref[...] = acc_ref[...]


# ------------------------------ kernel wrappers ------------------------------

def bn_relu_matmul(x2d, scale, bias, w_bf16, out_bias=None):
    """relu(x * scale + bias) @ w (+ out_bias).  x2d: (M, K) f32, w: (K, N) bf16."""
    m, k = x2d.shape
    n = w_bf16.shape[1]
    if out_bias is None:
        out_bias = jnp.zeros((n,), jnp.float32)
    tm = _row_tile(m) or m
    return pl.pallas_call(
        _bn_relu_matmul_kernel,
        out_shape=jax.ShapeDtypeStruct((m, n), jnp.float32),
        grid=(m // tm,),
        in_specs=[pl.BlockSpec((tm, k), lambda i: (i, 0)),
                  pl.BlockSpec((1, k), lambda i: (0, 0)),
                  pl.BlockSpec((1, k), lambda i: (0, 0)),
                  pl.BlockSpec((k, n), lambda i: (0, 0)),
                  pl.BlockSpec((1, n), lambda i: (0, 0))],
        out_specs=pl.BlockSpec((tm, n), lambda i: (i, 0)),
        compiler_params=pltpu.CompilerParams(
            dimension_semantics=("parallel",),
            vmem_limit_bytes=_VMEM_LIMIT),
    )(x2d.astype(jnp.float32),
      scale.reshape(1, k).astype(jnp.float32),
      bias.reshape(1, k).astype(jnp.float32),
      w_bf16,
      out_bias.reshape(1, n).astype(jnp.float32))


def tap_matmul(xs_bf16, w_taps_bf16):
    """xs: (T, M, K) bf16 shifted taps, w: (T, K, N) bf16 -> sum_t xs[t] @ w[t]."""
    ntaps, m, k = xs_bf16.shape
    n = w_taps_bf16.shape[2]
    tm = _row_tile(m) or m
    return pl.pallas_call(
        _tap_matmul_kernel,
        out_shape=jax.ShapeDtypeStruct((m, n), jnp.float32),
        grid=(m // tm, ntaps),
        in_specs=[pl.BlockSpec((1, tm, k), lambda i, j: (j, i, 0)),
                  pl.BlockSpec((1, k, n), lambda i, j: (j, 0, 0))],
        out_specs=pl.BlockSpec((tm, n), lambda i, j: (i, 0)),
        scratch_shapes=[pltpu.VMEM((tm, n), jnp.float32)],
        compiler_params=pltpu.CompilerParams(
            dimension_semantics=("parallel", "arbitrary"),
            vmem_limit_bytes=_VMEM_LIMIT),
    )(xs_bf16, w_taps_bf16)


# ------------------------------ layer helpers --------------------------------

def bn_scale_bias(x, gamma, beta, eps=1e-5):
    """Training-mode BatchNorm folded to per-channel (scale, bias), one pass."""
    c = x.shape[-1]
    xf = x.reshape(-1, c)
    cnt = xf.shape[0]
    s1 = jnp.sum(xf, axis=0)
    s2 = jnp.sum(xf * xf, axis=0)
    mean = s1 / cnt
    var = jnp.maximum(s2 / cnt - mean * mean, 0.0)    # biased var, as PyTorch
    scale = gamma * lax.rsqrt(var + eps)
    bias = beta - mean * scale
    return scale, bias


def conv3x3(x_act, w_taps_bf16):
    """3x3 same-pad, stride-1 conv.  x_act: (N,H,W,C), already activated (or raw).

    The 9 shifted taps are built by one XLA fusion (lane-aligned, bf16) and the
    tap reduction happens inside the Pallas kernel in a VMEM accumulator."""
    n, h, w, c = x_act.shape
    cout = w_taps_bf16.shape[2]
    xp = jnp.pad(x_act, ((0, 0), (1, 1), (1, 1), (0, 0)))
    taps = [xp[:, dy:dy + h, dx:dx + w, :].reshape(n * h * w, c)
            for dy in range(3) for dx in range(3)]
    xs = jnp.stack(taps, axis=0).astype(jnp.bfloat16)          # (9, M, C)
    y = tap_matmul(xs, w_taps_bf16)                             # (M, cout)
    return y.reshape(n, h, w, cout)


def bottleneck_forward(x, real_c, p, growth):
    """Canonical Bottleneck: bn->relu->1x1(4g) -> bn->relu->3x3(g) -> cat([out, x])."""
    n, h, w, cpad = x.shape
    s1, b1 = bn_scale_bias(x, p["bn1_g"], p["bn1_b"])
    y1 = bn_relu_matmul(x.reshape(-1, cpad), s1, b1, p["w1"])   # (M, inter_pad)
    interp = y1.shape[1]
    s2, b2 = bn_scale_bias(y1, p["bn2_g"], p["bn2_b"])
    # BN2 + ReLU are folded by XLA into the tap-stack construction inside conv3x3.
    y1a = jnp.maximum(y1 * s2[None, :] + b2[None, :], 0.0).reshape(n, h, w, interp)
    y2 = conv3x3(y1a, p["w2"])                                   # (N,H,W,growth_pad)

    new_c = growth + real_c                                      # torch.cat([out, x], 1)
    cat = jnp.concatenate([y2[..., :growth], x[..., :real_c]], axis=-1)
    cat = jnp.pad(cat, ((0, 0), (0, 0), (0, 0), (0, _cpad(new_c) - new_c)))
    return cat, new_c


def transition_forward(x, p):
    """bn -> relu -> 1x1 conv -> avg_pool2d(2)."""
    n, h, w, cpad = x.shape
    s, b = bn_scale_bias(x, p["bn_g"], p["bn_b"])
    y = bn_relu_matmul(x.reshape(-1, cpad), s, b, p["w"])        # (M, out_pad)
    op = y.shape[1]
    y = y.reshape(n, h, w, op)
    return y.reshape(n, h // 2, 2, w // 2, 2, op).mean(axis=(2, 4))


# ------------------------------ parameter init -------------------------------

def init_densenet_params(key, nblocks=(1, 1, 1, 1), growth_rate=12,
                         reduction=0.5, num_classes=10):
    keys = iter(jax.random.split(key, 64))

    def nk():
        return next(keys)

    def conv_taps(cin, cout, cin_pad=None):
        # 3x3 conv weights as (9, cin_pad, cout_pad) bf16, zero-padded.
        fan_in = 9 * cin
        w = jax.random.normal(nk(), (3, 3, cin, cout), jnp.float32) / math.sqrt(fan_in)
        cp = cin if cin_pad is None else cin_pad
        wp = jnp.zeros((3, 3, cp, _cpad(cout)), jnp.float32)
        wp = wp.at[:, :, :cin, :cout].set(w)
        return wp.reshape(9, cp, _cpad(cout)).astype(jnp.bfloat16)

    def conv1x1_w(cin, cout):
        w = jax.random.normal(nk(), (cin, cout), jnp.float32) / math.sqrt(cin)
        wp = jnp.zeros((_cpad(cin), _cpad(cout)), jnp.float32)
        wp = wp.at[:cin, :cout].set(w)
        return wp.astype(jnp.bfloat16)

    def bn_params(c):
        return (jnp.ones((_cpad(c),), jnp.float32),
                jnp.zeros((_cpad(c),), jnp.float32))

    params = {"growth": growth_rate, "num_classes": num_classes}
    num_planes = 2 * growth_rate
    params["conv1"] = conv_taps(3, num_planes)          # raw input: Cin stays 3
    params["conv1_out"] = num_planes

    dense, trans = [], []
    for stage in range(4):
        blocks = []
        for _ in range(nblocks[stage]):
            inter = 4 * growth_rate
            g1, b1 = bn_params(num_planes)
            g2, b2 = bn_params(inter)
            blocks.append({
                "bn1_g": g1, "bn1_b": b1,
                "w1": conv1x1_w(num_planes, inter),
                "bn2_g": g2, "bn2_b": b2,
                "w2": conv_taps(inter, growth_rate, cin_pad=_cpad(inter)),
            })
            num_planes += growth_rate
        dense.append(blocks)
        if stage < 3:
            out_planes = int(math.floor(num_planes * reduction))
            g, b = bn_params(num_planes)
            trans.append({"bn_g": g, "bn_b": b,
                          "w": conv1x1_w(num_planes, out_planes),
                          "out": out_planes})
            num_planes = out_planes

    params["dense"] = dense
    params["trans"] = trans
    g, b = bn_params(num_planes)
    params["bn_g"], params["bn_b"] = g, b

    lin = (jax.random.normal(nk(), (num_planes, num_classes), jnp.float32)
           / math.sqrt(num_planes))
    lw = jnp.zeros((_cpad(num_planes), _cpad(num_classes)), jnp.float32)
    lw = lw.at[:num_planes, :num_classes].set(lin)
    params["lin_w"] = lw.astype(jnp.bfloat16)
    params["lin_b"] = jnp.zeros((_cpad(num_classes),), jnp.float32)
    return params


# --------------------------------- forward -----------------------------------

def densenet_forward(params, x_nchw):
    growth = params["growth"]
    # NCHW (PyTorch) -> NHWC so channels sit on the TPU lane axis.
    x = jnp.transpose(x_nchw.astype(jnp.float32), (0, 2, 3, 1))

    out = conv3x3(x, params["conv1"])                    # conv1 (no activation)
    real_c = params["conv1_out"]

    for stage in range(4):
        for blk in params["dense"][stage]:               # denseN
            out, real_c = bottleneck_forward(out, real_c, blk, growth)
        if stage < 3:
            tp = params["trans"][stage]                  # transN
            out = transition_forward(out, tp)
            real_c = tp["out"]

    # Final: avg_pool2d(relu(bn(out)), 4) -> view -> linear.  With 4x4 spatial
    # the pool is a full spatial mean, which commutes with the Linear, so we
    # fuse bn+relu+linear(+bias) per pixel in one kernel and average the logits.
    n, h, w, cpad = out.shape
    s, b = bn_scale_bias(out, params["bn_g"], params["bn_b"])
    logits_px = bn_relu_matmul(out.reshape(-1, cpad), s, b,
                               params["lin_w"], params["lin_b"])
    logits = logits_px.reshape(n, h * w, -1).mean(axis=1)
    return logits[:, :params["num_classes"]]
    # TODO(synk): the torch.cuda.memory_allocated prints / reset_atm in the
    # reference forward are device-profiling side effects with no Pallas
    # equivalent.


# ----------------------------------- main -------------------------------------

if __name__ == "__main__":
    key = jax.random.PRNGKey(0)
    k_param, k_x = jax.random.split(key)

    # Small DenseNet: growth_rate=12, one Bottleneck per stage, CIFAR-sized
    # spatial (32) so the final avg_pool(4) -> 1x1 matches nn.Linear in_dim.
    params = init_densenet_params(k_param, nblocks=(1, 1, 1, 1),
                                  growth_rate=12, reduction=0.5,
                                  num_classes=10)

    x = jax.random.normal(k_x, (2, 3, 32, 32), jnp.float32)   # NCHW like torch

    fwd = jax.jit(lambda inp: densenet_forward(params, inp))
    logits = fwd(x)
    jax.block_until_ready(logits)

    assert logits.shape == (2, 10), logits.shape
    assert bool(jnp.all(jnp.isfinite(logits)))
    print("KERNEL_OK")
</pallas_src>

<mosaic_0001>
module attributes {stable_mosaic.version = 11 : i64} {
  func.func @_tap_matmul_kernel(%arg0: i32, %arg1: i32, %arg2: memref<1x512x3xbf16, #tpu.memory_space<vmem>>, %arg3: memref<1x3x128xbf16, #tpu.memory_space<vmem>>, %arg4: memref<512x128xf32, #tpu.memory_space<vmem>>, %arg5: memref<512x128xf32, #tpu.memory_space<vmem>>) attributes {dimension_semantics = [#tpu.dimension_semantics<parallel>, #tpu.dimension_semantics<arbitrary>], iteration_bounds = array<i64: 4, 9>, scalar_prefetch = 0 : i64, scratch_operands = 1 : i64, tpu.core_type = #tpu.core_type<tc>, window_params = [{transform_indices = @transform_0, window_bounds = array<i64: 1, 512, 3>}, {transform_indices = @transform_1, window_bounds = array<i64: 1, 3, 128>}, {transform_indices = @transform_2, window_bounds = array<i64: 512, 128>}]} {
    %c0_i32 = arith.constant 0 : i32
    %0 = arith.cmpi eq, %arg1, %c0_i32 : i32
    %1 = arith.extui %0 : i1 to i32
    %c0_i32_0 = arith.constant 0 : i32
    %2 = arith.cmpi ne, %1, %c0_i32_0 : i32
    scf.if %2 {
      %cst_11 = arith.constant 0.000000e+00 : f32
      %14 = vector.broadcast %cst_11 : f32 to vector<512x128xf32>
      %c0_12 = arith.constant 0 : index
      %c0_13 = arith.constant 0 : index
      %15 = vector.load %arg5[%c0_12, %c0_13] : memref<512x128xf32, #tpu.memory_space<vmem>>, vector<512x128xf32>
      tpu.vector_store %arg5[%c0_12, %c0_13], %14 {strides = array<i32>} : memref<512x128xf32, #tpu.memory_space<vmem>>, vector<512x128xf32>,
    } else {
    }
    %c0 = arith.constant 0 : index
    %c0_1 = arith.constant 0 : index
    %3 = vector.load %arg5[%c0, %c0_1] : memref<512x128xf32, #tpu.memory_space<vmem>>, vector<512x128xf32>
    %c0_2 = arith.constant 0 : index
    %c0_3 = arith.constant 0 : index
    %c0_4 = arith.constant 0 : index
    %4 = vector.load %arg2[%c0_2, %c0_3, %c0_4] : memref<1x512x3xbf16, #tpu.memory_space<vmem>>, vector<1x512x3xbf16>
    %5 = vector.shape_cast %4 : vector<1x512x3xbf16> to vector<512x3xbf16>
    %c0_5 = arith.constant 0 : index
    %c0_6 = arith.constant 0 : index
    %c0_7 = arith.constant 0 : index
    %6 = vector.load %arg3[%c0_5, %c0_6, %c0_7] : memref<1x3x128xbf16, #tpu.memory_space<vmem>>, vector<1x3x128xbf16>
    %7 = vector.shape_cast %6 : vector<1x3x128xbf16> to vector<3x128xbf16>
    %cst = arith.constant dense<0.000000e+00> : vector<512x128xf32>
    %8 = tpu.matmul %5, %7, %cst {dimension_numbers = #tpu.dot_dimension_numbers<[1], [0], [0], [1], [0, 0, 1, 1], [], []>} : vector<512x3xbf16>, vector<3x128xbf16>, vector<512x128xf32> -> vector<512x128xf32>
    %9 = arith.addf %3, %8 : vector<512x128xf32>
    %c0_8 = arith.constant 0 : index
    %c0_9 = arith.constant 0 : index
    %10 = vector.load %arg5[%c0_8, %c0_9] : memref<512x128xf32, #tpu.memory_space<vmem>>, vector<512x128xf32>
    tpu.vector_store %arg5[%c0_8, %c0_9], %9 {strides = array<i32>} : memref<512x128xf32, #tpu.memory_space<vmem>>, vector<512x128xf32>,
    %c8_i32 = arith.constant 8 : i32
    %11 = arith.cmpi eq, %arg1, %c8_i32 : i32
    %12 = arith.extui %11 : i1 to i32
    %c0_i32_10 = arith.constant 0 : i32
    %13 = arith.cmpi ne, %12, %c0_i32_10 : i32
    scf.if %13 {
      %c0_11 = arith.constant 0 : index
      %c0_12 = arith.constant 0 : index
      %14 = vector.load %arg5[%c0_11, %c0_12] : memref<512x128xf32, #tpu.memory_space<vmem>>, vector<512x128xf32>
      %c0_13 = arith.constant 0 : index
      %c0_14 = arith.constant 0 : index
      %15 = vector.load %arg4[%c0_13, %c0_14] : memref<512x128xf32, #tpu.memory_space<vmem>>, vector<512x128xf32>
      tpu.vector_store %arg4[%c0_13, %c0_14], %14 {strides = array<i32>} : memref<512x128xf32, #tpu.memory_space<vmem>>, vector<512x128xf32>,
    } else {
    }
    return
  }
  func.func @transform_0(%arg0: i32, %arg1: i32) -> (i32, i32, i32) {
    %c0_i32 = arith.constant 0 : i32
    %c0_i32_0 = arith.constant 0 : i32
    return %arg1, %arg0, %c0_i32 : i32, i32, i32
  }
  func.func @transform_1(%arg0: i32, %arg1: i32) -> (i32, i32, i32) {
    %c0_i32 = arith.constant 0 : i32
    %c0_i32_0 = arith.constant 0 : i32
    %c0_i32_1 = arith.constant 0 : i32
    return %arg1, %c0_i32, %c0_i32_0 : i32, i32, i32
  }
  func.func @transform_2(%arg0: i32, %arg1: i32) -> (i32, i32) {
    %c0_i32 = arith.constant 0 : i32
    %c0_i32_0 = arith.constant 0 : i32
    return %arg0, %c0_i32 : i32, i32
  }
}

module attributes {stable_mosaic.version = 11 : i64} {
  func.func @_bn_relu_matmul_kernel(%arg0: i32, %arg1: memref<512x128xf32, #tpu.memory_space<vmem>>, %arg2: memref<1x128xf32, #tpu.memory_space<vmem>>, %arg3: memref<1x128xf32, #tpu.memory_space<vmem>>, %arg4: memref<128x128xbf16, #tpu.memory_space<vmem>>, %arg5: memref<1x128xf32, #tpu.memory_space<vmem>>, %arg6: memref<512x128xf32, #tpu.memory_space<vmem>>) attributes {dimension_semantics = [#tpu.dimension_semantics<parallel>], iteration_bounds = array<i64: 4>, scalar_prefetch = 0 : i64, scratch_operands = 0 : i64, tpu.core_type = #tpu.core_type<tc>, window_params = [{transform_indices = @transform_0, window_bounds = array<i64: 512, 128>}, {pipeline_mode = #tpu.pipeline_mode<synchronous>, transform_indices = @transform_1, window_bounds = array<i64: 1, 128>}, {pipeline_mode = #tpu.pipeline_mode<synchronous>, transform_indices = @transform_2, window_bounds = array<i64: 1, 128>}, {pipeline_mode = #tpu.pipeline_mode<synchronous>, transform_indices = @transform_3, window_bounds = array<i64: 128, 128>}, {pipeline_mode = #tpu.pipeline_mode<synchronous>, transform_indices = @transform_4, window_bounds = array<i64: 1, 128>}, {transform_indices = @transform_5, window_bounds = array<i64: 512, 128>}]} {
    %c0 = arith.constant 0 : index
    %c0_0 = arith.constant 0 : index
    %0 = vector.load %arg1[%c0, %c0_0] : memref<512x128xf32, #tpu.memory_space<vmem>>, vector<512x128xf32>
    %c0_1 = arith.constant 0 : index
    %c0_2 = arith.constant 0 : index
    %1 = vector.load %arg2[%c0_1, %c0_2] : memref<1x128xf32, #tpu.memory_space<vmem>>, vector<1x128xf32>
    %2 = vector.broadcast %1 : vector<1x128xf32> to vector<512x128xf32>
    %3 = arith.mulf %0, %2 : vector<512x128xf32>
    %c0_3 = arith.constant 0 : index
    %c0_4 = arith.constant 0 : index
    %4 = vector.load %arg3[%c0_3, %c0_4] : memref<1x128xf32, #tpu.memory_space<vmem>>, vector<1x128xf32>
    %5 = vector.broadcast %4 : vector<1x128xf32> to vector<512x128xf32>
    %6 = arith.addf %3, %5 : vector<512x128xf32>
    %cst = arith.constant 0.000000e+00 : f32
    %7 = vector.broadcast %cst : f32 to vector<512x128xf32>
    %8 = arith.maximumf %6, %7 : vector<512x128xf32>
    %9 = arith.truncf %8 : vector<512x128xf32> to vector<512x128xbf16>
    %c0_5 = arith.constant 0 : index
    %c0_6 = arith.constant 0 : index
    %10 = vector.load %arg4[%c0_5, %c0_6] : memref<128x128xbf16, #tpu.memory_space<vmem>>, vector<128x128xbf16>
    %cst_7 = arith.constant dense<0.000000e+00> : vector<512x128xf32>
    %11 = tpu.matmul %9, %10, %cst_7 {dimension_numbers = #tpu.dot_dimension_numbers<[1], [0], [0], [1], [0, 0, 1, 1], [], []>} : vector<512x128xbf16>, vector<128x128xbf16>, vector<512x128xf32> -> vector<512x128xf32>
    %c0_8 = arith.constant 0 : index
    %c0_9 = arith.constant 0 : index
    %12 = vector.load %arg5[%c0_8, %c0_9] : memref<1x128xf32, #tpu.memory_space<vmem>>, vector<1x128xf32>
    %13 = vector.broadcast %12 : vector<1x128xf32> to vector<512x128xf32>
    %14 = arith.addf %11, %13 : vector<512x128xf32>
    %c0_10 = arith.constant 0 : index
    %c0_11 = arith.constant 0 : index
    %15 = vector.load %arg6[%c0_10, %c0_11] : memref<512x128xf32, #tpu.memory_space<vmem>>, vector<512x128xf32>
    tpu.vector_store %arg6[%c0_10, %c0_11], %14 {strides = array<i32>} : memref<512x128xf32, #tpu.memory_space<vmem>>, vector<512x128xf32>,
    return
  }
  func.func @transform_0(%arg0: i32) -> (i32, i32) {
    %c0_i32 = arith.constant 0 : i32
    %c0_i32_0 = arith.constant 0 : i32
    return %arg0, %c0_i32 : i32, i32
  }
  func.func @transform_1(%arg0: i32) -> (i32, i32) {
    %c0_i32 = arith.constant 0 : i32
    %c0_i32_0 = arith.constant 0 : i32
    %c0_i32_1 = arith.constant 0 : i32
    return %c0_i32, %c0_i32_0 : i32, i32
  }
  func.func @transform_2(%arg0: i32) -> (i32, i32) {
    %c0_i32 = arith.constant 0 : i32
    %c0_i32_0 = arith.constant 0 : i32
    %c0_i32_1 = arith.constant 0 : i32
    return %c0_i32, %c0_i32_0 : i32, i32
  }
  func.func @transform_3(%arg0: i32) -> (i32, i32) {
    %c0_i32 = arith.constant 0 : i32
    %c0_i32_0 = arith.constant 0 : i32
    %c0_i32_1 = arith.constant 0 : i32
    return %c0_i32, %c0_i32_0 : i32, i32
  }
  func.func @transform_4(%arg0: i32) -> (i32, i32) {
    %c0_i32 = arith.constant 0 : i32
    %c0_i32_0 = arith.constant 0 : i32
    %c0_i32_1 = arith.constant 0 : i32
    return %c0_i32, %c0_i32_0 : i32, i32
  }
  func.func @transform_5(%arg0: i32) -> (i32, i32) {
    %c0_i32 = arith.constant 0 : i32
    %c0_i32_0 = arith.constant 0 : i32
    return %arg0, %c0_i32 : i32, i32
  }
}

module attributes {stable_mosaic.version = 11 : i64} {
  func.func @_tap_matmul_kernel(%arg0: i32, %arg1: i32, %arg2: memref<1x512x128xbf16, #tpu.memory_space<vmem>>, %arg3: memref<1x128x128xbf16, #tpu.memory_space<vmem>>, %arg4: memref<512x128xf32, #tpu.memory_space<vmem>>, %arg5: memref<512x128xf32, #tpu.memory_space<vmem>>) attributes {dimension_semantics = [#tpu.dimension_semantics<parallel>, #tpu.dimension_semantics<arbitrary>], iteration_bounds = array<i64: 4, 9>, scalar_prefetch = 0 : i64, scratch_operands = 1 : i64, tpu.core_type = #tpu.core_type<tc>, window_params = [{transform_indices = @transform_0, window_bounds = array<i64: 1, 512, 128>}, {transform_indices = @transform_1, window_bounds = array<i64: 1, 128, 128>}, {transform_indices = @transform_2, window_bounds = array<i64: 512, 128>}]} {
    %c0_i32 = arith.constant 0 : i32
    %0 = arith.cmpi eq, %arg1, %c0_i32 : i32
    %1 = arith.extui %0 : i1 to i32
    %c0_i32_0 = arith.constant 0 : i32
    %2 = arith.cmpi ne, %1, %c0_i32_0 : i32
    scf.if %2 {
      %cst_11 = arith.constant 0.000000e+00 : f32
      %14 = vector.broadcast %cst_11 : f32 to vector<512x128xf32>
      %c0_12 = arith.constant 0 : index
      %c0_13 = arith.constant 0 : index
      %15 = vector.load %arg5[%c0_12, %c0_13] : memref<512x128xf32, #tpu.memory_space<vmem>>, vector<512x128xf32>
      tpu.vector_store %arg5[%c0_12, %c0_13], %14 {strides = array<i32>} : memref<512x128xf32, #tpu.memory_space<vmem>>, vector<512x128xf32>,
    } else {
    }
    %c0 = arith.constant 0 : index
    %c0_1 = arith.constant 0 : index
    %3 = vector.load %arg5[%c0, %c0_1] : memref<512x128xf32, #tpu.memory_space<vmem>>, vector<512x128xf32>
    %c0_2 = arith.constant 0 : index
    %c0_3 = arith.constant 0 : index
    %c0_4 = arith.constant 0 : index
    %4 = vector.load %arg2[%c0_2, %c0_3, %c0_4] : memref<1x512x128xbf16, #tpu.memory_space<vmem>>, vector<1x512x128xbf16>
    %5 = vector.shape_cast %4 : vector<1x512x128xbf16> to vector<512x128xbf16>
    %c0_5 = arith.constant 0 : index
    %c0_6 = arith.constant 0 : index
    %c0_7 = arith.constant 0 : index
    %6 = vector.load %arg3[%c0_5, %c0_6, %c0_7] : memref<1x128x128xbf16, #tpu.memory_space<vmem>>, vector<1x128x128xbf16>
    %7 = vector.shape_cast %6 : vector<1x128x128xbf16> to vector<128x128xbf16>
    %cst = arith.constant dense<0.000000e+00> : vector<512x128xf32>
    %8 = tpu.matmul %5, %7, %cst {dimension_numbers = #tpu.dot_dimension_numbers<[1], [0], [0], [1], [0, 0, 1, 1], [], []>} : vector<512x128xbf16>, vector<128x128xbf16>, vector<512x128xf32> -> vector<512x128xf32>
    %9 = arith.addf %3, %8 : vector<512x128xf32>
    %c0_8 = arith.constant 0 : index
    %c0_9 = arith.constant 0 : index
    %10 = vector.load %arg5[%c0_8, %c0_9] : memref<512x128xf32, #tpu.memory_space<vmem>>, vector<512x128xf32>
    tpu.vector_store %arg5[%c0_8, %c0_9], %9 {strides = array<i32>} : memref<512x128xf32, #tpu.memory_space<vmem>>, vector<512x128xf32>,
    %c8_i32 = arith.constant 8 : i32
    %11 = arith.cmpi eq, %arg1, %c8_i32 : i32
    %12 = arith.extui %11 : i1 to i32
    %c0_i32_10 = arith.constant 0 : i32
    %13 = arith.cmpi ne, %12, %c0_i32_10 : i32
    scf.if %13 {
      %c0_11 = arith.constant 0 : index
      %c0_12 = arith.constant 0 : index
      %14 = vector.load %arg5[%c0_11, %c0_12] : memref<512x128xf32, #tpu.memory_space<vmem>>, vector<512x128xf32>
      %c0_13 = arith.constant 0 : index
      %c0_14 = arith.constant 0 : index
      %15 = vector.load %arg4[%c0_13, %c0_14] : memref<512x128xf32, #tpu.memory_space<vmem>>, vector<512x128xf32>
      tpu.vector_store %arg4[%c0_13, %c0_14], %14 {strides = array<i32>} : memref<512x128xf32, #tpu.memory_space<vmem>>, vector<512x128xf32>,
    } else {
    }
    return
  }
  func.func @transform_0(%arg0: i32, %arg1: i32) -> (i32, i32, i32) {
    %c0_i32 = arith.constant 0 : i32
    %c0_i32_0 = arith.constant 0 : i32
    return %arg1, %arg0, %c0_i32 : i32, i32, i32
  }
  func.func @transform_1(%arg0: i32, %arg1: i32) -> (i32, i32, i32) {
    %c0_i32 = arith.constant 0 : i32
    %c0_i32_0 = arith.constant 0 : i32
    %c0_i32_1 = arith.constant 0 : i32
    return %arg1, %c0_i32, %c0_i32_0 : i32, i32, i32
  }
  func.func @transform_2(%arg0: i32, %arg1: i32) -> (i32, i32) {
    %c0_i32 = arith.constant 0 : i32
    %c0_i32_0 = arith.constant 0 : i32
    return %arg0, %c0_i32 : i32, i32
  }
}

module attributes {stable_mosaic.version = 11 : i64} {
  func.func @_bn_relu_matmul_kernel(%arg0: i32, %arg1: memref<256x128xf32, #tpu.memory_space<vmem>>, %arg2: memref<1x128xf32, #tpu.memory_space<vmem>>, %arg3: memref<1x128xf32, #tpu.memory_space<vmem>>, %arg4: memref<128x128xbf16, #tpu.memory_space<vmem>>, %arg5: memref<1x128xf32, #tpu.memory_space<vmem>>, %arg6: memref<256x128xf32, #tpu.memory_space<vmem>>) attributes {dimension_semantics = [#tpu.dimension_semantics<parallel>], iteration_bounds = array<i64: 2>, scalar_prefetch = 0 : i64, scratch_operands = 0 : i64, tpu.core_type = #tpu.core_type<tc>, window_params = [{transform_indices = @transform_0, window_bounds = array<i64: 256, 128>}, {pipeline_mode = #tpu.pipeline_mode<synchronous>, transform_indices = @transform_1, window_bounds = array<i64: 1, 128>}, {pipeline_mode = #tpu.pipeline_mode<synchronous>, transform_indices = @transform_2, window_bounds = array<i64: 1, 128>}, {pipeline_mode = #tpu.pipeline_mode<synchronous>, transform_indices = @transform_3, window_bounds = array<i64: 128, 128>}, {pipeline_mode = #tpu.pipeline_mode<synchronous>, transform_indices = @transform_4, window_bounds = array<i64: 1, 128>}, {transform_indices = @transform_5, window_bounds = array<i64: 256, 128>}]} {
    %c0 = arith.constant 0 : index
    %c0_0 = arith.constant 0 : index
    %0 = vector.load %arg1[%c0, %c0_0] : memref<256x128xf32, #tpu.memory_space<vmem>>, vector<256x128xf32>
    %c0_1 = arith.constant 0 : index
    %c0_2 = arith.constant 0 : index
    %1 = vector.load %arg2[%c0_1, %c0_2] : memref<1x128xf32, #tpu.memory_space<vmem>>, vector<1x128xf32>
    %2 = vector.broadcast %1 : vector<1x128xf32> to vector<256x128xf32>
    %3 = arith.mulf %0, %2 : vector<256x128xf32>
    %c0_3 = arith.constant 0 : index
    %c0_4 = arith.constant 0 : index
    %4 = vector.load %arg3[%c0_3, %c0_4] : memref<1x128xf32, #tpu.memory_space<vmem>>, vector<1x128xf32>
    %5 = vector.broadcast %4 : vector<1x128xf32> to vector<256x128xf32>
    %6 = arith.addf %3, %5 : vector<256x128xf32>
    %cst = arith.constant 0.000000e+00 : f32
    %7 = vector.broadcast %cst : f32 to vector<256x128xf32>
    %8 = arith.maximumf %6, %7 : vector<256x128xf32>
    %9 = arith.truncf %8 : vector<256x128xf32> to vector<256x128xbf16>
    %c0_5 = arith.constant 0 : index
    %c0_6 = arith.constant 0 : index
    %10 = vector.load %arg4[%c0_5, %c0_6] : memref<128x128xbf16, #tpu.memory_space<vmem>>, vector<128x128xbf16>
    %cst_7 = arith.constant dense<0.000000e+00> : vector<256x128xf32>
    %11 = tpu.matmul %9, %10, %cst_7 {dimension_numbers = #tpu.dot_dimension_numbers<[1], [0], [0], [1], [0, 0, 1, 1], [], []>} : vector<256x128xbf16>, vector<128x128xbf16>, vector<256x128xf32> -> vector<256x128xf32>
    %c0_8 = arith.constant 0 : index
    %c0_9 = arith.constant 0 : index
    %12 = vector.load %arg5[%c0_8, %c0_9] : memref<1x128xf32, #tpu.memory_space<vmem>>, vector<1x128xf32>
    %13 = vector.broadcast %12 : vector<1x128xf32> to vector<256x128xf32>
    %14 = arith.addf %11, %13 : vector<256x128xf32>
    %c0_10 = arith.constant 0 : index
    %c0_11 = arith.constant 0 : index
    %15 = vector.load %arg6[%c0_10, %c0_11] : memref<256x128xf32, #tpu.memory_space<vmem>>, vector<256x128xf32>
    tpu.vector_store %arg6[%c0_10, %c0_11], %14 {strides = array<i32>} : memref<256x128xf32, #tpu.memory_space<vmem>>, vector<256x128xf32>,
    return
  }
  func.func @transform_0(%arg0: i32) -> (i32, i32) {
    %c0_i32 = arith.constant 0 : i32
    %c0_i32_0 = arith.constant 0 : i32
    return %arg0, %c0_i32 : i32, i32
  }
  func.func @transform_1(%arg0: i32) -> (i32, i32) {
    %c0_i32 = arith.constant 0 : i32
    %c0_i32_0 = arith.constant 0 : i32
    %c0_i32_1 = arith.constant 0 : i32
    return %c0_i32, %c0_i32_0 : i32, i32
  }
  func.func @transform_2(%arg0: i32) -> (i32, i32) {
    %c0_i32 = arith.constant 0 : i32
    %c0_i32_0 = arith.constant 0 : i32
    %c0_i32_1 = arith.constant 0 : i32
    return %c0_i32, %c0_i32_0 : i32, i32
  }
  func.func @transform_3(%arg0: i32) -> (i32, i32) {
    %c0_i32 = arith.constant 0 : i32
    %c0_i32_0 = arith.constant 0 : i32
    %c0_i32_1 = arith.constant 0 : i32
    return %c0_i32, %c0_i32_0 : i32, i32
  }
  func.func @transform_4(%arg0: i32) -> (i32, i32) {
    %c0_i32 = arith.constant 0 : i32
    %c0_i32_0 = arith.constant 0 : i32
    %c0_i32_1 = arith.constant 0 : i32
    return %c0_i32, %c0_i32_0 : i32, i32
  }
  func.func @transform_5(%arg0: i32) -> (i32, i32) {
    %c0_i32 = arith.constant 0 : i32
    %c0_i32_0 = arith.constant 0 : i32
    return %arg0, %c0_i32 : i32, i32
  }
}

module attributes {stable_mosaic.version = 11 : i64} {
  func.func @_tap_matmul_kernel(%arg0: i32, %arg1: i32, %arg2: memref<1x256x128xbf16, #tpu.memory_space<vmem>>, %arg3: memref<1x128x128xbf16, #tpu.memory_space<vmem>>, %arg4: memref<256x128xf32, #tpu.memory_space<vmem>>, %arg5: memref<256x128xf32, #tpu.memory_space<vmem>>) attributes {dimension_semantics = [#tpu.dimension_semantics<parallel>, #tpu.dimension_semantics<arbitrary>], iteration_bounds = array<i64: 2, 9>, scalar_prefetch = 0 : i64, scratch_operands = 1 : i64, tpu.core_type = #tpu.core_type<tc>, window_params = [{transform_indices = @transform_0, window_bounds = array<i64: 1, 256, 128>}, {transform_indices = @transform_1, window_bounds = array<i64: 1, 128, 128>}, {transform_indices = @transform_2, window_bounds = array<i64: 256, 128>}]} {
    %c0_i32 = arith.constant 0 : i32
    %0 = arith.cmpi eq, %arg1, %c0_i32 : i32
    %1 = arith.extui %0 : i1 to i32
    %c0_i32_0 = arith.constant 0 : i32
    %2 = arith.cmpi ne, %1, %c0_i32_0 : i32
    scf.if %2 {
      %cst_11 = arith.constant 0.000000e+00 : f32
      %14 = vector.broadcast %cst_11 : f32 to vector<256x128xf32>
      %c0_12 = arith.constant 0 : index
      %c0_13 = arith.constant 0 : index
      %15 = vector.load %arg5[%c0_12, %c0_13] : memref<256x128xf32, #tpu.memory_space<vmem>>, vector<256x128xf32>
      tpu.vector_store %arg5[%c0_12, %c0_13], %14 {strides = array<i32>} : memref<256x128xf32, #tpu.memory_space<vmem>>, vector<256x128xf32>,
    } else {
    }
    %c0 = arith.constant 0 : index
    %c0_1 = arith.constant 0 : index
    %3 = vector.load %arg5[%c0, %c0_1] : memref<256x128xf32, #tpu.memory_space<vmem>>, vector<256x128xf32>
    %c0_2 = arith.constant 0 : index
    %c0_3 = arith.constant 0 : index
    %c0_4 = arith.constant 0 : index
    %4 = vector.load %arg2[%c0_2, %c0_3, %c0_4] : memref<1x256x128xbf16, #tpu.memory_space<vmem>>, vector<1x256x128xbf16>
    %5 = vector.shape_cast %4 : vector<1x256x128xbf16> to vector<256x128xbf16>
    %c0_5 = arith.constant 0 : index
    %c0_6 = arith.constant 0 : index
    %c0_7 = arith.constant 0 : index
    %6 = vector.load %arg3[%c0_5, %c0_6, %c0_7] : memref<1x128x128xbf16, #tpu.memory_space<vmem>>, vector<1x128x128xbf16>
    %7 = vector.shape_cast %6 : vector<1x128x128xbf16> to vector<128x128xbf16>
    %cst = arith.constant dense<0.000000e+00> : vector<256x128xf32>
    %8 = tpu.matmul %5, %7, %cst {dimension_numbers = #tpu.dot_dimension_numbers<[1], [0], [0], [1], [0, 0, 1, 1], [], []>} : vector<256x128xbf16>, vector<128x128xbf16>, vector<256x128xf32> -> vector<256x128xf32>
    %9 = arith.addf %3, %8 : vector<256x128xf32>
    %c0_8 = arith.constant 0 : index
    %c0_9 = arith.constant 0 : index
    %10 = vector.load %arg5[%c0_8, %c0_9] : memref<256x128xf32, #tpu.memory_space<vmem>>, vector<256x128xf32>
    tpu.vector_store %arg5[%c0_8, %c0_9], %9 {strides = array<i32>} : memref<256x128xf32, #tpu.memory_space<vmem>>, vector<256x128xf32>,
    %c8_i32 = arith.constant 8 : i32
    %11 = arith.cmpi eq, %arg1, %c8_i32 : i32
    %12 = arith.extui %11 : i1 to i32
    %c0_i32_10 = arith.constant 0 : i32
    %13 = arith.cmpi ne, %12, %c0_i32_10 : i32
    scf.if %13 {
      %c0_11 = arith.constant 0 : index
      %c0_12 = arith.constant 0 : index
      %14 = vector.load %arg5[%c0_11, %c0_12] : memref<256x128xf32, #tpu.memory_space<vmem>>, vector<256x128xf32>
      %c0_13 = arith.constant 0 : index
      %c0_14 = arith.constant 0 : index
      %15 = vector.load %arg4[%c0_13, %c0_14] : memref<256x128xf32, #tpu.memory_space<vmem>>, vector<256x128xf32>
      tpu.vector_store %arg4[%c0_13, %c0_14], %14 {strides = array<i32>} : memref<256x128xf32, #tpu.memory_space<vmem>>, vector<256x128xf32>,
    } else {
    }
    return
  }
  func.func @transform_0(%arg0: i32, %arg1: i32) -> (i32, i32, i32) {
    %c0_i32 = arith.constant 0 : i32
    %c0_i32_0 = arith.constant 0 : i32
    return %arg1, %arg0, %c0_i32 : i32, i32, i32
  }
  func.func @transform_1(%arg0: i32, %arg1: i32) -> (i32, i32, i32) {
    %c0_i32 = arith.constant 0 : i32
    %c0_i32_0 = arith.constant 0 : i32
    %c0_i32_1 = arith.constant 0 : i32
    return %arg1, %c0_i32, %c0_i32_0 : i32, i32, i32
  }
  func.func @transform_2(%arg0: i32, %arg1: i32) -> (i32, i32) {
    %c0_i32 = arith.constant 0 : i32
    %c0_i32_0 = arith.constant 0 : i32
    return %arg0, %c0_i32 : i32, i32
  }
}

module attributes {stable_mosaic.version = 11 : i64} {
  func.func @_bn_relu_matmul_kernel(%arg0: i32, %arg1: memref<64x128xf32, #tpu.memory_space<vmem>>, %arg2: memref<1x128xf32, #tpu.memory_space<vmem>>, %arg3: memref<1x128xf32, #tpu.memory_space<vmem>>, %arg4: memref<128x128xbf16, #tpu.memory_space<vmem>>, %arg5: memref<1x128xf32, #tpu.memory_space<vmem>>, %arg6: memref<64x128xf32, #tpu.memory_space<vmem>>) attributes {dimension_semantics = [#tpu.dimension_semantics<parallel>], iteration_bounds = array<i64: 2>, scalar_prefetch = 0 : i64, scratch_operands = 0 : i64, tpu.core_type = #tpu.core_type<tc>, window_params = [{transform_indices = @transform_0, window_bounds = array<i64: 64, 128>}, {pipeline_mode = #tpu.pipeline_mode<synchronous>, transform_indices = @transform_1, window_bounds = array<i64: 1, 128>}, {pipeline_mode = #tpu.pipeline_mode<synchronous>, transform_indices = @transform_2, window_bounds = array<i64: 1, 128>}, {pipeline_mode = #tpu.pipeline_mode<synchronous>, transform_indices = @transform_3, window_bounds = array<i64: 128, 128>}, {pipeline_mode = #tpu.pipeline_mode<synchronous>, transform_indices = @transform_4, window_bounds = array<i64: 1, 128>}, {transform_indices = @transform_5, window_bounds = array<i64: 64, 128>}]} {
    %c0 = arith.constant 0 : index
    %c0_0 = arith.constant 0 : index
    %0 = vector.load %arg1[%c0, %c0_0] : memref<64x128xf32, #tpu.memory_space<vmem>>, vector<64x128xf32>
    %c0_1 = arith.constant 0 : index
    %c0_2 = arith.constant 0 : index
    %1 = vector.load %arg2[%c0_1, %c0_2] : memref<1x128xf32, #tpu.memory_space<vmem>>, vector<1x128xf32>
    %2 = vector.broadcast %1 : vector<1x128xf32> to vector<64x128xf32>
    %3 = arith.mulf %0, %2 : vector<64x128xf32>
    %c0_3 = arith.constant 0 : index
    %c0_4 = arith.constant 0 : index
    %4 = vector.load %arg3[%c0_3, %c0_4] : memref<1x128xf32, #tpu.memory_space<vmem>>, vector<1x128xf32>
    %5 = vector.broadcast %4 : vector<1x128xf32> to vector<64x128xf32>
    %6 = arith.addf %3, %5 : vector<64x128xf32>
    %cst = arith.constant 0.000000e+00 : f32
    %7 = vector.broadcast %cst : f32 to vector<64x128xf32>
    %8 = arith.maximumf %6, %7 : vector<64x128xf32>
    %9 = arith.truncf %8 : vector<64x128xf32> to vector<64x128xbf16>
    %c0_5 = arith.constant 0 : index
    %c0_6 = arith.constant 0 : index
    %10 = vector.load %arg4[%c0_5, %c0_6] : memref<128x128xbf16, #tpu.memory_space<vmem>>, vector<128x128xbf16>
    %cst_7 = arith.constant dense<0.000000e+00> : vector<64x128xf32>
    %11 = tpu.matmul %9, %10, %cst_7 {dimension_numbers = #tpu.dot_dimension_numbers<[1], [0], [0], [1], [0, 0, 1, 1], [], []>} : vector<64x128xbf16>, vector<128x128xbf16>, vector<64x128xf32> -> vector<64x128xf32>
    %c0_8 = arith.constant 0 : index
    %c0_9 = arith.constant 0 : index
    %12 = vector.load %arg5[%c0_8, %c0_9] : memref<1x128xf32, #tpu.memory_space<vmem>>, vector<1x128xf32>
    %13 = vector.broadcast %12 : vector<1x128xf32> to vector<64x128xf32>
    %14 = arith.addf %11, %13 : vector<64x128xf32>
    %c0_10 = arith.constant 0 : index
    %c0_11 = arith.constant 0 : index
    %15 = vector.load %arg6[%c0_10, %c0_11] : memref<64x128xf32, #tpu.memory_space<vmem>>, vector<64x128xf32>
    tpu.vector_store %arg6[%c0_10, %c0_11], %14 {strides = array<i32>} : memref<64x128xf32, #tpu.memory_space<vmem>>, vector<64x128xf32>,
    return
  }
  func.func @transform_0(%arg0: i32) -> (i32, i32) {
    %c0_i32 = arith.constant 0 : i32
    %c0_i32_0 = arith.constant 0 : i32
    return %arg0, %c0_i32 : i32, i32
  }
  func.func @transform_1(%arg0: i32) -> (i32, i32) {
    %c0_i32 = arith.constant 0 : i32
    %c0_i32_0 = arith.constant 0 : i32
    %c0_i32_1 = arith.constant 0 : i32
    return %c0_i32, %c0_i32_0 : i32, i32
  }
  func.func @transform_2(%arg0: i32) -> (i32, i32) {
    %c0_i32 = arith.constant 0 : i32
    %c0_i32_0 = arith.constant 0 : i32
    %c0_i32_1 = arith.constant 0 : i32
    return %c0_i32, %c0_i32_0 : i32, i32
  }
  func.func @transform_3(%arg0: i32) -> (i32, i32) {
    %c0_i32 = arith.constant 0 : i32
    %c0_i32_0 = arith.constant 0 : i32
    %c0_i32_1 = arith.constant 0 : i32
    return %c0_i32, %c0_i32_0 : i32, i32
  }
  func.func @transform_4(%arg0: i32) -> (i32, i32) {
    %c0_i32 = arith.constant 0 : i32
    %c0_i32_0 = arith.constant 0 : i32
    %c0_i32_1 = arith.constant 0 : i32
    return %c0_i32, %c0_i32_0 : i32, i32
  }
  func.func @transform_5(%arg0: i32) -> (i32, i32) {
    %c0_i32 = arith.constant 0 : i32
    %c0_i32_0 = arith.constant 0 : i32
    return %arg0, %c0_i32 : i32, i32
  }
}

module attributes {stable_mosaic.version = 11 : i64} {
  func.func @_tap_matmul_kernel(%arg0: i32, %arg1: i32, %arg2: memref<1x64x128xbf16, #tpu.memory_space<vmem>>, %arg3: memref<1x128x128xbf16, #tpu.memory_space<vmem>>, %arg4: memref<64x128xf32, #tpu.memory_space<vmem>>, %arg5: memref<64x128xf32, #tpu.memory_space<vmem>>) attributes {dimension_semantics = [#tpu.dimension_semantics<parallel>, #tpu.dimension_semantics<arbitrary>], iteration_bounds = array<i64: 2, 9>, scalar_prefetch = 0 : i64, scratch_operands = 1 : i64, tpu.core_type = #tpu.core_type<tc>, window_params = [{transform_indices = @transform_0, window_bounds = array<i64: 1, 64, 128>}, {transform_indices = @transform_1, window_bounds = array<i64: 1, 128, 128>}, {transform_indices = @transform_2, window_bounds = array<i64: 64, 128>}]} {
    %c0_i32 = arith.constant 0 : i32
    %0 = arith.cmpi eq, %arg1, %c0_i32 : i32
    %1 = arith.extui %0 : i1 to i32
    %c0_i32_0 = arith.constant 0 : i32
    %2 = arith.cmpi ne, %1, %c0_i32_0 : i32
    scf.if %2 {
      %cst_11 = arith.constant 0.000000e+00 : f32
      %14 = vector.broadcast %cst_11 : f32 to vector<64x128xf32>
      %c0_12 = arith.constant 0 : index
      %c0_13 = arith.constant 0 : index
      %15 = vector.load %arg5[%c0_12, %c0_13] : memref<64x128xf32, #tpu.memory_space<vmem>>, vector<64x128xf32>
      tpu.vector_store %arg5[%c0_12, %c0_13], %14 {strides = array<i32>} : memref<64x128xf32, #tpu.memory_space<vmem>>, vector<64x128xf32>,
    } else {
    }
    %c0 = arith.constant 0 : index
    %c0_1 = arith.constant 0 : index
    %3 = vector.load %arg5[%c0, %c0_1] : memref<64x128xf32, #tpu.memory_space<vmem>>, vector<64x128xf32>
    %c0_2 = arith.constant 0 : index
    %c0_3 = arith.constant 0 : index
    %c0_4 = arith.constant 0 : index
    %4 = vector.load %arg2[%c0_2, %c0_3, %c0_4] : memref<1x64x128xbf16, #tpu.memory_space<vmem>>, vector<1x64x128xbf16>
    %5 = vector.shape_cast %4 : vector<1x64x128xbf16> to vector<64x128xbf16>
    %c0_5 = arith.constant 0 : index
    %c0_6 = arith.constant 0 : index
    %c0_7 = arith.constant 0 : index
    %6 = vector.load %arg3[%c0_5, %c0_6, %c0_7] : memref<1x128x128xbf16, #tpu.memory_space<vmem>>, vector<1x128x128xbf16>
    %7 = vector.shape_cast %6 : vector<1x128x128xbf16> to vector<128x128xbf16>
    %cst = arith.constant dense<0.000000e+00> : vector<64x128xf32>
    %8 = tpu.matmul %5, %7, %cst {dimension_numbers = #tpu.dot_dimension_numbers<[1], [0], [0], [1], [0, 0, 1, 1], [], []>} : vector<64x128xbf16>, vector<128x128xbf16>, vector<64x128xf32> -> vector<64x128xf32>
    %9 = arith.addf %3, %8 : vector<64x128xf32>
    %c0_8 = arith.constant 0 : index
    %c0_9 = arith.constant 0 : index
    %10 = vector.load %arg5[%c0_8, %c0_9] : memref<64x128xf32, #tpu.memory_space<vmem>>, vector<64x128xf32>
    tpu.vector_store %arg5[%c0_8, %c0_9], %9 {strides = array<i32>} : memref<64x128xf32, #tpu.memory_space<vmem>>, vector<64x128xf32>,
    %c8_i32 = arith.constant 8 : i32
    %11 = arith.cmpi eq, %arg1, %c8_i32 : i32
    %12 = arith.extui %11 : i1 to i32
    %c0_i32_10 = arith.constant 0 : i32
    %13 = arith.cmpi ne, %12, %c0_i32_10 : i32
    scf.if %13 {
      %c0_11 = arith.constant 0 : index
      %c0_12 = arith.constant 0 : index
      %14 = vector.load %arg5[%c0_11, %c0_12] : memref<64x128xf32, #tpu.memory_space<vmem>>, vector<64x128xf32>
      %c0_13 = arith.constant 0 : index
      %c0_14 = arith.constant 0 : index
      %15 = vector.load %arg4[%c0_13, %c0_14] : memref<64x128xf32, #tpu.memory_space<vmem>>, vector<64x128xf32>
      tpu.vector_store %arg4[%c0_13, %c0_14], %14 {strides = array<i32>} : memref<64x128xf32, #tpu.memory_space<vmem>>, vector<64x128xf32>,
    } else {
    }
    return
  }
  func.func @transform_0(%arg0: i32, %arg1: i32) -> (i32, i32, i32) {
    %c0_i32 = arith.constant 0 : i32
    %c0_i32_0 = arith.constant 0 : i32
    return %arg1, %arg0, %c0_i32 : i32, i32, i32
  }
  func.func @transform_1(%arg0: i32, %arg1: i32) -> (i32, i32, i32) {
    %c0_i32 = arith.constant 0 : i32
    %c0_i32_0 = arith.constant 0 : i32
    %c0_i32_1 = arith.constant 0 : i32
    return %arg1, %c0_i32, %c0_i32_0 : i32, i32, i32
  }
  func.func @transform_2(%arg0: i32, %arg1: i32) -> (i32, i32) {
    %c0_i32 = arith.constant 0 : i32
    %c0_i32_0 = arith.constant 0 : i32
    return %arg0, %c0_i32 : i32, i32
  }
}

module attributes {stable_mosaic.version = 11 : i64} {
  func.func @_bn_relu_matmul_kernel(%arg0: i32, %arg1: memref<16x128xf32, #tpu.memory_space<vmem>>, %arg2: memref<1x128xf32, #tpu.memory_space<vmem>>, %arg3: memref<1x128xf32, #tpu.memory_space<vmem>>, %arg4: memref<128x128xbf16, #tpu.memory_space<vmem>>, %arg5: memref<1x128xf32, #tpu.memory_space<vmem>>, %arg6: memref<16x128xf32, #tpu.memory_space<vmem>>) attributes {dimension_semantics = [#tpu.dimension_semantics<parallel>], iteration_bounds = array<i64: 2>, scalar_prefetch = 0 : i64, scratch_operands = 0 : i64, tpu.core_type = #tpu.core_type<tc>, window_params = [{transform_indices = @transform_0, window_bounds = array<i64: 16, 128>}, {pipeline_mode = #tpu.pipeline_mode<synchronous>, transform_indices = @transform_1, window_bounds = array<i64: 1, 128>}, {pipeline_mode = #tpu.pipeline_mode<synchronous>, transform_indices = @transform_2, window_bounds = array<i64: 1, 128>}, {pipeline_mode = #tpu.pipeline_mode<synchronous>, transform_indices = @transform_3, window_bounds = array<i64: 128, 128>}, {pipeline_mode = #tpu.pipeline_mode<synchronous>, transform_indices = @transform_4, window_bounds = array<i64: 1, 128>}, {transform_indices = @transform_5, window_bounds = array<i64: 16, 128>}]} {
    %c0 = arith.constant 0 : index
    %c0_0 = arith.constant 0 : index
    %0 = vector.load %arg1[%c0, %c0_0] : memref<16x128xf32, #tpu.memory_space<vmem>>, vector<16x128xf32>
    %c0_1 = arith.constant 0 : index
    %c0_2 = arith.constant 0 : index
    %1 = vector.load %arg2[%c0_1, %c0_2] : memref<1x128xf32, #tpu.memory_space<vmem>>, vector<1x128xf32>
    %2 = vector.broadcast %1 : vector<1x128xf32> to vector<16x128xf32>
    %3 = arith.mulf %0, %2 : vector<16x128xf32>
    %c0_3 = arith.constant 0 : index
    %c0_4 = arith.constant 0 : index
    %4 = vector.load %arg3[%c0_3, %c0_4] : memref<1x128xf32, #tpu.memory_space<vmem>>, vector<1x128xf32>
    %5 = vector.broadcast %4 : vector<1x128xf32> to vector<16x128xf32>
    %6 = arith.addf %3, %5 : vector<16x128xf32>
    %cst = arith.constant 0.000000e+00 : f32
    %7 = vector.broadcast %cst : f32 to vector<16x128xf32>
    %8 = arith.maximumf %6, %7 : vector<16x128xf32>
    %9 = arith.truncf %8 : vector<16x128xf32> to vector<16x128xbf16>
    %c0_5 = arith.constant 0 : index
    %c0_6 = arith.constant 0 : index
    %10 = vector.load %arg4[%c0_5, %c0_6] : memref<128x128xbf16, #tpu.memory_space<vmem>>, vector<128x128xbf16>
    %cst_7 = arith.constant dense<0.000000e+00> : vector<16x128xf32>
    %11 = tpu.matmul %9, %10, %cst_7 {dimension_numbers = #tpu.dot_dimension_numbers<[1], [0], [0], [1], [0, 0, 1, 1], [], []>} : vector<16x128xbf16>, vector<128x128xbf16>, vector<16x128xf32> -> vector<16x128xf32>
    %c0_8 = arith.constant 0 : index
    %c0_9 = arith.constant 0 : index
    %12 = vector.load %arg5[%c0_8, %c0_9] : memref<1x128xf32, #tpu.memory_space<vmem>>, vector<1x128xf32>
    %13 = vector.broadcast %12 : vector<1x128xf32> to vector<16x128xf32>
    %14 = arith.addf %11, %13 : vector<16x128xf32>
    %c0_10 = arith.constant 0 : index
    %c0_11 = arith.constant 0 : index
    %15 = vector.load %arg6[%c0_10, %c0_11] : memref<16x128xf32, #tpu.memory_space<vmem>>, vector<16x128xf32>
    tpu.vector_store %arg6[%c0_10, %c0_11], %14 {strides = array<i32>} : memref<16x128xf32, #tpu.memory_space<vmem>>, vector<16x128xf32>,
    return
  }
  func.func @transform_0(%arg0: i32) -> (i32, i32) {
    %c0_i32 = arith.constant 0 : i32
    %c0_i32_0 = arith.constant 0 : i32
    return %arg0, %c0_i32 : i32, i32
  }
  func.func @transform_1(%arg0: i32) -> (i32, i32) {
    %c0_i32 = arith.constant 0 : i32
    %c0_i32_0 = arith.constant 0 : i32
    %c0_i32_1 = arith.constant 0 : i32
    return %c0_i32, %c0_i32_0 : i32, i32
  }
  func.func @transform_2(%arg0: i32) -> (i32, i32) {
    %c0_i32 = arith.constant 0 : i32
    %c0_i32_0 = arith.constant 0 : i32
    %c0_i32_1 = arith.constant 0 : i32
    return %c0_i32, %c0_i32_0 : i32, i32
  }
  func.func @transform_3(%arg0: i32) -> (i32, i32) {
    %c0_i32 = arith.constant 0 : i32
    %c0_i32_0 = arith.constant 0 : i32
    %c0_i32_1 = arith.constant 0 : i32
    return %c0_i32, %c0_i32_0 : i32, i32
  }
  func.func @transform_4(%arg0: i32) -> (i32, i32) {
    %c0_i32 = arith.constant 0 : i32
    %c0_i32_0 = arith.constant 0 : i32
    %c0_i32_1 = arith.constant 0 : i32
    return %c0_i32, %c0_i32_0 : i32, i32
  }
  func.func @transform_5(%arg0: i32) -> (i32, i32) {
    %c0_i32 = arith.constant 0 : i32
    %c0_i32_0 = arith.constant 0 : i32
    return %arg0, %c0_i32 : i32, i32
  }
}

module attributes {stable_mosaic.version = 11 : i64} {
  func.func @_tap_matmul_kernel(%arg0: i32, %arg1: i32, %arg2: memref<1x16x128xbf16, #tpu.memory_space<vmem>>, %arg3: memref<1x128x128xbf16, #tpu.memory_space<vmem>>, %arg4: memref<16x128xf32, #tpu.memory_space<vmem>>, %arg5: memref<16x128xf32, #tpu.memory_space<vmem>>) attributes {dimension_semantics = [#tpu.dimension_semantics<parallel>, #tpu.dimension_semantics<arbitrary>], iteration_bounds = array<i64: 2, 9>, scalar_prefetch = 0 : i64, scratch_operands = 1 : i64, tpu.core_type = #tpu.core_type<tc>, window_params = [{transform_indices = @transform_0, window_bounds = array<i64: 1, 16, 128>}, {transform_indices = @transform_1, window_bounds = array<i64: 1, 128, 128>}, {transform_indices = @transform_2, window_bounds = array<i64: 16, 128>}]} {
    %c0_i32 = arith.constant 0 : i32
    %0 = arith.cmpi eq, %arg1, %c0_i32 : i32
    %1 = arith.extui %0 : i1 to i32
    %c0_i32_0 = arith.constant 0 : i32
    %2 = arith.cmpi ne, %1, %c0_i32_0 : i32
    scf.if %2 {
      %cst_11 = arith.constant 0.000000e+00 : f32
      %14 = vector.broadcast %cst_11 : f32 to vector<16x128xf32>
      %c0_12 = arith.constant 0 : index
      %c0_13 = arith.constant 0 : index
      %15 = vector.load %arg5[%c0_12, %c0_13] : memref<16x128xf32, #tpu.memory_space<vmem>>, vector<16x128xf32>
      tpu.vector_store %arg5[%c0_12, %c0_13], %14 {strides = array<i32>} : memref<16x128xf32, #tpu.memory_space<vmem>>, vector<16x128xf32>,
    } else {
    }
    %c0 = arith.constant 0 : index
    %c0_1 = arith.constant 0 : index
    %3 = vector.load %arg5[%c0, %c0_1] : memref<16x128xf32, #tpu.memory_space<vmem>>, vector<16x128xf32>
    %c0_2 = arith.constant 0 : index
    %c0_3 = arith.constant 0 : index
    %c0_4 = arith.constant 0 : index
    %4 = vector.load %arg2[%c0_2, %c0_3, %c0_4] : memref<1x16x128xbf16, #tpu.memory_space<vmem>>, vector<1x16x128xbf16>
    %5 = vector.shape_cast %4 : vector<1x16x128xbf16> to vector<16x128xbf16>
    %c0_5 = arith.constant 0 : index
    %c0_6 = arith.constant 0 : index
    %c0_7 = arith.constant 0 : index
    %6 = vector.load %arg3[%c0_5, %c0_6, %c0_7] : memref<1x128x128xbf16, #tpu.memory_space<vmem>>, vector<1x128x128xbf16>
    %7 = vector.shape_cast %6 : vector<1x128x128xbf16> to vector<128x128xbf16>
    %cst = arith.constant dense<0.000000e+00> : vector<16x128xf32>
    %8 = tpu.matmul %5, %7, %cst {dimension_numbers = #tpu.dot_dimension_numbers<[1], [0], [0], [1], [0, 0, 1, 1], [], []>} : vector<16x128xbf16>, vector<128x128xbf16>, vector<16x128xf32> -> vector<16x128xf32>
    %9 = arith.addf %3, %8 : vector<16x128xf32>
    %c0_8 = arith.constant 0 : index
    %c0_9 = arith.constant 0 : index
    %10 = vector.load %arg5[%c0_8, %c0_9] : memref<16x128xf32, #tpu.memory_space<vmem>>, vector<16x128xf32>
    tpu.vector_store %arg5[%c0_8, %c0_9], %9 {strides = array<i32>} : memref<16x128xf32, #tpu.memory_space<vmem>>, vector<16x128xf32>,
    %c8_i32 = arith.constant 8 : i32
    %11 = arith.cmpi eq, %arg1, %c8_i32 : i32
    %12 = arith.extui %11 : i1 to i32
    %c0_i32_10 = arith.constant 0 : i32
    %13 = arith.cmpi ne, %12, %c0_i32_10 : i32
    scf.if %13 {
      %c0_11 = arith.constant 0 : index
      %c0_12 = arith.constant 0 : index
      %14 = vector.load %arg5[%c0_11, %c0_12] : memref<16x128xf32, #tpu.memory_space<vmem>>, vector<16x128xf32>
      %c0_13 = arith.constant 0 : index
      %c0_14 = arith.constant 0 : index
      %15 = vector.load %arg4[%c0_13, %c0_14] : memref<16x128xf32, #tpu.memory_space<vmem>>, vector<16x128xf32>
      tpu.vector_store %arg4[%c0_13, %c0_14], %14 {strides = array<i32>} : memref<16x128xf32, #tpu.memory_space<vmem>>, vector<16x128xf32>,
    } else {
    }
    return
  }
  func.func @transform_0(%arg0: i32, %arg1: i32) -> (i32, i32, i32) {
    %c0_i32 = arith.constant 0 : i32
    %c0_i32_0 = arith.constant 0 : i32
    return %arg1, %arg0, %c0_i32 : i32, i32, i32
  }
  func.func @transform_1(%arg0: i32, %arg1: i32) -> (i32, i32, i32) {
    %c0_i32 = arith.constant 0 : i32
    %c0_i32_0 = arith.constant 0 : i32
    %c0_i32_1 = arith.constant 0 : i32
    return %arg1, %c0_i32, %c0_i32_0 : i32, i32, i32
  }
  func.func @transform_2(%arg0: i32, %arg1: i32) -> (i32, i32) {
    %c0_i32 = arith.constant 0 : i32
    %c0_i32_0 = arith.constant 0 : i32
    return %arg0, %c0_i32 : i32, i32
  }
}

</mosaic_0001>

<bundles_post_ra>
// kernel: _lambda_.13
= control target key start
LH: loop header
LB: loop body
LE: loop exit
PB: predicated region body
PF: predicated region fallthrough
CT: control target
= control target key end

     0   :  { %s1598_s9 = smov 0   ;;  %s1600_s10 = smov 0   ;;  %s1857_s0 = inlined_call_operand.vmem [shape: bf16[9,2048,3], index: 0, kind: input, shape index: {}]   ;;  %s1858_s1 = inlined_call_operand.vmem [shape: bf16[9,3,128], index: 1, kind: input, shape index: {}]   ;;  %s1859_s2 = inlined_call_operand.vmem [shape: f32[2048,128], index: 2, kind: output, shape index: {}]  }
   0x1   :  { %s1602_s11 = smov 0   ;;  %s1604_s12 = smov 0  }
   0x2   :  { %s1606_s13 = smov 0  }
   0x3 LB: > { %s21_s14 = sadd.s32 1, %s1571_s11  ;;  %s24_s15 = sadd.s32 1, %s1575_s12  ;;  %s1579_s13 = sphi %s1606_s13, %s12_s13   ;;  %s1575_s12 = sphi %s1604_s12, %s1863_s12   ;;  %s1571_s11 = sphi %s1602_s11, %s1862_s11   ;;  %s1567_s10 = sphi %s1600_s10, %s1861_s10   ;;  %s1563_s9 = sphi %s1598_s9, %s1860_s9  }
   0x4   : > { %p22_p0 = scmp.ge.s32.totalorder %s21_s14, 9  ;;  %p1291_p1 = scmp.ge.s32.totalorder %s1579_s13, 1 }
   0x5   : > { %p140_p2 = scmp.lt.s32.totalorder %s1579_s13, 37 }
   0x6   : > { %s1865_s14 = smov (%p22_p0, %s21_s14), 0  ;;  %s1867_s15 = smov (!%p22_p0, %s24_s15), %s1575_s12 }
   0x7   : > { %p141_p3 = pnand %p1291_p1, %p140_p2  ;;  %p26_p4 = scmp.ge.s32.totalorder %s1867_s15, 4 }
   0x8   : > { %s1292_s16 = sshll.u32 (!%p141_p3), %s1567_s10, 6  ;;  %p171_p5 = scmp.lt.s32.totalorder (!%p141_p3), %s1563_s9, 8 }
   0x9   : > { %s1869_s15 = smov (%p26_p4, %s1867_s15), 0  ;;  %144 = sbr.rel (%p141_p3) target bundleno = 358 (0x166), region = 28 }
   0xa   : > { %p173_p6 = scmp.lt.s32.totalorder (!%p141_p3), %s1292_s16, 255  ;;  %p1298_p7 = scmp.ne.s32.totalorder (!%p141_p3), %s1563_s9, 0 }
  0x10   : > { %s172_s17 = scalar_select %p171_p5, %s1563_s9, 8 }
  0x11   : > { %s1871_s16 = smov (!%p173_p6, %s1292_s16), 255  ;;  %194 = sbr.rel (%p1298_p7) target bundleno = 51 (0x33), region = 32 }
  0x12   : > { %s1293_s18 = sshll.u32 %s172_s17, 8  ;;  %s1295_s19 = sshll.u32 %s172_s17, 1  ;;  %v1581_v0 = vmov (!%p1298_p7), 0.0  }
  0x13   : > { %s176_s20 = sadd.s32 %s1293_s18, %s1871_s16  ;;  %s1635_s23 = scalar_lea.vmem %s1858_s1, %s1295_s19  ;;  %195 = vst [vmem:[#allocation2] sm:$0xff] (!%p1298_p7), %v1581_v0  ;;  %196 = vst [vmem:[#allocation2 + $0x8] sm:$0xff] (!%p1298_p7), %v1581_v0 }
  0x14   : > { %s1294_s24 = sshll.u32 %s176_s20, 2  ;;  %s1297_s25 = sshll.u32 %s1871_s16, 3  ;;  %197 = vst [vmem:[#allocation2 + $0x10] sm:$0xff] (!%p1298_p7), %v1581_v0  ;;  %198 = vst [vmem:[#allocation2 + $0x18] sm:$0xff] (!%p1298_p7), %v1581_v0 }
  0x15   : > { %s1640_s28 = scalar_lea.vmem %s1857_s0, %s1294_s24  ;;  %s1645_s3 = scalar_lea.vmem %s1859_s2, %s1297_s25  ;;  %199 = vst [vmem:[#allocation2 + $0x20] sm:$0xff] (!%p1298_p7), %v1581_v0  ;;  %200 = vst [vmem:[#allocation2 + $0x28] sm:$0xff] (!%p1298_p7), %v1581_v0 }
  0x16   : > { %201 = vst [vmem:[#allocation2 + $0x30] sm:$0xff] (!%p1298_p7), %v1581_v0  ;;  %202 = vst [vmem:[#allocation2 + $0x38] sm:$0xff] (!%p1298_p7), %v1581_v0 }
  0x17   : > { %203 = vst [vmem:[#allocation2 + $0x40] sm:$0xff] (!%p1298_p7), %v1581_v0  ;;  %204 = vst [vmem:[#allocation2 + $0x48] sm:$0xff] (!%p1298_p7), %v1581_v0 }
  0x18   : > { %205 = vst [vmem:[#allocation2 + $0x50] sm:$0xff] %v1581_v0  ;;  %206 = vst [vmem:[#allocation2 + $0x58] sm:$0xff] %v1581_v0 }
  0x19   : > { %207 = vst [vmem:[#allocation2 + $0x60] sm:$0xff] %v1581_v0  ;;  %208 = vst [vmem:[#allocation2 + $0x68] sm:$0xff] %v1581_v0 }
  0x1a   : > { %209 = vst [vmem:[#allocation2 + $0x70] sm:$0xff] %v1581_v0  ;;  %210 = vst [vmem:[#allocation2 + $0x78] sm:$0xff] %v1581_v0 }
  0x1b   : > { %211 = vst [vmem:[#allocation2 + $0x80] sm:$0xff] %v1581_v0  ;;  %212 = vst [vmem:[#allocation2 + $0x88] sm:$0xff] %v1581_v0 }
  0x1c   : > { %213 = vst [vmem:[#allocation2 + $0x90] sm:$0xff] %v1581_v0  ;;  %214 = vst [vmem:[#allocation2 + $0x98] sm:$0xff] %v1581_v0 }
  0x1d   : > { %215 = vst [vmem:[#allocation2 + $0xa0] sm:$0xff] %v1581_v0  ;;  %216 = vst [vmem:[#allocation2 + $0xa8] sm:$0xff] %v1581_v0 }
  0x1e   : > { %217 = vst [vmem:[#allocation2 + $0xb0] sm:$0xff] %v1581_v0  ;;  %218 = vst [vmem:[#allocation2 + $0xb8] sm:$0xff] %v1581_v0 }
  0x1f   : > { %219 = vst [vmem:[#allocation2 + $0xc0] sm:$0xff] %v1581_v0  ;;  %220 = vst [vmem:[#allocation2 + $0xc8] sm:$0xff] %v1581_v0 }
  0x20   : > { %221 = vst [vmem:[#allocation2 + $0xd0] sm:$0xff] %v1581_v0  ;;  %222 = vst [vmem:[#allocation2 + $0xd8] sm:$0xff] %v1581_v0 }
  0x21   : > { %223 = vst [vmem:[#allocation2 + $0xe0] sm:$0xff] %v1581_v0  ;;  %224 = vst [vmem:[#allocation2 + $0xe8] sm:$0xff] %v1581_v0 }
  0x22   : > { %225 = vst [vmem:[#allocation2 + $0xf0] sm:$0xff] %v1581_v0  ;;  %226 = vst [vmem:[#allocation2 + $0xf8] sm:$0xff] %v1581_v0 }
  0x23   : > { %227 = vst [vmem:[#allocation2 + $0x100] sm:$0xff] %v1581_v0  ;;  %228 = vst [vmem:[#allocation2 + $0x108] sm:$0xff] %v1581_v0 }
  0x24   : > { %229 = vst [vmem:[#allocation2 + $0x110] sm:$0xff] %v1581_v0  ;;  %230 = vst [vmem:[#allocation2 + $0x118] sm:$0xff] %v1581_v0 }
  0x25   : > { %231 = vst [vmem:[#allocation2 + $0x120] sm:$0xff] %v1581_v0  ;;  %232 = vst [vmem:[#allocation2 + $0x128] sm:$0xff] %v1581_v0 }
  0x26   : > { %233 = vst [vmem:[#allocation2 + $0x130] sm:$0xff] %v1581_v0  ;;  %234 = vst [vmem:[#allocation2 + $0x138] sm:$0xff] %v1581_v0 }
  0x27   : > { %235 = vst [vmem:[#allocation2 + $0x140] sm:$0xff] %v1581_v0  ;;  %236 = vst [vmem:[#allocation2 + $0x148] sm:$0xff] %v1581_v0 }
  0x28   : > { %237 = vst [vmem:[#allocation2 + $0x150] sm:$0xff] %v1581_v0  ;;  %238 = vst [vmem:[#allocation2 + $0x158] sm:$0xff] %v1581_v0 }
  0x29   : > { %239 = vst [vmem:[#allocation2 + $0x160] sm:$0xff] %v1581_v0  ;;  %240 = vst [vmem:[#allocation2 + $0x168] sm:$0xff] %v1581_v0 }
  0x2a   : > { %241 = vst [vmem:[#allocation2 + $0x170] sm:$0xff] %v1581_v0  ;;  %242 = vst [vmem:[#allocation2 + $0x178] sm:$0xff] %v1581_v0 }
  0x2b   : > { %243 = vst [vmem:[#allocation2 + $0x180] sm:$0xff] %v1581_v0  ;;  %244 = vst [vmem:[#allocation2 + $0x188] sm:$0xff] %v1581_v0 }
  0x2c   : > { %245 = vst [vmem:[#allocation2 + $0x190] sm:$0xff] %v1581_v0  ;;  %246 = vst [vmem:[#allocation2 + $0x198] sm:$0xff] %v1581_v0 }
  0x2d   : > { %247 = vst [vmem:[#allocation2 + $0x1a0] sm:$0xff] %v1581_v0  ;;  %248 = vst [vmem:[#allocation2 + $0x1a8] sm:$0xff] %v1581_v0 }
  0x2e   : > { %249 = vst [vmem:[#allocation2 + $0x1b0] sm:$0xff] %v1581_v0  ;;  %250 = vst [vmem:[#allocation2 + $0x1b8] sm:$0xff] %v1581_v0 }
  0x2f   : > { %251 = vst [vmem:[#allocation2 + $0x1c0] sm:$0xff] %v1581_v0  ;;  %252 = vst [vmem:[#allocation2 + $0x1c8] sm:$0xff] %v1581_v0 }
  0x30   : > { %253 = vst [vmem:[#allocation2 + $0x1d0] sm:$0xff] %v1581_v0  ;;  %254 = vst [vmem:[#allocation2 + $0x1d8] sm:$0xff] %v1581_v0 }
  0x31   : > { %255 = vst [vmem:[#allocation2 + $0x1e0] sm:$0xff] %v1581_v0  ;;  %256 = vst [vmem:[#allocation2 + $0x1e8] sm:$0xff] %v1581_v0 }
  0x32   : > { %257 = vst [vmem:[#allocation2 + $0x1f0] sm:$0xff] %v1581_v0  ;;  %258 = vst [vmem:[#allocation2 + $0x1f8] sm:$0xff] %v1581_v0 }
  0x33 PF: > { %v387_v1 = vld [vmem:[%s1635_s23] sm:$0x3]  ;;  %vm645_vm0 = vcmask 1040384   ;;  %vm646_vm1 = vcmask 1041408   ;;  %v1582_v3 = vmov 65535   ;;  %vm548_vm2 = vcmask 23552  }
  0x34   : > { %v1509_v2 = vld [vmem:[%s1640_s28] sm:$0xff]   ;;  %v647_v4 = vsel %vm645_vm0, 4294967295, %v1582_v3  ;;  %v1511_v8 = vld [vmem:[%s1640_s28 + $0x8] sm:$0xff]   ;;  %v1513_v10 = vld [vmem:[%s1640_s28 + $0x10] sm:$0xff]   ;;  %p1363_p8 = scmp.ne.s32.totalorder %s1563_s9, 8 }
  0x35   : > { %v648_v5 = vsel %vm646_vm1, %v647_v4, 0  ;;  %1401 = vmatprep.mubr.msk.bf16.mxu0 %vm548_vm2, %v1509_v2  ;;  %v1510_v6 = vld [vmem:[%s1640_s28 + $0x80] sm:$0xff]   ;;  %v1512_v9 = vld [vmem:[%s1640_s28 + $0x88] sm:$0xff]   ;;  %v1514_v11 = vld [vmem:[%s1640_s28 + $0x90] sm:$0xff]  }
  0x36   : > { %v650_v7 = vand.u32 %v648_v5, %v387_v1  ;;  %1433 = vmatprep.mubr.msk.bf16.mxu1 %vm548_vm2, %v1510_v6  ;;  %v1515_v12 = vld [vmem:[%s1640_s28 + $0x18] sm:$0xff]   ;;  %v1517_v14 = vld [vmem:[%s1640_s28 + $0x20] sm:$0xff]   ;;  %v1519_v16 = vld [vmem:[%s1640_s28 + $0x28] sm:$0xff]  }
  0x37   : > { %v1516_v13 = vld [vmem:[%s1640_s28 + $0x98] sm:$0xff]   ;;  %v1518_v15 = vld [vmem:[%s1640_s28 + $0xa0] sm:$0xff]   ;;  %v1520_v17 = vld [vmem:[%s1640_s28 + $0xa8] sm:$0xff]  }
  0x38   : > { %1399 = vmatprep.subr.bf16.mxu0 %v650_v7  ;;  %1465 = vmatprep.subr.bf16.mxu1 %v650_v7  ;;  %v1521_v18 = vld [vmem:[%s1640_s28 + $0x30] sm:$0xff]   ;;  %v1523_v20 = vld [vmem:[%s1640_s28 + $0x38] sm:$0xff]   ;;  %v1525_v22 = vld [vmem:[%s1640_s28 + $0x40] sm:$0xff]  }
  0x39   : > { %1400 = vmatpush3.bf16.msra.mxu0 %v650_v7  ;;  %1466 = vmatpush3.bf16.msra.mxu1 %v650_v7  ;;  %v1522_v19 = vld [vmem:[%s1640_s28 + $0xb0] sm:$0xff]   ;;  %v1524_v21 = vld [vmem:[%s1640_s28 + $0xb8] sm:$0xff]   ;;  %v1526_v23 = vld [vmem:[%s1640_s28 + $0xc0] sm:$0xff]  }
  0x3a   : > { %v1527_v24 = vld [vmem:[%s1640_s28 + $0x48] sm:$0xff]   ;;  %v1529_v26 = vld [vmem:[%s1640_s28 + $0x50] sm:$0xff]   ;;  %v1531_v28 = vld [vmem:[%s1640_s28 + $0x58] sm:$0xff]  }
  0x3b   : > { %v1528_v25 = vld [vmem:[%s1640_s28 + $0xc8] sm:$0xff]   ;;  %v1530_v27 = vld [vmem:[%s1640_s28 + $0xd0] sm:$0xff]   ;;  %v1532_v29 = vld [vmem:[%s1640_s28 + $0xd8] sm:$0xff]  }
  0x3c   : > { %1402 = vmatmul.mubr.msk.bf16.vlgmr.msra.gmra.mrb[0].mxu0 %vm548_vm2, %v1511_v8  ;;  %1434 = vmatmul.mubr.msk.bf16.vlgmr.msra.gmra.mrb[0].mxu1 %vm548_vm2, %v1512_v9  ;;  %v1533_v30 = vld [vmem:[%s1640_s28 + $0x60] sm:$0xff]   ;;  %v1535_v32 = vld [vmem:[%s1640_s28 + $0x68] sm:$0xff]   ;;  %v1537_v34 = vld [vmem:[%s1640_s28 + $0x70] sm:$0xff]  }
  0x3d   : > { %1405 = vmatprep.mubr.msk.bf16.mxu0 %vm548_vm2, %v1513_v10  ;;  %1437 = vmatprep.mubr.msk.bf16.mxu1 %vm548_vm2, %v1514_v11  ;;  %v1534_v31 = vld [vmem:[%s1640_s28 + $0xe0] sm:$0xff]   ;;  %v1536_v33 = vld [vmem:[%s1640_s28 + $0xe8] sm:$0xff]   ;;  %v1538_v35 = vld [vmem:[%s1640_s28 + $0xf0] sm:$0xff]  }
  0x3e   : > { %v1539_v36 = vld [vmem:[%s1640_s28 + $0x78] sm:$0xff]   ;;  %v261_v38 = vld [vmem:[#allocation2 + $0x10] sm:$0xff]  ;;  %v259_v40 = vld [vmem:[#allocation2] sm:$0xff] }
  0x3f   : > { %v1540_v37 = vld [vmem:[%s1640_s28 + $0xf8] sm:$0xff]   ;;  %v293_v39 = vld [vmem:[#allocation2 + $0x110] sm:$0xff]  ;;  %v291_v41 = vld [vmem:[#allocation2 + $0x100] sm:$0xff] }
  0x40   : > { %v262_v44 = vld [vmem:[#allocation2 + $0x18] sm:$0xff]  ;;  %v260_v50 = vld [vmem:[#allocation2 + $0x8] sm:$0xff]  ;;  %v265_v62 = vld [vmem:[#allocation2 + $0x30] sm:$0xff] }
  0x41   : > { %v294_v45 = vld [vmem:[#allocation2 + $0x118] sm:$0xff]  ;;  %v292_v51 = vld [vmem:[#allocation2 + $0x108] sm:$0xff]  ;;  %v297_v63 = vld [vmem:[#allocation2 + $0x130] sm:$0xff] }
  0x42   : > { %v263_v0 = vld [vmem:[#allocation2 + $0x20] sm:$0xff]  ;;  %v266_v4 = vld [vmem:[#allocation2 + $0x38] sm:$0xff]  ;;  %v264_v10 = vld [vmem:[#allocation2 + $0x28] sm:$0xff] }
  0x43   : > { %v295_v1 = vld [vmem:[#allocation2 + $0x120] sm:$0xff]  ;;  %v298_v5 = vld [vmem:[#allocation2 + $0x138] sm:$0xff]  ;;  %v296_v11 = vld [vmem:[#allocation2 + $0x128] sm:$0xff] }
  0x44   : > { %1406 = vmatmul.mubr.msk.bf16.gmra.mrb[4].mxu0 %vm548_vm2, %v1515_v12  ;;  %1438 = vmatmul.mubr.msk.bf16.gmra.mrb[4].mxu1 %vm548_vm2, %v1516_v13 }
  0x45   : > { %1409 = vmatprep.mubr.msk.bf16.mxu0 %vm548_vm2, %v1517_v14  ;;  %1441 = vmatprep.mubr.msk.bf16.mxu1 %vm548_vm2, %v1518_v15 }
  0x4c   : > { %1410 = vmatmul.mubr.msk.bf16.gmra.mrb[8].mxu0 %vm548_vm2, %v1519_v16  ;;  %1442 = vmatmul.mubr.msk.bf16.gmra.mrb[8].mxu1 %vm548_vm2, %v1520_v17 }
  0x4d   : > { %1413 = vmatprep.mubr.msk.bf16.mxu0 %vm548_vm2, %v1521_v18  ;;  %1445 = vmatprep.mubr.msk.bf16.mxu1 %vm548_vm2, %v1522_v19 }
  0x54   : > { %1414 = vmatmul.mubr.msk.bf16.gmra.mrb[12].mxu0 %vm548_vm2, %v1523_v20  ;;  %1446 = vmatmul.mubr.msk.bf16.gmra.mrb[12].mxu1 %vm548_vm2, %v1524_v21 }
  0x55   : > { %1417 = vmatprep.mubr.msk.bf16.mxu0 %vm548_vm2, %v1525_v22  ;;  %1449 = vmatprep.mubr.msk.bf16.mxu1 %vm548_vm2, %v1526_v23  ;;  %v269_v22 = vld [vmem:[#allocation2 + $0x50] sm:$0xff] }
  0x56   : > { %v301_v23 = vld [vmem:[#allocation2 + $0x150] sm:$0xff] }
  0x5c   : > { %1418 = vmatmul.mubr.msk.bf16.gmra.mrb[16].mxu0 %vm548_vm2, %v1527_v24  ;;  %1450 = vmatmul.mubr.msk.bf16.gmra.mrb[16].mxu1 %vm548_vm2, %v1528_v25  ;;  %v267_v24 = vld [vmem:[#allocation2 + $0x40] sm:$0xff] }
  0x5d   : > { %1421 = vmatprep.mubr.msk.bf16.mxu0 %vm548_vm2, %v1529_v26  ;;  %1453 = vmatprep.mubr.msk.bf16.mxu1 %vm548_vm2, %v1530_v27  ;;  %v299_v25 = vld [vmem:[#allocation2 + $0x140] sm:$0xff] }
  0x64   : > { %1422 = vmatmul.mubr.msk.bf16.gmra.mrb[20].mxu0 %vm548_vm2, %v1531_v28  ;;  %1454 = vmatmul.mubr.msk.bf16.gmra.mrb[20].mxu1 %vm548_vm2, %v1532_v29  ;;  %v270_v28 = vld [vmem:[#allocation2 + $0x58] sm:$0xff] }
  0x65   : > { %1425 = vmatprep.mubr.msk.bf16.mxu0 %vm548_vm2, %v1533_v30  ;;  %1457 = vmatprep.mubr.msk.bf16.mxu1 %vm548_vm2, %v1534_v31  ;;  %v302_v29 = vld [vmem:[#allocation2 + $0x158] sm:$0xff] }
  0x6c   : > { %1426 = vmatmul.mubr.msk.bf16.gmra.mrb[24].mxu0 %vm548_vm2, %v1535_v32  ;;  %1458 = vmatmul.mubr.msk.bf16.gmra.mrb[24].mxu1 %vm548_vm2, %v1536_v33 }
  0x6d   : > { %1429 = vmatprep.mubr.msk.bf16.mxu0 %vm548_vm2, %v1537_v34  ;;  %1461 = vmatprep.mubr.msk.bf16.mxu1 %vm548_vm2, %v1538_v35  ;;  %v268_v34 = vld [vmem:[#allocation2 + $0x48] sm:$0xff] }
  0x6e   : > { %v300_v35 = vld [vmem:[#allocation2 + $0x148] sm:$0xff] }
  0x74   : > { %1430 = vmatmul.mubr.msk.bf16.gmra.mrb[28].mxu0 %vm548_vm2, %v1539_v36  ;;  %1462 = vmatmul.mubr.msk.bf16.gmra.mrb[28].mxu1 %vm548_vm2, %v1540_v37 }
 0x10f   : > { %v1403_v42 = vpop.f32.mrb[0].mxu0  ;;  %v1435_v43 = vpop.f32.mrb[0].mxu1 }
 0x110   : > { %v943_v46 = vadd.f32 %v1403_v42, %v261_v38  ;;  %v975_v47 = vadd.f32 %v1435_v43, %v293_v39  ;;  %v686_v48 = vpop.f32.mrb[1].mxu0  ;;  %v814_v49 = vpop.f32.mrb[1].mxu1 }
 0x111   : > { %v941_v52 = vadd.f32 %v686_v48, %v259_v40  ;;  %v973_v53 = vadd.f32 %v814_v49, %v291_v41  ;;  %v1404_v54 = vpop.f32.mrb[2].mxu0  ;;  %v1436_v55 = vpop.f32.mrb[2].mxu1  ;;  %v271_v48 = vld [vmem:[#allocation2 + $0x60] sm:$0xff] }
 0x112   : > { %1007 = vst [vmem:[#allocation2 + $0x10] sm:$0xff] %v943_v46  ;;  %1039 = vst [vmem:[#allocation2 + $0x110] sm:$0xff] %v975_v47  ;;  %v944_v56 = vadd.f32 %v1404_v54, %v262_v44  ;;  %v976_v57 = vadd.f32 %v1436_v55, %v294_v45  ;;  %v689_v58 = vpop.f32.mrb[3].mxu0  ;;  %v817_v59 = vpop.f32.mrb[3].mxu1  ;;  %v273_v46 = vld [vmem:[#allocation2 + $0x70] sm:$0xff]  ;;  %v303_v49 = vld [vmem:[#allocation2 + $0x160] sm:$0xff] }
 0x113   : > { %1005 = vst [vmem:[#allocation2] sm:$0xff] %v941_v52  ;;  %1037 = vst [vmem:[#allocation2 + $0x100] sm:$0xff] %v973_v53  ;;  %v942_v60 = vadd.f32 %v689_v58, %v260_v50  ;;  %v974_v61 = vadd.f32 %v817_v59, %v292_v51  ;;  %v305_v47 = vld [vmem:[#allocation2 + $0x170] sm:$0xff]  ;;  %v274_v52 = vld [vmem:[#allocation2 + $0x78] sm:$0xff] }
 0x114   : > { %1008 = vst [vmem:[#allocation2 + $0x18] sm:$0xff] %v944_v56  ;;  %1040 = vst [vmem:[#allocation2 + $0x118] sm:$0xff] %v976_v57  ;;  %v306_v53 = vld [vmem:[#allocation2 + $0x178] sm:$0xff]  ;;  %v272_v58 = vld [vmem:[#allocation2 + $0x68] sm:$0xff] }
 0x115   : > { %1006 = vst [vmem:[#allocation2 + $0x8] sm:$0xff] %v942_v60  ;;  %1038 = vst [vmem:[#allocation2 + $0x108] sm:$0xff] %v974_v61  ;;  %v304_v59 = vld [vmem:[#allocation2 + $0x168] sm:$0xff] }
 0x117   : > { %v1407_v2 = vpop.f32.mrb[4].mxu0  ;;  %v1439_v3 = vpop.f32.mrb[4].mxu1 }
 0x118   : > { %v947_v6 = vadd.f32 %v1407_v2, %v265_v62  ;;  %v979_v7 = vadd.f32 %v1439_v3, %v297_v63  ;;  %v702_v8 = vpop.f32.mrb[5].mxu0  ;;  %v830_v9 = vpop.f32.mrb[5].mxu1 }
 0x119   : > { %v945_v12 = vadd.f32 %v702_v8, %v263_v0  ;;  %v977_v13 = vadd.f32 %v830_v9, %v295_v1  ;;  %v1408_v14 = vpop.f32.mrb[6].mxu0  ;;  %v1440_v15 = vpop.f32.mrb[6].mxu1  ;;  %v275_v8 = vld [vmem:[#allocation2 + $0x80] sm:$0xff] }
 0x11a   : > { %1011 = vst [vmem:[#allocation2 + $0x30] sm:$0xff] %v947_v6  ;;  %1043 = vst [vmem:[#allocation2 + $0x130] sm:$0xff] %v979_v7  ;;  %v948_v16 = vadd.f32 %v1408_v14, %v266_v4  ;;  %v980_v17 = vadd.f32 %v1440_v15, %v298_v5  ;;  %v705_v18 = vpop.f32.mrb[7].mxu0  ;;  %v833_v19 = vpop.f32.mrb[7].mxu1  ;;  %v277_v6 = vld [vmem:[#allocation2 + $0x90] sm:$0xff]  ;;  %v307_v9 = vld [vmem:[#allocation2 + $0x180] sm:$0xff] }
 0x11b   : > { %1009 = vst [vmem:[#allocation2 + $0x20] sm:$0xff] %v945_v12  ;;  %1041 = vst [vmem:[#allocation2 + $0x120] sm:$0xff] %v977_v13  ;;  %v946_v20 = vadd.f32 %v705_v18, %v264_v10  ;;  %v978_v21 = vadd.f32 %v833_v19, %v296_v11  ;;  %v309_v7 = vld [vmem:[#allocation2 + $0x190] sm:$0xff]  ;;  %v278_v12 = vld [vmem:[#allocation2 + $0x98] sm:$0xff] }
 0x11c   : > { %1012 = vst [vmem:[#allocation2 + $0x38] sm:$0xff] %v948_v16  ;;  %1044 = vst [vmem:[#allocation2 + $0x138] sm:$0xff] %v980_v17  ;;  %v310_v13 = vld [vmem:[#allocation2 + $0x198] sm:$0xff]  ;;  %v276_v18 = vld [vmem:[#allocation2 + $0x88] sm:$0xff] }
 0x11d   : > { %1010 = vst [vmem:[#allocation2 + $0x28] sm:$0xff] %v946_v20  ;;  %1042 = vst [vmem:[#allocation2 + $0x128] sm:$0xff] %v978_v21  ;;  %v308_v19 = vld [vmem:[#allocation2 + $0x188] sm:$0xff] }
 0x11f   : > { %v1411_v26 = vpop.f32.mrb[8].mxu0  ;;  %v1443_v27 = vpop.f32.mrb[8].mxu1 }
 0x120   : > { %v951_v30 = vadd.f32 %v1411_v26, %v269_v22  ;;  %v983_v31 = vadd.f32 %v1443_v27, %v301_v23  ;;  %v718_v32 = vpop.f32.mrb[9].mxu0  ;;  %v846_v33 = vpop.f32.mrb[9].mxu1 }
 0x121   : > { %v949_v36 = vadd.f32 %v718_v32, %v267_v24  ;;  %v981_v37 = vadd.f32 %v846_v33, %v299_v25  ;;  %v1412_v38 = vpop.f32.mrb[10].mxu0  ;;  %v1444_v39 = vpop.f32.mrb[10].mxu1  ;;  %v279_v32 = vld [vmem:[#allocation2 + $0xa0] sm:$0xff] }
 0x122   : > { %1015 = vst [vmem:[#allocation2 + $0x50] sm:$0xff] %v951_v30  ;;  %1047 = vst [vmem:[#allocation2 + $0x150] sm:$0xff] %v983_v31  ;;  %v952_v40 = vadd.f32 %v1412_v38, %v270_v28  ;;  %v984_v41 = vadd.f32 %v1444_v39, %v302_v29  ;;  %v721_v42 = vpop.f32.mrb[11].mxu0  ;;  %v849_v43 = vpop.f32.mrb[11].mxu1  ;;  %v281_v30 = vld [vmem:[#allocation2 + $0xb0] sm:$0xff]  ;;  %v311_v33 = vld [vmem:[#allocation2 + $0x1a0] sm:$0xff] }
 0x123   : > { %1013 = vst [vmem:[#allocation2 + $0x40] sm:$0xff] %v949_v36  ;;  %1045 = vst [vmem:[#allocation2 + $0x140] sm:$0xff] %v981_v37  ;;  %v950_v44 = vadd.f32 %v721_v42, %v268_v34  ;;  %v982_v45 = vadd.f32 %v849_v43, %v300_v35  ;;  %v313_v31 = vld [vmem:[#allocation2 + $0x1b0] sm:$0xff]  ;;  %v282_v36 = vld [vmem:[#allocation2 + $0xb8] sm:$0xff] }
 0x124   : > { %1016 = vst [vmem:[#allocation2 + $0x58] sm:$0xff] %v952_v40  ;;  %1048 = vst [vmem:[#allocation2 + $0x158] sm:$0xff] %v984_v41  ;;  %v314_v37 = vld [vmem:[#allocation2 + $0x1b8] sm:$0xff]  ;;  %v280_v42 = vld [vmem:[#allocation2 + $0xa8] sm:$0xff] }
 0x125   : > { %1014 = vst [vmem:[#allocation2 + $0x48] sm:$0xff] %v950_v44  ;;  %1046 = vst [vmem:[#allocation2 + $0x148] sm:$0xff] %v982_v45  ;;  %v312_v43 = vld [vmem:[#allocation2 + $0x1a8] sm:$0xff] }
 0x127   : > { %v1415_v50 = vpop.f32.mrb[12].mxu0  ;;  %v1447_v51 = vpop.f32.mrb[12].mxu1 }
 0x128   : > { %v955_v54 = vadd.f32 %v1415_v50, %v273_v46  ;;  %v987_v55 = vadd.f32 %v1447_v51, %v305_v47  ;;  %v734_v56 = vpop.f32.mrb[13].mxu0  ;;  %v862_v57 = vpop.f32.mrb[13].mxu1 }
 0x129   : > { %v953_v60 = vadd.f32 %v734_v56, %v271_v48  ;;  %v985_v61 = vadd.f32 %v862_v57, %v303_v49  ;;  %v1416_v62 = vpop.f32.mrb[14].mxu0  ;;  %v1448_v63 = vpop.f32.mrb[14].mxu1  ;;  %v283_v56 = vld [vmem:[#allocation2 + $0xc0] sm:$0xff] }
 0x12a   : > { %1019 = vst [vmem:[#allocation2 + $0x70] sm:$0xff] %v955_v54  ;;  %1051 = vst [vmem:[#allocation2 + $0x170] sm:$0xff] %v987_v55  ;;  %v956_v0 = vadd.f32 %v1416_v62, %v274_v52  ;;  %v988_v1 = vadd.f32 %v1448_v63, %v306_v53  ;;  %v737_v2 = vpop.f32.mrb[15].mxu0  ;;  %v865_v3 = vpop.f32.mrb[15].mxu1  ;;  %v285_v54 = vld [vmem:[#allocation2 + $0xd0] sm:$0xff]  ;;  %v315_v57 = vld [vmem:[#allocation2 + $0x1c0] sm:$0xff] }
 0x12b   : > { %1017 = vst [vmem:[#allocation2 + $0x60] sm:$0xff] %v953_v60  ;;  %1049 = vst [vmem:[#allocation2 + $0x160] sm:$0xff] %v985_v61  ;;  %v954_v4 = vadd.f32 %v737_v2, %v272_v58  ;;  %v986_v5 = vadd.f32 %v865_v3, %v304_v59  ;;  %v317_v55 = vld [vmem:[#allocation2 + $0x1d0] sm:$0xff]  ;;  %v286_v60 = vld [vmem:[#allocation2 + $0xd8] sm:$0xff] }
 0x12c   : > { %1020 = vst [vmem:[#allocation2 + $0x78] sm:$0xff] %v956_v0  ;;  %1052 = vst [vmem:[#allocation2 + $0x178] sm:$0xff] %v988_v1  ;;  %v318_v61 = vld [vmem:[#allocation2 + $0x1d8] sm:$0xff]  ;;  %v284_v2 = vld [vmem:[#allocation2 + $0xc8] sm:$0xff] }
 0x12d   : > { %1018 = vst [vmem:[#allocation2 + $0x68] sm:$0xff] %v954_v4  ;;  %1050 = vst [vmem:[#allocation2 + $0x168] sm:$0xff] %v986_v5  ;;  %v316_v3 = vld [vmem:[#allocation2 + $0x1c8] sm:$0xff] }
 0x12f   : > { %v1419_v10 = vpop.f32.mrb[16].mxu0  ;;  %v1451_v11 = vpop.f32.mrb[16].mxu1 }
 0x130   : > { %v959_v14 = vadd.f32 %v1419_v10, %v277_v6  ;;  %v991_v15 = vadd.f32 %v1451_v11, %v309_v7  ;;  %v750_v16 = vpop.f32.mrb[17].mxu0  ;;  %v878_v17 = vpop.f32.mrb[17].mxu1 }
 0x131   : > { %v957_v20 = vadd.f32 %v750_v16, %v275_v8  ;;  %v989_v21 = vadd.f32 %v878_v17, %v307_v9  ;;  %v1420_v22 = vpop.f32.mrb[18].mxu0  ;;  %v1452_v23 = vpop.f32.mrb[18].mxu1  ;;  %v287_v16 = vld [vmem:[#allocation2 + $0xe0] sm:$0xff] }
 0x132   : > { %1023 = vst [vmem:[#allocation2 + $0x90] sm:$0xff] %v959_v14  ;;  %1055 = vst [vmem:[#allocation2 + $0x190] sm:$0xff] %v991_v15  ;;  %v960_v24 = vadd.f32 %v1420_v22, %v278_v12  ;;  %v992_v25 = vadd.f32 %v1452_v23, %v310_v13  ;;  %v753_v26 = vpop.f32.mrb[19].mxu0  ;;  %v881_v27 = vpop.f32.mrb[19].mxu1  ;;  %v289_v14 = vld [vmem:[#allocation2 + $0xf0] sm:$0xff]  ;;  %v319_v17 = vld [vmem:[#allocation2 + $0x1e0] sm:$0xff] }
 0x133   : > { %1021 = vst [vmem:[#allocation2 + $0x80] sm:$0xff] %v957_v20  ;;  %1053 = vst [vmem:[#allocation2 + $0x180] sm:$0xff] %v989_v21  ;;  %v958_v28 = vadd.f32 %v753_v26, %v276_v18  ;;  %v990_v29 = vadd.f32 %v881_v27, %v308_v19  ;;  %v321_v15 = vld [vmem:[#allocation2 + $0x1f0] sm:$0xff]  ;;  %v290_v20 = vld [vmem:[#allocation2 + $0xf8] sm:$0xff] }
 0x134   : > { %1024 = vst [vmem:[#allocation2 + $0x98] sm:$0xff] %v960_v24  ;;  %1056 = vst [vmem:[#allocation2 + $0x198] sm:$0xff] %v992_v25  ;;  %v322_v21 = vld [vmem:[#allocation2 + $0x1f8] sm:$0xff]  ;;  %v288_v26 = vld [vmem:[#allocation2 + $0xe8] sm:$0xff] }
 0x135   : > { %1022 = vst [vmem:[#allocation2 + $0x88] sm:$0xff] %v958_v28  ;;  %1054 = vst [vmem:[#allocation2 + $0x188] sm:$0xff] %v990_v29  ;;  %v320_v27 = vld [vmem:[#allocation2 + $0x1e8] sm:$0xff] }
 0x137   : > { %v1423_v34 = vpop.f32.mrb[20].mxu0  ;;  %v1455_v35 = vpop.f32.mrb[20].mxu1 }
 0x138   : > { %v963_v38 = vadd.f32 %v1423_v34, %v281_v30  ;;  %v995_v39 = vadd.f32 %v1455_v35, %v313_v31  ;;  %v766_v40 = vpop.f32.mrb[21].mxu0  ;;  %v894_v41 = vpop.f32.mrb[21].mxu1 }
 0x139   : > { %v961_v44 = vadd.f32 %v766_v40, %v279_v32  ;;  %v993_v45 = vadd.f32 %v894_v41, %v311_v33  ;;  %v1424_v46 = vpop.f32.mrb[22].mxu0  ;;  %v1456_v47 = vpop.f32.mrb[22].mxu1  ;;  %v1075_v40 = vld [vmem:[#allocation2 + $0x10] sm:$0xff] (!%p1363_p8)  ;;  %v1076_v41 = vld [vmem:[#allocation2 + $0x18] sm:$0xff] (!%p1363_p8) }
 0x13a   : > { %1027 = vst [vmem:[#allocation2 + $0xb0] sm:$0xff] %v963_v38  ;;  %1059 = vst [vmem:[#allocation2 + $0x1b0] sm:$0xff] %v995_v39  ;;  %v964_v48 = vadd.f32 %v1424_v46, %v282_v36  ;;  %v996_v49 = vadd.f32 %v1456_v47, %v314_v37  ;;  %v769_v50 = vpop.f32.mrb[23].mxu0  ;;  %v897_v51 = vpop.f32.mrb[23].mxu1  ;;  %v1073_v38 = vld [vmem:[#allocation2] sm:$0xff] (!%p1363_p8)  ;;  %v1074_v39 = vld [vmem:[#allocation2 + $0x8] sm:$0xff] (!%p1363_p8) }
 0x13b   : > { %1025 = vst [vmem:[#allocation2 + $0xa0] sm:$0xff] %v961_v44  ;;  %1057 = vst [vmem:[#allocation2 + $0x1a0] sm:$0xff] %v993_v45  ;;  %v962_v52 = vadd.f32 %v769_v50, %v280_v42  ;;  %v994_v53 = vadd.f32 %v897_v51, %v312_v43  ;;  %v1077_v42 = vld [vmem:[#allocation2 + $0x20] sm:$0xff] (!%p1363_p8)  ;;  %v1078_v43 = vld [vmem:[#allocation2 + $0x28] sm:$0xff] (!%p1363_p8) }
 0x13c   : > { %1028 = vst [vmem:[#allocation2 + $0xb8] sm:$0xff] %v964_v48  ;;  %1060 = vst [vmem:[#allocation2 + $0x1b8] sm:$0xff] %v996_v49  ;;  %v1079_v44 = vld [vmem:[#allocation2 + $0x30] sm:$0xff] (!%p1363_p8)  ;;  %v1080_v45 = vld [vmem:[#allocation2 + $0x38] sm:$0xff] (!%p1363_p8) }
 0x13d   : > { %1026 = vst [vmem:[#allocation2 + $0xa8] sm:$0xff] %v962_v52  ;;  %1058 = vst [vmem:[#allocation2 + $0x1a8] sm:$0xff] %v994_v53  ;;  %v1081_v46 = vld [vmem:[#allocation2 + $0x40] sm:$0xff] (!%p1363_p8)  ;;  %v1082_v47 = vld [vmem:[#allocation2 + $0x48] sm:$0xff] (!%p1363_p8) }
 0x13e   : > { %1137 = vst [vmem:[%s1645_s3] sm:$0xff] (!%p1363_p8), %v1073_v38  ;;  %1138 = vst [vmem:[%s1645_s3 + $0x8] sm:$0xff] (!%p1363_p8), %v1074_v39  ;;  %v1083_v48 = vld [vmem:[#allocation2 + $0x50] sm:$0xff] (!%p1363_p8)  ;;  %v1084_v49 = vld [vmem:[#allocation2 + $0x58] sm:$0xff] (!%p1363_p8) }
 0x13f   : > { %v1427_v58 = vpop.f32.mrb[24].mxu0  ;;  %v1459_v59 = vpop.f32.mrb[24].mxu1  ;;  %1139 = vst [vmem:[%s1645_s3 + $0x10] sm:$0xff] (!%p1363_p8), %v1075_v40  ;;  %1140 = vst [vmem:[%s1645_s3 + $0x18] sm:$0xff] (!%p1363_p8), %v1076_v41  ;;  %v1085_v50 = vld [vmem:[#allocation2 + $0x60] sm:$0xff] (!%p1363_p8)  ;;  %v1086_v51 = vld [vmem:[#allocation2 + $0x68] sm:$0xff] (!%p1363_p8) }
 0x140   : > { %v967_v62 = vadd.f32 %v1427_v58, %v285_v54  ;;  %v999_v63 = vadd.f32 %v1459_v59, %v317_v55  ;;  %v782_v0 = vpop.f32.mrb[25].mxu0  ;;  %v910_v1 = vpop.f32.mrb[25].mxu1  ;;  %1141 = vst [vmem:[%s1645_s3 + $0x20] sm:$0xff] (!%p1363_p8), %v1077_v42  ;;  %1142 = vst [vmem:[%s1645_s3 + $0x28] sm:$0xff] (!%p1363_p8), %v1078_v43  ;;  %v1087_v52 = vld [vmem:[#allocation2 + $0x70] sm:$0xff] (!%p1363_p8)  ;;  %v1088_v53 = vld [vmem:[#allocation2 + $0x78] sm:$0xff] (!%p1363_p8) }
 0x141   : > { %v965_v4 = vadd.f32 %v782_v0, %v283_v56  ;;  %v997_v5 = vadd.f32 %v910_v1, %v315_v57  ;;  %v1428_v6 = vpop.f32.mrb[26].mxu0  ;;  %v1460_v7 = vpop.f32.mrb[26].mxu1  ;;  %1143 = vst [vmem:[%s1645_s3 + $0x30] sm:$0xff] (!%p1363_p8), %v1079_v44  ;;  %1144 = vst [vmem:[%s1645_s3 + $0x38] sm:$0xff] (!%p1363_p8), %v1080_v45  ;;  %v1089_v54 = vld [vmem:[#allocation2 + $0x80] sm:$0xff] (!%p1363_p8)  ;;  %v1090_v55 = vld [vmem:[#allocation2 + $0x88] sm:$0xff] (!%p1363_p8) }
 0x142   : > { %1031 = vst [vmem:[#allocation2 + $0xd0] sm:$0xff] %v967_v62  ;;  %1063 = vst [vmem:[#allocation2 + $0x1d0] sm:$0xff] %v999_v63  ;;  %v968_v8 = vadd.f32 %v1428_v6, %v286_v60  ;;  %v1000_v9 = vadd.f32 %v1460_v7, %v318_v61  ;;  %v785_v10 = vpop.f32.mrb[27].mxu0  ;;  %v913_v11 = vpop.f32.mrb[27].mxu1  ;;  %v1091_v56 = vld [vmem:[#allocation2 + $0x90] sm:$0xff] (!%p1363_p8)  ;;  %v1092_v57 = vld [vmem:[#allocation2 + $0x98] sm:$0xff] (!%p1363_p8) }
 0x143   : > { %1029 = vst [vmem:[#allocation2 + $0xc0] sm:$0xff] %v965_v4  ;;  %1061 = vst [vmem:[#allocation2 + $0x1c0] sm:$0xff] %v997_v5  ;;  %v966_v12 = vadd.f32 %v785_v10, %v284_v2  ;;  %v998_v13 = vadd.f32 %v913_v11, %v316_v3  ;;  %v1093_v58 = vld [vmem:[#allocation2 + $0xa0] sm:$0xff] (!%p1363_p8)  ;;  %v1095_v60 = vld [vmem:[#allocation2 + $0xb0] sm:$0xff] (!%p1363_p8) }
 0x144   : > { %1032 = vst [vmem:[#allocation2 + $0xd8] sm:$0xff] %v968_v8  ;;  %1064 = vst [vmem:[#allocation2 + $0x1d8] sm:$0xff] %v1000_v9  ;;  %v1094_v59 = vld [vmem:[#allocation2 + $0xa8] sm:$0xff] (!%p1363_p8)  ;;  %v1096_v61 = vld [vmem:[#allocation2 + $0xb8] sm:$0xff] (!%p1363_p8) }
 0x145   : > { %1030 = vst [vmem:[#allocation2 + $0xc8] sm:$0xff] %v966_v12  ;;  %1062 = vst [vmem:[#allocation2 + $0x1c8] sm:$0xff] %v998_v13  ;;  %v1105_v6 = vld [vmem:[#allocation2 + $0x100] sm:$0xff] (!%p1363_p8)  ;;  %v1106_v7 = vld [vmem:[#allocation2 + $0x108] sm:$0xff] (!%p1363_p8) }
 0x146   : > { %1145 = vst [vmem:[%s1645_s3 + $0x40] sm:$0xff] (!%p1363_p8), %v1081_v46  ;;  %1146 = vst [vmem:[%s1645_s3 + $0x48] sm:$0xff] (!%p1363_p8), %v1082_v47  ;;  %v1107_v8 = vld [vmem:[#allocation2 + $0x110] sm:$0xff] (!%p1363_p8)  ;;  %v1108_v9 = vld [vmem:[#allocation2 + $0x118] sm:$0xff] (!%p1363_p8) }
 0x147   : > { %v1431_v18 = vpop.f32.mrb[28].mxu0  ;;  %v1463_v19 = vpop.f32.mrb[28].mxu1  ;;  %1072 = sbr.rel (%p1363_p8) target bundleno = 358 (0x166), region = 36  ;;  %1147 = vst [vmem:[%s1645_s3 + $0x50] sm:$0xff] (!%p1363_p8), %v1083_v48  ;;  %1148 = vst [vmem:[%s1645_s3 + $0x58] sm:$0xff] (!%p1363_p8), %v1084_v49  ;;  %v1109_v10 = vld [vmem:[#allocation2 + $0x120] sm:$0xff] (!%p1363_p8) }
 0x148   : > { %v971_v22 = vadd.f32 %v1431_v18, %v289_v14  ;;  %v1003_v23 = vadd.f32 %v1463_v19, %v321_v15  ;;  %v798_v24 = vpop.f32.mrb[29].mxu0  ;;  %v926_v25 = vpop.f32.mrb[29].mxu1  ;;  %1149 = vst [vmem:[%s1645_s3 + $0x60] sm:$0xff] (!%p1363_p8), %v1085_v50  ;;  %1150 = vst [vmem:[%s1645_s3 + $0x68] sm:$0xff] (!%p1363_p8), %v1086_v51  ;;  %v1110_v11 = vld [vmem:[#allocation2 + $0x128] sm:$0xff] (!%p1363_p8)  ;;  %v1111_v12 = vld [vmem:[#allocation2 + $0x130] sm:$0xff] (!%p1363_p8) }
 0x149   : > { %v969_v28 = vadd.f32 %v798_v24, %v287_v16  ;;  %v1001_v29 = vadd.f32 %v926_v25, %v319_v17  ;;  %v1432_v30 = vpop.f32.mrb[30].mxu0  ;;  %v1464_v31 = vpop.f32.mrb[30].mxu1  ;;  %1151 = vst [vmem:[%s1645_s3 + $0x70] sm:$0xff] (!%p1363_p8), %v1087_v52  ;;  %1152 = vst [vmem:[%s1645_s3 + $0x78] sm:$0xff] (!%p1363_p8), %v1088_v53  ;;  %v1099_v0 = vld [vmem:[#allocation2 + $0xd0] sm:$0xff] (!%p1363_p8)  ;;  %v1112_v13 = vld [vmem:[#allocation2 + $0x138] sm:$0xff] (!%p1363_p8) }
 0x14a   : > { %1035 = vst [vmem:[#allocation2 + $0xf0] sm:$0xff] %v971_v22  ;;  %1067 = vst [vmem:[#allocation2 + $0x1f0] sm:$0xff] %v1003_v23  ;;  %v972_v32 = vadd.f32 %v1432_v30, %v290_v20  ;;  %v1004_v33 = vadd.f32 %v1464_v31, %v322_v21  ;;  %v801_v34 = vpop.f32.mrb[31].mxu0  ;;  %v929_v35 = vpop.f32.mrb[31].mxu1  ;;  %v1097_v62 = vld [vmem:[#allocation2 + $0xc0] sm:$0xff] (!%p1363_p8)  ;;  %v1114_v15 = vld [vmem:[#allocation2 + $0x148] sm:$0xff] (!%p1363_p8) }
 0x14b   : > { %1033 = vst [vmem:[#allocation2 + $0xe0] sm:$0xff] %v969_v28  ;;  %1065 = vst [vmem:[#allocation2 + $0x1e0] sm:$0xff] %v1001_v29  ;;  %v970_v36 = vadd.f32 %v801_v34, %v288_v26  ;;  %v1002_v37 = vadd.f32 %v929_v35, %v320_v27  ;;  %v1100_v1 = vld [vmem:[#allocation2 + $0xd8] sm:$0xff] (!%p1363_p8)  ;;  %v1113_v14 = vld [vmem:[#allocation2 + $0x140] sm:$0xff] (!%p1363_p8) }
 0x14c   : > { %1036 = vst [vmem:[#allocation2 + $0xf8] sm:$0xff] %v972_v32  ;;  %1068 = vst [vmem:[#allocation2 + $0x1f8] sm:$0xff] %v1004_v33  ;;  %v1098_v63 = vld [vmem:[#allocation2 + $0xc8] sm:$0xff] (!%p1363_p8)  ;;  %v1115_v16 = vld [vmem:[#allocation2 + $0x150] sm:$0xff] (!%p1363_p8) }
 0x14d   : > { %1034 = vst [vmem:[#allocation2 + $0xe8] sm:$0xff] %v970_v36  ;;  %1066 = vst [vmem:[#allocation2 + $0x1e8] sm:$0xff] %v1002_v37  ;;  %v1116_v17 = vld [vmem:[#allocation2 + $0x158] sm:$0xff] (!%p1363_p8)  ;;  %v1117_v18 = vld [vmem:[#allocation2 + $0x160] sm:$0xff] (!%p1363_p8) }
 0x14e   : > { %1153 = vst [vmem:[%s1645_s3 + $0x80] sm:$0xff] %v1089_v54  ;;  %1154 = vst [vmem:[%s1645_s3 + $0x88] sm:$0xff] %v1090_v55  ;;  %v1118_v19 = vld [vmem:[#allocation2 + $0x168] sm:$0xff]  ;;  %v1119_v20 = vld [vmem:[#allocation2 + $0x170] sm:$0xff] }
 0x14f   : > { %1155 = vst [vmem:[%s1645_s3 + $0x90] sm:$0xff] %v1091_v56  ;;  %1156 = vst [vmem:[%s1645_s3 + $0x98] sm:$0xff] %v1092_v57  ;;  %v1120_v21 = vld [vmem:[#allocation2 + $0x178] sm:$0xff]  ;;  %v1121_v22 = vld [vmem:[#allocation2 + $0x180] sm:$0xff] }
 0x150   : > { %1157 = vst [vmem:[%s1645_s3 + $0xa0] sm:$0xff] %v1093_v58  ;;  %1158 = vst [vmem:[%s1645_s3 + $0xa8] sm:$0xff] %v1094_v59  ;;  %v1122_v23 = vld [vmem:[#allocation2 + $0x188] sm:$0xff]  ;;  %v1123_v24 = vld [vmem:[#allocation2 + $0x190] sm:$0xff] }
 0x151   : > { %1159 = vst [vmem:[%s1645_s3 + $0xb0] sm:$0xff] %v1095_v60  ;;  %1160 = vst [vmem:[%s1645_s3 + $0xb8] sm:$0xff] %v1096_v61  ;;  %v1103_v4 = vld [vmem:[#allocation2 + $0xf0] sm:$0xff]  ;;  %v1124_v25 = vld [vmem:[#allocation2 + $0x198] sm:$0xff] }
 0x152   : > { %1161 = vst [vmem:[%s1645_s3 + $0xc0] sm:$0xff] %v1097_v62  ;;  %1162 = vst [vmem:[%s1645_s3 + $0xc8] sm:$0xff] %v1098_v63  ;;  %v1101_v2 = vld [vmem:[#allocation2 + $0xe0] sm:$0xff]  ;;  %v1126_v27 = vld [vmem:[#allocation2 + $0x1a8] sm:$0xff] }
 0x153   : > { %1163 = vst [vmem:[%s1645_s3 + $0xd0] sm:$0xff] %v1099_v0  ;;  %1164 = vst [vmem:[%s1645_s3 + $0xd8] sm:$0xff] %v1100_v1  ;;  %v1104_v5 = vld [vmem:[#allocation2 + $0xf8] sm:$0xff]  ;;  %v1125_v26 = vld [vmem:[#allocation2 + $0x1a0] sm:$0xff] }
 0x154   : > { %v1102_v3 = vld [vmem:[#allocation2 + $0xe8] sm:$0xff]  ;;  %1165 = vst [vmem:[%s1645_s3 + $0xe0] sm:$0xff] %v1101_v2  ;;  %1167 = vst [vmem:[%s1645_s3 + $0xf0] sm:$0xff] %v1103_v4  ;;  %v1127_v28 = vld [vmem:[#allocation2 + $0x1b0] sm:$0xff] }
 0x155   : > { %1166 = vst [vmem:[%s1645_s3 + $0xe8] sm:$0xff] %v1102_v3  ;;  %1168 = vst [vmem:[%s1645_s3 + $0xf8] sm:$0xff] %v1104_v5  ;;  %v1128_v29 = vld [vmem:[#allocation2 + $0x1b8] sm:$0xff]  ;;  %v1129_v30 = vld [vmem:[#allocation2 + $0x1c0] sm:$0xff] }
 0x156   : > { %1169 = vst [vmem:[%s1645_s3 + $0x100] sm:$0xff] %v1105_v6  ;;  %1170 = vst [vmem:[%s1645_s3 + $0x108] sm:$0xff] %v1106_v7  ;;  %v1130_v31 = vld [vmem:[#allocation2 + $0x1c8] sm:$0xff]  ;;  %v1131_v32 = vld [vmem:[#allocation2 + $0x1d0] sm:$0xff] }
 0x157   : > { %1171 = vst [vmem:[%s1645_s3 + $0x110] sm:$0xff] %v1107_v8  ;;  %1172 = vst [vmem:[%s1645_s3 + $0x118] sm:$0xff] %v1108_v9  ;;  %v1132_v33 = vld [vmem:[#allocation2 + $0x1d8] sm:$0xff]  ;;  %v1133_v34 = vld [vmem:[#allocation2 + $0x1e0] sm:$0xff] }
 0x158   : > { %1173 = vst [vmem:[%s1645_s3 + $0x120] sm:$0xff] %v1109_v10  ;;  %1174 = vst [vmem:[%s1645_s3 + $0x128] sm:$0xff] %v1110_v11  ;;  %v1134_v35 = vld [vmem:[#allocation2 + $0x1e8] sm:$0xff]  ;;  %v1135_v36 = vld [vmem:[#allocation2 + $0x1f0] sm:$0xff] }
 0x159   : > { %1175 = vst [vmem:[%s1645_s3 + $0x130] sm:$0xff] %v1111_v12  ;;  %1176 = vst [vmem:[%s1645_s3 + $0x138] sm:$0xff] %v1112_v13  ;;  %v1136_v37 = vld [vmem:[#allocation2 + $0x1f8] sm:$0xff] }
 0x15a   : > { %1177 = vst [vmem:[%s1645_s3 + $0x140] sm:$0xff] %v1113_v14  ;;  %1178 = vst [vmem:[%s1645_s3 + $0x148] sm:$0xff] %v1114_v15 }
 0x15b   : > { %1179 = vst [vmem:[%s1645_s3 + $0x150] sm:$0xff] %v1115_v16  ;;  %1180 = vst [vmem:[%s1645_s3 + $0x158] sm:$0xff] %v1116_v17 }
 0x15c   : > { %1181 = vst [vmem:[%s1645_s3 + $0x160] sm:$0xff] %v1117_v18  ;;  %1182 = vst [vmem:[%s1645_s3 + $0x168] sm:$0xff] %v1118_v19 }
 0x15d   : > { %1183 = vst [vmem:[%s1645_s3 + $0x170] sm:$0xff] %v1119_v20  ;;  %1184 = vst [vmem:[%s1645_s3 + $0x178] sm:$0xff] %v1120_v21 }
 0x15e   : > { %1185 = vst [vmem:[%s1645_s3 + $0x180] sm:$0xff] %v1121_v22  ;;  %1186 = vst [vmem:[%s1645_s3 + $0x188] sm:$0xff] %v1122_v23 }
 0x15f   : > { %1187 = vst [vmem:[%s1645_s3 + $0x190] sm:$0xff] %v1123_v24  ;;  %1188 = vst [vmem:[%s1645_s3 + $0x198] sm:$0xff] %v1124_v25 }
 0x160   : > { %1189 = vst [vmem:[%s1645_s3 + $0x1a0] sm:$0xff] %v1125_v26  ;;  %1190 = vst [vmem:[%s1645_s3 + $0x1a8] sm:$0xff] %v1126_v27 }
 0x161   : > { %1191 = vst [vmem:[%s1645_s3 + $0x1b0] sm:$0xff] %v1127_v28  ;;  %1192 = vst [vmem:[%s1645_s3 + $0x1b8] sm:$0xff] %v1128_v29 }
 0x162   : > { %1193 = vst [vmem:[%s1645_s3 + $0x1c0] sm:$0xff] %v1129_v30  ;;  %1194 = vst [vmem:[%s1645_s3 + $0x1c8] sm:$0xff] %v1130_v31 }
 0x163   : > { %1195 = vst [vmem:[%s1645_s3 + $0x1d0] sm:$0xff] %v1131_v32  ;;  %1196 = vst [vmem:[%s1645_s3 + $0x1d8] sm:$0xff] %v1132_v33 }
 0x164   : > { %1197 = vst [vmem:[%s1645_s3 + $0x1e0] sm:$0xff] %v1133_v34  ;;  %1198 = vst [vmem:[%s1645_s3 + $0x1e8] sm:$0xff] %v1134_v35 }
 0x165   : > { %1199 = vst [vmem:[%s1645_s3 + $0x1f0] sm:$0xff] %v1135_v36  ;;  %1200 = vst [vmem:[%s1645_s3 + $0x1f8] sm:$0xff] %v1136_v37 }
 0x166 PF: > { %s12_s13 = sadd.s32 1, %s1579_s13   ;;  %s1860_s9 = smov %s1571_s11 }
 0x167   : > { %p9_p9 = scmp.ge.s32.totalorder %s12_s13, 38   ;;  %s1861_s10 = smov %s1575_s12 }
 0x168   : > { %s1862_s11 = smov %s1865_s14  ;;  %s1863_s12 = smov %s1869_s15 }
 0x169   :  { %11 = sbr.rel (!%p9_p9) target bundleno = 3 (0x3), region = 69 }

// kernel: _lambda_.14
= control target key start
LH: loop header
LB: loop body
LE: loop exit
PB: predicated region body
PF: predicated region fallthrough
CT: control target
= control target key end

     0   :  { %s1223_s18 = smov 0   ;;  %s1651_s0 = inlined_call_operand.vmem [shape: f32[2048,128], index: 0, kind: input, shape index: {}]   ;;  %s1652_s1 = inlined_call_operand.vmem [shape: f32[1,128], index: 1, kind: input, shape index: {}]   ;;  %s1653_s2 = inlined_call_operand.vmem [shape: f32[1,128], index: 2, kind: input, shape index: {}]   ;;  %s1654_s3 = inlined_call_operand.vmem [shape: bf16[128,128], index: 3, kind: input, shape index: {}]   ;;  %s1655_s4 = inlined_call_operand.vmem [shape: f32[1,128], index: 4, kind: input, shape index: {}]   ;;  %s1656_s5 = inlined_call_operand.vmem [shape: f32[2048,128], index: 5, kind: output, shape index: {}]  }
   0x1 LB: > { %s1011_s19 = sadd.s32 4294967295, %s1191_s18   ;;  %p1015_p0 = scmp.ge.s32.totalorder %s1191_s18, 1  ;;  %s1191_s18 = sphi %s1223_s18, %s15_s18  }
   0x2   : > { %p188_p1 = scmp.lt.s32.totalorder %s1191_s18, 5 }
   0x4   : > { %p189_p2 = pnand %p1015_p0, %p188_p1 }
   0x5   : > { %v1177_v0 = vld [vmem:[%s1654_s3] sm:$0xff] (!%p189_p2)   ;;  %s1016_s22 = sshll.u32 (!%p189_p2), %s1011_s19, 6  ;;  %v1178_v1 = vld [vmem:[%s1654_s3 + $0x8] sm:$0xff] (!%p189_p2)   ;;  %v1179_v2 = vld [vmem:[%s1654_s3 + $0x10] sm:$0xff] (!%p189_p2)  }
   0x6   : > { %192 = sbr.rel (%p189_p2) target bundleno = 313 (0x139), region = 40  ;;  %p217_p3 = scmp.lt.s32.totalorder (!%p189_p2), %s1016_s22, 255  ;;  %1073 = vmatprep.subr.bf16.mxu0 (!%p189_p2), %v1177_v0  ;;  %1153 = vmatprep.subr.bf16.mxu1 (!%p189_p2), %v1177_v0  ;;  %v1180_v3 = vld [vmem:[%s1654_s3 + $0x18] sm:$0xff] (!%p189_p2)   ;;  %v1258_v6 = vld [vmem:[%s1652_s1] ss:$0 sm:$0xff] (!%p189_p2)  ;;  %v1182_v39 = vld [vmem:[%s1654_s3 + $0x28] sm:$0xff] (!%p189_p2)  }
   0x7   : > { %1074 = vmatpush3.bf16.msra.mxu0 (!%p189_p2), %v1177_v0  ;;  %1161 = vmatpush3.bf16.msra.mxu1 (!%p189_p2), %v1177_v0  ;;  %v1265_v9 = vld [vmem:[%s1653_s2] ss:$0 sm:$0xff] (!%p189_p2)  ;;  %v1183_v56 = vld [vmem:[%s1654_s3 + $0x30] sm:$0xff] (!%p189_p2)  }
   0x8   : > { %1075 = vmatprep.subr.bf16.mxu0 (!%p189_p2), %v1178_v1  ;;  %1154 = vmatprep.subr.bf16.mxu1 (!%p189_p2), %v1178_v1  ;;  %v1181_v21 = vld [vmem:[%s1654_s3 + $0x20] sm:$0xff] (!%p189_p2)  }
   0xb   : > { %1076 = vmatpush3.bf16.msra.mxu0 (!%p189_p2), %v1178_v1  ;;  %1162 = vmatpush3.bf16.msra.mxu1 (!%p189_p2), %v1178_v1 }
   0xc   : > { %1077 = vmatprep.subr.bf16.mxu0 (!%p189_p2), %v1179_v2  ;;  %1155 = vmatprep.subr.bf16.mxu1 (!%p189_p2), %v1179_v2 }
   0xd   : > { %s1658_s22 = smov (!%p217_p3, %s1016_s22), 255 }
   0xe   : > { %s1017_s27 = sshll.u32 %s1658_s22, 3 }
   0xf   : > { %s1248_s30 = scalar_lea.vmem %s1651_s0, %s1017_s27  ;;  %1078 = vmatpush3.bf16.msra.mxu0 %v1179_v2  ;;  %1163 = vmatpush3.bf16.msra.mxu1 %v1179_v2  ;;  %s1518_s26 = scalar_lea.vmem %s1656_s5, %s1017_s27 }
  0x10   : > { %v229_v4 = vld [vmem:[%s1248_s30] sm:$0xff]  ;;  %v230_v5 = vld [vmem:[%s1248_s30 + $0x8] sm:$0xff]  ;;  %v231_v14 = vld [vmem:[%s1248_s30 + $0x10] sm:$0xff]  ;;  %1079 = vmatprep.subr.bf16.mxu0 %v1180_v3  ;;  %1156 = vmatprep.subr.bf16.mxu1 %v1180_v3 }
  0x11   : > { %v300_v7 = vmul.f32 %v1258_v6, %v229_v4  ;;  %v301_v8 = vmul.f32 %v1258_v6, %v230_v5  ;;  %v261_v10 = vld [vmem:[%s1248_s30 + $0x100] sm:$0xff]  ;;  %v262_v11 = vld [vmem:[%s1248_s30 + $0x108] sm:$0xff]  ;;  %v232_v15 = vld [vmem:[%s1248_s30 + $0x18] sm:$0xff]  ;;  %v302_v19 = vmul.f32 %v1258_v6, %v231_v14 }
  0x12   : > { %v332_v12 = vmul.f32 %v1258_v6, %v261_v10  ;;  %v333_v13 = vmul.f32 %v1258_v6, %v262_v11  ;;  %v263_v16 = vld [vmem:[%s1248_s30 + $0x110] sm:$0xff]  ;;  %v264_v20 = vld [vmem:[%s1248_s30 + $0x118] sm:$0xff]  ;;  %v303_v24 = vmul.f32 %v1258_v6, %v232_v15  ;;  %v233_v25 = vld [vmem:[%s1248_s30 + $0x20] sm:$0xff] }
  0x13   : > { %v371_v17 = vadd.f32 %v1265_v9, %v300_v7  ;;  %v372_v18 = vadd.f32 %v1265_v9, %v301_v8  ;;  %v334_v28 = vmul.f32 %v1258_v6, %v263_v16  ;;  %v234_v29 = vld [vmem:[%s1248_s30 + $0x28] sm:$0xff]  ;;  %v335_v32 = vmul.f32 %v1258_v6, %v264_v20  ;;  %v265_v33 = vld [vmem:[%s1248_s30 + $0x120] sm:$0xff]  ;;  %1080 = vmatpush3.bf16.msra.mxu0 %v1180_v3  ;;  %v235_v38 = vld [vmem:[%s1248_s30 + $0x30] sm:$0xff] }
  0x14   : > { %v403_v22 = vadd.f32 %v1265_v9, %v332_v12  ;;  %v404_v23 = vadd.f32 %v1265_v9, %v333_v13  ;;  %v266_v34 = vld [vmem:[%s1248_s30 + $0x128] sm:$0xff]  ;;  %1164 = vmatpush3.bf16.msra.mxu1 %v1180_v3  ;;  %v373_v36 = vadd.f32 %v1265_v9, %v302_v19  ;;  %v304_v37 = vmul.f32 %v1258_v6, %v233_v25  ;;  %v236_v43 = vld [vmem:[%s1248_s30 + $0x38] sm:$0xff]  ;;  %v267_v47 = vld [vmem:[%s1248_s30 + $0x130] sm:$0xff] }
  0x15   : > { %v435_v26 = vmax.f32 %v371_v17, 0.0  ;;  %v436_v27 = vmax.f32 %v372_v18, 0.0  ;;  %1081 = vmatprep.subr.bf16.mxu0 %v1181_v21  ;;  %1157 = vmatprep.subr.bf16.mxu1 %v1181_v21  ;;  %v374_v41 = vadd.f32 %v1265_v9, %v303_v24  ;;  %v305_v42 = vmul.f32 %v1258_v6, %v234_v29  ;;  %v268_v52 = vld [vmem:[%s1248_s30 + $0x138] sm:$0xff]  ;;  %v237_v61 = vld [vmem:[%s1248_s30 + $0x40] sm:$0xff]  ;;  %v238_v1 = vld [vmem:[%s1248_s30 + $0x48] sm:$0xff] }
  0x16   : > { %v467_v30 = vmax.f32 %v403_v22, 0.0  ;;  %v468_v31 = vmax.f32 %v404_v23, 0.0  ;;  %v405_v44 = vadd.f32 %v1265_v9, %v334_v28  ;;  %v336_v45 = vmul.f32 %v1258_v6, %v265_v33  ;;  %v269_v7 = vld [vmem:[%s1248_s30 + $0x140] sm:$0xff]  ;;  %v270_v8 = vld [vmem:[%s1248_s30 + $0x148] sm:$0xff]  ;;  %v239_v14 = vld [vmem:[%s1248_s30 + $0x50] sm:$0xff] }
  0x17   : > { %v499_v35 = vpack.c.bf16 %v436_v27, %v435_v26  ;;  %v337_v46 = vmul.f32 %v1258_v6, %v266_v34  ;;  %v406_v48 = vadd.f32 %v1265_v9, %v335_v32  ;;  %v375_v49 = vadd.f32 %v1265_v9, %v304_v37  ;;  %1082 = vmatpush3.bf16.msra.mxu0 %v1181_v21  ;;  %v240_v15 = vld [vmem:[%s1248_s30 + $0x58] sm:$0xff] }
  0x18   : > { %v515_v40 = vpack.c.bf16 %v468_v31, %v467_v30  ;;  %v376_v50 = vadd.f32 %v1265_v9, %v305_v42  ;;  %v306_v51 = vmul.f32 %v1258_v6, %v235_v38  ;;  %1165 = vmatpush3.bf16.msra.mxu1 %v1181_v21  ;;  %v407_v53 = vadd.f32 %v1265_v9, %v336_v45  ;;  %v1184_v16 = vld [vmem:[%s1654_s3 + $0x38] sm:$0xff]   ;;  %v271_v21 = vld [vmem:[%s1248_s30 + $0x150] sm:$0xff]  ;;  %v241_v31 = vld [vmem:[%s1248_s30 + $0x60] sm:$0xff] }
  0x19   : > { %1089 = vmatprep.mubr.bf16.mxu0 %v499_v35  ;;  %v408_v54 = vadd.f32 %v1265_v9, %v337_v46  ;;  %v307_v55 = vmul.f32 %v1258_v6, %v236_v43  ;;  %1083 = vmatprep.subr.bf16.mxu0 %v1182_v39  ;;  %v437_v57 = vmax.f32 %v373_v36, 0.0  ;;  %v438_v58 = vmax.f32 %v374_v41, 0.0  ;;  %v272_v26 = vld [vmem:[%s1248_s30 + $0x158] sm:$0xff]  ;;  %v242_v35 = vld [vmem:[%s1248_s30 + $0x68] sm:$0xff]  ;;  %v243_v45 = vld [vmem:[%s1248_s30 + $0x70] sm:$0xff] }
  0x1a   : > { %1121 = vmatprep.mubr.bf16.mxu1 %v515_v40  ;;  %1158 = vmatprep.subr.bf16.mxu1 %v1182_v39  ;;  %v377_v59 = vadd.f32 %v1265_v9, %v306_v51  ;;  %v338_v60 = vmul.f32 %v1258_v6, %v267_v47  ;;  %v469_v62 = vmax.f32 %v405_v44, 0.0  ;;  %v339_v0 = vmul.f32 %v1258_v6, %v268_v52  ;;  %v274_v40 = vld [vmem:[%s1248_s30 + $0x168] sm:$0xff] }
  0x1b   : > { %v378_v63 = vadd.f32 %v1265_v9, %v307_v55  ;;  %v470_v2 = vmax.f32 %v406_v48, 0.0  ;;  %v439_v3 = vmax.f32 %v375_v49, 0.0  ;;  %v440_v4 = vmax.f32 %v376_v50, 0.0  ;;  %1084 = vmatpush3.bf16.msra.mxu0 %v1182_v39  ;;  %v244_v50 = vld [vmem:[%s1248_s30 + $0x78] sm:$0xff] }
  0x1c   : > { %v409_v5 = vadd.f32 %v1265_v9, %v338_v60  ;;  %1166 = vmatpush3.bf16.msra.mxu1 %v1182_v39  ;;  %v471_v10 = vmax.f32 %v407_v53, 0.0  ;;  %v472_v11 = vmax.f32 %v408_v54, 0.0  ;;  %v410_v12 = vadd.f32 %v1265_v9, %v339_v0  ;;  %1085 = vmatprep.subr.bf16.mxu0 %v1183_v56  ;;  %v273_v39 = vld [vmem:[%s1248_s30 + $0x160] sm:$0xff] }
  0x1d   : > { %v308_v13 = vmul.f32 %v1258_v6, %v237_v61  ;;  %1159 = vmatprep.subr.bf16.mxu1 %v1183_v56  ;;  %v500_v17 = vpack.c.bf16 %v438_v58, %v437_v57  ;;  %v441_v18 = vmax.f32 %v377_v59, 0.0  ;;  %v442_v19 = vmax.f32 %v378_v63, 0.0  ;;  %v275_v59 = vld [vmem:[%s1248_s30 + $0x170] sm:$0xff] }
  0x1e   : > { %v309_v20 = vmul.f32 %v1258_v6, %v238_v1  ;;  %v473_v22 = vmax.f32 %v409_v5, 0.0  ;;  %v474_v23 = vmax.f32 %v410_v12, 0.0  ;;  %v340_v24 = vmul.f32 %v1258_v6, %v269_v7  ;;  %v245_v5 = vld [vmem:[%s1248_s30 + $0x80] sm:$0xff]  ;;  %v246_v12 = vld [vmem:[%s1248_s30 + $0x88] sm:$0xff] }
  0x1f   : > { %v341_v25 = vmul.f32 %v1258_v6, %v270_v8  ;;  %v516_v27 = vpack.c.bf16 %v470_v2, %v469_v62  ;;  %v501_v28 = vpack.c.bf16 %v440_v4, %v439_v3  ;;  %v310_v29 = vmul.f32 %v1258_v6, %v239_v14  ;;  %1086 = vmatpush3.bf16.msra.mxu0 %v1183_v56  ;;  %v276_v4 = vld [vmem:[%s1248_s30 + $0x178] sm:$0xff] }
  0x20   : > { %v311_v30 = vmul.f32 %v1258_v6, %v240_v15  ;;  %1167 = vmatpush3.bf16.msra.mxu1 %v1183_v56  ;;  %v517_v32 = vpack.c.bf16 %v472_v11, %v471_v10  ;;  %v1339_v33 = vadd.f32 %v1265_v9, %v308_v13  ;;  %v342_v34 = vmul.f32 %v1258_v6, %v271_v21  ;;  %v277_v13 = vld [vmem:[%s1248_s30 + $0x180] sm:$0xff] }
  0x21   : > { %1087 = vmatprep.subr.bf16.mxu0 %v1184_v16  ;;  %1160 = vmatprep.subr.bf16.mxu1 %v1184_v16  ;;  %v1343_v36 = vpack.c.bf16 %v442_v19, %v441_v18  ;;  %v380_v37 = vadd.f32 %v1265_v9, %v309_v20  ;;  %v343_v38 = vmul.f32 %v1258_v6, %v272_v26  ;;  %v278_v18 = vld [vmem:[%s1248_s30 + $0x188] sm:$0xff]  ;;  %v247_v19 = vld [vmem:[%s1248_s30 + $0x90] sm:$0xff] }
  0x22   : > { %v1349_v41 = vpack.c.bf16 %v474_v23, %v473_v22  ;;  %v411_v42 = vadd.f32 %v1265_v9, %v340_v24  ;;  %v412_v43 = vadd.f32 %v1265_v9, %v341_v25  ;;  %v312_v44 = vmul.f32 %v1258_v6, %v241_v31  ;;  %v248_v24 = vld [vmem:[%s1248_s30 + $0x98] sm:$0xff] }
  0x23   : > { %v381_v46 = vadd.f32 %v1265_v9, %v310_v29  ;;  %v382_v47 = vadd.f32 %v1265_v9, %v311_v30  ;;  %v413_v48 = vadd.f32 %v1265_v9, %v342_v34  ;;  %v313_v49 = vmul.f32 %v1258_v6, %v242_v35  ;;  %1088 = vmatpush3.bf16.msra.mxu0 %v1184_v16  ;;  %v279_v29 = vld [vmem:[%s1248_s30 + $0x190] sm:$0xff]  ;;  %v280_v34 = vld [vmem:[%s1248_s30 + $0x198] sm:$0xff] }
  0x24   : > { %1168 = vmatpush3.bf16.msra.mxu1 %v1184_v16  ;;  %v443_v51 = vmax.f32 %v1339_v33, 0.0  ;;  %v414_v52 = vadd.f32 %v1265_v9, %v343_v38  ;;  %v344_v53 = vmul.f32 %v1258_v6, %v273_v39  ;;  %v345_v54 = vmul.f32 %v1258_v6, %v274_v40  ;;  %v249_v40 = vld [vmem:[%s1248_s30 + $0xa0] sm:$0xff] }
  0x25   : > { %v444_v55 = vmax.f32 %v380_v37, 0.0  ;;  %v383_v56 = vadd.f32 %v1265_v9, %v312_v44  ;;  %v384_v57 = vadd.f32 %v1265_v9, %v313_v49  ;;  %v314_v58 = vmul.f32 %v1258_v6, %v243_v45 }
  0x26   : > { %v475_v60 = vmax.f32 %v411_v42, 0.0  ;;  %v415_v61 = vadd.f32 %v1265_v9, %v344_v53  ;;  %v416_v62 = vadd.f32 %v1265_v9, %v345_v54  ;;  %v315_v63 = vmul.f32 %v1258_v6, %v244_v50  ;;  %1090 = vmatmul.mubr.bf16.vlgmr.msra.gmra.mrb[0].mxu0 %v500_v17  ;;  %v281_v50 = vld [vmem:[%s1248_s30 + $0x1a0] sm:$0xff] }
  0x27   : > { %1122 = vmatmul.mubr.bf16.vlgmr.msra.gmra.mrb[0].mxu1 %v516_v27  ;;  %v476_v0 = vmax.f32 %v412_v43, 0.0  ;;  %v445_v1 = vmax.f32 %v381_v46, 0.0  ;;  %v446_v2 = vmax.f32 %v382_v47, 0.0  ;;  %v385_v3 = vadd.f32 %v1265_v9, %v314_v58  ;;  %1093 = vmatprep.mubr.bf16.mxu0 %v501_v28  ;;  %v250_v46 = vld [vmem:[%s1248_s30 + $0xa8] sm:$0xff] }
  0x28   : > { %1125 = vmatprep.mubr.bf16.mxu1 %v517_v32  ;;  %v477_v7 = vmax.f32 %v413_v48, 0.0  ;;  %v478_v8 = vmax.f32 %v414_v52, 0.0  ;;  %v386_v10 = vadd.f32 %v1265_v9, %v315_v63  ;;  %v346_v11 = vmul.f32 %v1258_v6, %v275_v59 }
  0x29   : > { %v447_v14 = vmax.f32 %v383_v56, 0.0  ;;  %v448_v15 = vmax.f32 %v384_v57, 0.0  ;;  %v479_v16 = vmax.f32 %v415_v61, 0.0  ;;  %v480_v17 = vmax.f32 %v416_v62, 0.0 }
  0x2a   : > { %v449_v20 = vmax.f32 %v385_v3, 0.0  ;;  %v450_v21 = vmax.f32 %v386_v10, 0.0  ;;  %v347_v22 = vmul.f32 %v1258_v6, %v276_v4  ;;  %v316_v23 = vmul.f32 %v1258_v6, %v245_v5  ;;  %v283_v10 = vld [vmem:[%s1248_s30 + $0x1b0] sm:$0xff] }
  0x2b   : > { %v503_v25 = vpack.c.bf16 %v444_v55, %v443_v51  ;;  %v519_v26 = vpack.c.bf16 %v476_v0, %v475_v60  ;;  %v317_v27 = vmul.f32 %v1258_v6, %v246_v12  ;;  %v348_v28 = vmul.f32 %v1258_v6, %v277_v13  ;;  %v282_v51 = vld [vmem:[%s1248_s30 + $0x1a8] sm:$0xff]  ;;  %v251_v55 = vld [vmem:[%s1248_s30 + $0xb0] sm:$0xff] }
  0x2c   : > { %v504_v30 = vpack.c.bf16 %v446_v2, %v445_v1  ;;  %v417_v31 = vadd.f32 %v1265_v9, %v346_v11  ;;  %v349_v32 = vmul.f32 %v1258_v6, %v278_v18  ;;  %v318_v33 = vmul.f32 %v1258_v6, %v247_v19  ;;  %v252_v2 = vld [vmem:[%s1248_s30 + $0xb8] sm:$0xff] }
  0x2d   : > { %v520_v35 = vpack.c.bf16 %v478_v8, %v477_v7  ;;  %v505_v37 = vpack.c.bf16 %v448_v15, %v447_v14  ;;  %v521_v38 = vpack.c.bf16 %v480_v17, %v479_v16  ;;  %v319_v39 = vmul.f32 %v1258_v6, %v248_v24  ;;  %v284_v15 = vld [vmem:[%s1248_s30 + $0x1b8] sm:$0xff] }
  0x2e   : > { %v1392_v42 = vpack.c.bf16 %v450_v21, %v449_v20  ;;  %v418_v43 = vadd.f32 %v1265_v9, %v347_v22  ;;  %v387_v44 = vadd.f32 %v1265_v9, %v316_v23  ;;  %v350_v45 = vmul.f32 %v1258_v6, %v279_v29  ;;  %1094 = vmatmul.mubr.bf16.gmra.mrb[4].mxu0 %v1343_v36  ;;  %v253_v20 = vld [vmem:[%s1248_s30 + $0xc0] sm:$0xff]  ;;  %v254_v21 = vld [vmem:[%s1248_s30 + $0xc8] sm:$0xff] }
  0x2f   : > { %1126 = vmatmul.mubr.bf16.gmra.mrb[4].mxu1 %v1349_v41  ;;  %v388_v47 = vadd.f32 %v1265_v9, %v317_v27  ;;  %v419_v48 = vadd.f32 %v1265_v9, %v348_v28  ;;  %v351_v49 = vmul.f32 %v1258_v6, %v280_v34  ;;  %1097 = vmatprep.mubr.bf16.mxu0 %v503_v25  ;;  %v481_v52 = vmax.f32 %v417_v31, 0.0  ;;  %v285_v25 = vld [vmem:[%s1248_s30 + $0x1c0] sm:$0xff] }
  0x30   : > { %1129 = vmatprep.mubr.bf16.mxu1 %v519_v26  ;;  %v420_v53 = vadd.f32 %v1265_v9, %v349_v32  ;;  %v389_v54 = vadd.f32 %v1265_v9, %v318_v33  ;;  %v320_v36 = vmul.f32 %v1258_v6, %v249_v40  ;;  %v390_v41 = vadd.f32 %v1265_v9, %v319_v39  ;;  %v255_v26 = vld [vmem:[%s1248_s30 + $0xd0] sm:$0xff]  ;;  %v286_v32 = vld [vmem:[%s1248_s30 + $0x1c8] sm:$0xff] }
  0x31   : > { %v421_v56 = vadd.f32 %v1265_v9, %v350_v45  ;;  %v422_v57 = vadd.f32 %v1265_v9, %v351_v49  ;;  %v321_v58 = vmul.f32 %v1258_v6, %v250_v46  ;;  %v482_v59 = vmax.f32 %v418_v43, 0.0  ;;  %v288_v45 = vld [vmem:[%s1248_s30 + $0x1d8] sm:$0xff] }
  0x32   : > { %v391_v60 = vadd.f32 %v1265_v9, %v320_v36  ;;  %v352_v61 = vmul.f32 %v1258_v6, %v281_v50  ;;  %v353_v62 = vmul.f32 %v1258_v6, %v282_v51  ;;  %v451_v63 = vmax.f32 %v387_v44, 0.0  ;;  %v257_v50 = vld [vmem:[%s1248_s30 + $0xe0] sm:$0xff]  ;;  %v258_v36 = vld [vmem:[%s1248_s30 + $0xe8] sm:$0xff] }
  0x33   : > { %v452_v0 = vmax.f32 %v388_v47, 0.0  ;;  %v392_v1 = vadd.f32 %v1265_v9, %v321_v58  ;;  %v322_v3 = vmul.f32 %v1258_v6, %v251_v55  ;;  %v483_v4 = vmax.f32 %v419_v48, 0.0  ;;  %v289_v58 = vld [vmem:[%s1248_s30 + $0x1e0] sm:$0xff] }
  0x34   : > { %v484_v5 = vmax.f32 %v420_v53, 0.0  ;;  %v423_v7 = vadd.f32 %v1265_v9, %v352_v61  ;;  %v424_v8 = vadd.f32 %v1265_v9, %v353_v62  ;;  %v453_v11 = vmax.f32 %v389_v54, 0.0 }
  0x35   : > { %v454_v12 = vmax.f32 %v390_v41, 0.0  ;;  %v485_v13 = vmax.f32 %v421_v56, 0.0  ;;  %v486_v14 = vmax.f32 %v422_v57, 0.0  ;;  %v522_v16 = vpack.c.bf16 %v482_v59, %v481_v52  ;;  %v290_v59 = vld [vmem:[%s1248_s30 + $0x1e8] sm:$0xff] }
  0x36   : > { %v455_v17 = vmax.f32 %v391_v60, 0.0  ;;  %v456_v18 = vmax.f32 %v392_v1, 0.0  ;;  %v323_v19 = vmul.f32 %v1258_v6, %v252_v2  ;;  %1098 = vmatmul.mubr.bf16.gmra.mrb[8].mxu0 %v504_v30  ;;  %v507_v22 = vpack.c.bf16 %v452_v0, %v451_v63  ;;  %v256_v30 = vld [vmem:[%s1248_s30 + $0xd8] sm:$0xff]  ;;  %v259_v0 = vld [vmem:[%s1248_s30 + $0xf0] sm:$0xff] }
  0x37   : > { %1130 = vmatmul.mubr.bf16.gmra.mrb[8].mxu1 %v520_v35  ;;  %v1427_v23 = vadd.f32 %v1265_v9, %v322_v3  ;;  %v354_v24 = vmul.f32 %v1258_v6, %v283_v10  ;;  %1101 = vmatprep.mubr.bf16.mxu0 %v505_v37  ;;  %v523_v27 = vpack.c.bf16 %v484_v5, %v483_v4  ;;  %v487_v28 = vmax.f32 %v423_v7, 0.0  ;;  %v287_v37 = vld [vmem:[%s1248_s30 + $0x1d0] sm:$0xff]  ;;  %v260_v5 = vld [vmem:[%s1248_s30 + $0xf8] sm:$0xff] }
  0x38   : > { %1133 = vmatprep.mubr.bf16.mxu1 %v521_v38  ;;  %v488_v29 = vmax.f32 %v424_v8, 0.0  ;;  %v355_v31 = vmul.f32 %v1258_v6, %v284_v15  ;;  %v1435_v33 = vpack.c.bf16 %v454_v12, %v453_v11  ;;  %v1437_v34 = vpack.c.bf16 %v486_v14, %v485_v13 }
  0x39   : > { %v324_v35 = vmul.f32 %v1258_v6, %v253_v20  ;;  %v325_v39 = vmul.f32 %v1258_v6, %v254_v21  ;;  %v1442_v38 = vpack.c.bf16 %v456_v18, %v455_v17  ;;  %v1445_v40 = vadd.f32 %v1265_v9, %v323_v19 }
  0x3a   : > { %v356_v43 = vmul.f32 %v1258_v6, %v285_v25  ;;  %v326_v44 = vmul.f32 %v1258_v6, %v255_v26  ;;  %v457_v46 = vmax.f32 %v1427_v23, 0.0  ;;  %v1452_v47 = vadd.f32 %v1265_v9, %v354_v24 }
  0x3b   : > { %v357_v48 = vmul.f32 %v1258_v6, %v286_v32  ;;  %v327_v49 = vmul.f32 %v1258_v6, %v256_v30  ;;  %v525_v51 = vpack.c.bf16 %v488_v29, %v487_v28  ;;  %v1458_v52 = vadd.f32 %v1265_v9, %v355_v31 }
  0x3c   : > { %v397_v53 = vadd.f32 %v1265_v9, %v326_v44  ;;  %v358_v54 = vmul.f32 %v1258_v6, %v287_v37  ;;  %v1464_v55 = vadd.f32 %v1265_v9, %v324_v35  ;;  %v1467_v41 = vadd.f32 %v1265_v9, %v325_v39 }
  0x3d   : > { %v398_v56 = vadd.f32 %v1265_v9, %v327_v49  ;;  %v359_v57 = vmul.f32 %v1258_v6, %v288_v45  ;;  %v427_v60 = vadd.f32 %v1265_v9, %v356_v43  ;;  %v328_v63 = vmul.f32 %v1258_v6, %v257_v50 }
  0x3e   : > { %v461_v61 = vmax.f32 %v397_v53, 0.0  ;;  %v429_v62 = vadd.f32 %v1265_v9, %v358_v54  ;;  %1102 = vmatmul.mubr.bf16.gmra.mrb[12].mxu0 %v1392_v42  ;;  %v428_v1 = vadd.f32 %v1265_v9, %v357_v48  ;;  %v329_v4 = vmul.f32 %v1258_v6, %v258_v36  ;;  %v291_v42 = vld [vmem:[%s1248_s30 + $0x1f0] sm:$0xff] }
  0x3f   : > { %1134 = vmatmul.mubr.bf16.gmra.mrb[12].mxu1 %v522_v16  ;;  %v462_v2 = vmax.f32 %v398_v56, 0.0  ;;  %v430_v3 = vadd.f32 %v1265_v9, %v359_v57  ;;  %1105 = vmatprep.mubr.bf16.mxu0 %v507_v22  ;;  %v399_v8 = vadd.f32 %v1265_v9, %v328_v63  ;;  %v360_v10 = vmul.f32 %v1258_v6, %v289_v58  ;;  %v292_v16 = vld [vmem:[%s1248_s30 + $0x1f8] sm:$0xff] }
  0x40   : > { %1137 = vmatprep.mubr.bf16.mxu1 %v523_v27  ;;  %v493_v7 = vmax.f32 %v429_v62, 0.0  ;;  %v361_v11 = vmul.f32 %v1258_v6, %v290_v59  ;;  %v400_v14 = vadd.f32 %v1265_v9, %v329_v4  ;;  %v330_v15 = vmul.f32 %v1258_v6, %v259_v0 }
  0x41   : > { %v512_v12 = vpack.c.bf16 %v462_v2, %v461_v61  ;;  %v494_v13 = vmax.f32 %v430_v3, 0.0  ;;  %v463_v17 = vmax.f32 %v399_v8, 0.0  ;;  %v431_v18 = vadd.f32 %v1265_v9, %v360_v10 }
  0x42   : > { %v432_v19 = vadd.f32 %v1265_v9, %v361_v11  ;;  %v331_v20 = vmul.f32 %v1258_v6, %v260_v5  ;;  %v464_v22 = vmax.f32 %v400_v14, 0.0  ;;  %v401_v24 = vadd.f32 %v1265_v9, %v330_v15 }
  0x43   : > { %v528_v21 = vpack.c.bf16 %v494_v13, %v493_v7  ;;  %v362_v25 = vmul.f32 %v1258_v6, %v291_v42  ;;  %v495_v26 = vmax.f32 %v431_v18, 0.0  ;;  %v363_v29 = vmul.f32 %v1258_v6, %v292_v16 }
  0x44   : > { %v496_v27 = vmax.f32 %v432_v19, 0.0  ;;  %v402_v28 = vadd.f32 %v1265_v9, %v331_v20  ;;  %v458_v31 = vmax.f32 %v1445_v40, 0.0  ;;  %v513_v32 = vpack.c.bf16 %v464_v22, %v463_v17 }
  0x45   : > { %v465_v30 = vmax.f32 %v401_v24, 0.0  ;;  %v433_v35 = vadd.f32 %v1265_v9, %v362_v25  ;;  %v489_v39 = vmax.f32 %v1452_v47, 0.0  ;;  %v434_v44 = vadd.f32 %v1265_v9, %v363_v29 }
  0x46   : > { %v529_v37 = vpack.c.bf16 %v496_v27, %v495_v26  ;;  %v466_v43 = vmax.f32 %v402_v28, 0.0  ;;  %1106 = vmatmul.mubr.bf16.gmra.mrb[16].mxu0 %v1435_v33  ;;  %v490_v45 = vmax.f32 %v1458_v52, 0.0  ;;  %v459_v6 = vmax.f32 %v1464_v55, 0.0 }
  0x47   : > { %1138 = vmatmul.mubr.bf16.gmra.mrb[16].mxu1 %v1437_v34  ;;  %v460_v40 = vmax.f32 %v1467_v41, 0.0  ;;  %v497_v48 = vmax.f32 %v433_v35, 0.0  ;;  %1109 = vmatprep.mubr.bf16.mxu0 %v1442_v38  ;;  %v491_v49 = vmax.f32 %v427_v60, 0.0  ;;  %v492_v47 = vmax.f32 %v428_v1, 0.0  ;;  %v1511_v38 = vld [vmem:[%s1655_s4] ss:$0 sm:$0xff] }
  0x48   : > { %1141 = vmatprep.mubr.bf16.mxu1 %v525_v51  ;;  %v514_v50 = vpack.c.bf16 %v466_v43, %v465_v30  ;;  %v498_v53 = vmax.f32 %v434_v44, 0.0  ;;  %v510_v9 = vpack.c.bf16 %v458_v31, %v457_v46  ;;  %v526_v33 = vpack.c.bf16 %v490_v45, %v489_v39 }
  0x49   : > { %v511_v34 = vpack.c.bf16 %v460_v40, %v459_v6  ;;  %v527_v52 = vpack.c.bf16 %v492_v47, %v491_v49 }
  0x4a   : > { %v530_v54 = vpack.c.bf16 %v498_v53, %v497_v48 }
  0x4e   : > { %1110 = vmatmul.mubr.bf16.gmra.mrb[20].mxu0 %v510_v9 }
  0x4f   : > { %1142 = vmatmul.mubr.bf16.gmra.mrb[20].mxu1 %v526_v33  ;;  %1113 = vmatprep.mubr.bf16.mxu0 %v511_v34 }
  0x50   : > { %1145 = vmatprep.mubr.bf16.mxu1 %v527_v52 }
  0x56   : > { %1114 = vmatmul.mubr.bf16.gmra.mrb[24].mxu0 %v512_v12 }
  0x57   : > { %1146 = vmatmul.mubr.bf16.gmra.mrb[24].mxu1 %v528_v21  ;;  %1117 = vmatprep.mubr.bf16.mxu0 %v513_v32 }
  0x58   : > { %1149 = vmatprep.mubr.bf16.mxu1 %v529_v37 }
  0x5e   : > { %1118 = vmatmul.mubr.bf16.gmra.mrb[28].mxu0 %v514_v50 }
  0x5f   : > { %1150 = vmatmul.mubr.bf16.gmra.mrb[28].mxu1 %v530_v54 }
  0xf9   : > { %v1091_v23 = vpop.f32.mrb[0].mxu0 }
  0xfa   : > { %v1123_v46 = vpop.f32.mrb[0].mxu1  ;;  %v645_v51 = vadd.f32 %v1091_v23, %v1511_v38  ;;  %v636_v55 = vpop.f32.mrb[1].mxu0 }
  0xfb   : > { %v773_v36 = vadd.f32 %v1123_v46, %v1511_v38  ;;  %v764_v41 = vpop.f32.mrb[1].mxu1  ;;  %v637_v56 = vadd.f32 %v1511_v38, %v636_v55  ;;  %v1092_v58 = vpop.f32.mrb[2].mxu0 }
  0xfc   : > { %v765_v57 = vadd.f32 %v1511_v38, %v764_v41  ;;  %v1124_v59 = vpop.f32.mrb[2].mxu1  ;;  %893 = vst [vmem:[%s1518_s26 + $0x10] sm:$0xff] %v645_v51  ;;  %v648_v60 = vadd.f32 %v1092_v58, %v1511_v38  ;;  %v639_v62 = vpop.f32.mrb[3].mxu0 }
  0xfd   : > { %925 = vst [vmem:[%s1518_s26 + $0x110] sm:$0xff] %v773_v36  ;;  %v776_v61 = vadd.f32 %v1124_v59, %v1511_v38  ;;  %v767_v63 = vpop.f32.mrb[3].mxu1  ;;  %891 = vst [vmem:[%s1518_s26] sm:$0xff] %v637_v56  ;;  %v640_v0 = vadd.f32 %v1511_v38, %v639_v62 }
  0xfe   : > { %923 = vst [vmem:[%s1518_s26 + $0x100] sm:$0xff] %v765_v57  ;;  %v768_v1 = vadd.f32 %v1511_v38, %v767_v63  ;;  %894 = vst [vmem:[%s1518_s26 + $0x18] sm:$0xff] %v648_v60 }
  0xff   : > { %926 = vst [vmem:[%s1518_s26 + $0x118] sm:$0xff] %v776_v61  ;;  %892 = vst [vmem:[%s1518_s26 + $0x8] sm:$0xff] %v640_v0 }
 0x100   : > { %924 = vst [vmem:[%s1518_s26 + $0x108] sm:$0xff] %v768_v1 }
 0x101   : > { %v1095_v2 = vpop.f32.mrb[4].mxu0 }
 0x102   : > { %v1127_v3 = vpop.f32.mrb[4].mxu1  ;;  %v661_v4 = vadd.f32 %v1095_v2, %v1511_v38  ;;  %v652_v7 = vpop.f32.mrb[5].mxu0 }
 0x103   : > { %v789_v5 = vadd.f32 %v1127_v3, %v1511_v38  ;;  %v780_v8 = vpop.f32.mrb[5].mxu1  ;;  %v653_v10 = vadd.f32 %v1511_v38, %v652_v7  ;;  %v1096_v42 = vpop.f32.mrb[6].mxu0 }
 0x104   : > { %v781_v11 = vadd.f32 %v1511_v38, %v780_v8  ;;  %v1128_v12 = vpop.f32.mrb[6].mxu1  ;;  %897 = vst [vmem:[%s1518_s26 + $0x30] sm:$0xff] %v661_v4  ;;  %v664_v13 = vadd.f32 %v1096_v42, %v1511_v38  ;;  %v655_v15 = vpop.f32.mrb[7].mxu0 }
 0x105   : > { %929 = vst [vmem:[%s1518_s26 + $0x130] sm:$0xff] %v789_v5  ;;  %v792_v14 = vadd.f32 %v1128_v12, %v1511_v38  ;;  %v783_v16 = vpop.f32.mrb[7].mxu1  ;;  %895 = vst [vmem:[%s1518_s26 + $0x20] sm:$0xff] %v653_v10  ;;  %v656_v17 = vadd.f32 %v1511_v38, %v655_v15 }
 0x106   : > { %927 = vst [vmem:[%s1518_s26 + $0x120] sm:$0xff] %v781_v11  ;;  %v784_v18 = vadd.f32 %v1511_v38, %v783_v16  ;;  %898 = vst [vmem:[%s1518_s26 + $0x38] sm:$0xff] %v664_v13 }
 0x107   : > { %930 = vst [vmem:[%s1518_s26 + $0x138] sm:$0xff] %v792_v14  ;;  %896 = vst [vmem:[%s1518_s26 + $0x28] sm:$0xff] %v656_v17 }
 0x108   : > { %928 = vst [vmem:[%s1518_s26 + $0x128] sm:$0xff] %v784_v18 }
 0x109   : > { %v1099_v19 = vpop.f32.mrb[8].mxu0 }
 0x10a   : > { %v1131_v20 = vpop.f32.mrb[8].mxu1  ;;  %v677_v21 = vadd.f32 %v1099_v19, %v1511_v38  ;;  %v668_v24 = vpop.f32.mrb[9].mxu0 }
 0x10b   : > { %v805_v22 = vadd.f32 %v1131_v20, %v1511_v38  ;;  %v796_v25 = vpop.f32.mrb[9].mxu1  ;;  %v669_v26 = vadd.f32 %v1511_v38, %v668_v24  ;;  %v1100_v28 = vpop.f32.mrb[10].mxu0 }
 0x10c   : > { %v797_v27 = vadd.f32 %v1511_v38, %v796_v25  ;;  %v1132_v29 = vpop.f32.mrb[10].mxu1  ;;  %901 = vst [vmem:[%s1518_s26 + $0x50] sm:$0xff] %v677_v21  ;;  %v680_v31 = vadd.f32 %v1100_v28, %v1511_v38  ;;  %v671_v30 = vpop.f32.mrb[11].mxu0 }
 0x10d   : > { %933 = vst [vmem:[%s1518_s26 + $0x150] sm:$0xff] %v805_v22  ;;  %v808_v32 = vadd.f32 %v1132_v29, %v1511_v38  ;;  %v799_v35 = vpop.f32.mrb[11].mxu1  ;;  %899 = vst [vmem:[%s1518_s26 + $0x40] sm:$0xff] %v669_v26  ;;  %v672_v39 = vadd.f32 %v1511_v38, %v671_v30 }
 0x10e   : > { %931 = vst [vmem:[%s1518_s26 + $0x140] sm:$0xff] %v797_v27  ;;  %v800_v37 = vadd.f32 %v1511_v38, %v799_v35  ;;  %902 = vst [vmem:[%s1518_s26 + $0x58] sm:$0xff] %v680_v31 }
 0x10f   : > { %934 = vst [vmem:[%s1518_s26 + $0x158] sm:$0xff] %v808_v32  ;;  %900 = vst [vmem:[%s1518_s26 + $0x48] sm:$0xff] %v672_v39 }
 0x110   : > { %932 = vst [vmem:[%s1518_s26 + $0x148] sm:$0xff] %v800_v37 }
 0x111   : > { %v1103_v43 = vpop.f32.mrb[12].mxu0 }
 0x112   : > { %v1135_v44 = vpop.f32.mrb[12].mxu1  ;;  %v693_v45 = vadd.f32 %v1103_v43, %v1511_v38  ;;  %v684_v40 = vpop.f32.mrb[13].mxu0 }
 0x113   : > { %v821_v6 = vadd.f32 %v1135_v44, %v1511_v38  ;;  %v812_v48 = vpop.f32.mrb[13].mxu1  ;;  %v685_v49 = vadd.f32 %v1511_v38, %v684_v40  ;;  %v1104_v50 = vpop.f32.mrb[14].mxu0 }
 0x114   : > { %v813_v47 = vadd.f32 %v1511_v38, %v812_v48  ;;  %v1136_v53 = vpop.f32.mrb[14].mxu1  ;;  %905 = vst [vmem:[%s1518_s26 + $0x70] sm:$0xff] %v693_v45  ;;  %v696_v54 = vadd.f32 %v1104_v50, %v1511_v38  ;;  %v687_v33 = vpop.f32.mrb[15].mxu0 }
 0x115   : > { %937 = vst [vmem:[%s1518_s26 + $0x170] sm:$0xff] %v821_v6  ;;  %v824_v9 = vadd.f32 %v1136_v53, %v1511_v38  ;;  %v815_v34 = vpop.f32.mrb[15].mxu1  ;;  %903 = vst [vmem:[%s1518_s26 + $0x60] sm:$0xff] %v685_v49  ;;  %v688_v52 = vadd.f32 %v1511_v38, %v687_v33 }
 0x116   : > { %935 = vst [vmem:[%s1518_s26 + $0x160] sm:$0xff] %v813_v47  ;;  %v816_v23 = vadd.f32 %v1511_v38, %v815_v34  ;;  %906 = vst [vmem:[%s1518_s26 + $0x78] sm:$0xff] %v696_v54 }
 0x117   : > { %938 = vst [vmem:[%s1518_s26 + $0x178] sm:$0xff] %v824_v9  ;;  %904 = vst [vmem:[%s1518_s26 + $0x68] sm:$0xff] %v688_v52 }
 0x118   : > { %936 = vst [vmem:[%s1518_s26 + $0x168] sm:$0xff] %v816_v23 }
 0x119   : > { %v1107_v46 = vpop.f32.mrb[16].mxu0 }
 0x11a   : > { %v1139_v51 = vpop.f32.mrb[16].mxu1  ;;  %v709_v36 = vadd.f32 %v1107_v46, %v1511_v38  ;;  %v700_v41 = vpop.f32.mrb[17].mxu0 }
 0x11b   : > { %v837_v55 = vadd.f32 %v1139_v51, %v1511_v38  ;;  %v828_v56 = vpop.f32.mrb[17].mxu1  ;;  %v701_v57 = vadd.f32 %v1511_v38, %v700_v41  ;;  %v1108_v59 = vpop.f32.mrb[18].mxu0 }
 0x11c   : > { %v829_v58 = vadd.f32 %v1511_v38, %v828_v56  ;;  %v1140_v60 = vpop.f32.mrb[18].mxu1  ;;  %909 = vst [vmem:[%s1518_s26 + $0x90] sm:$0xff] %v709_v36  ;;  %v712_v61 = vadd.f32 %v1108_v59, %v1511_v38  ;;  %v703_v63 = vpop.f32.mrb[19].mxu0 }
 0x11d   : > { %941 = vst [vmem:[%s1518_s26 + $0x190] sm:$0xff] %v837_v55  ;;  %v840_v62 = vadd.f32 %v1140_v60, %v1511_v38  ;;  %v831_v0 = vpop.f32.mrb[19].mxu1  ;;  %907 = vst [vmem:[%s1518_s26 + $0x80] sm:$0xff] %v701_v57  ;;  %v704_v1 = vadd.f32 %v1511_v38, %v703_v63 }
 0x11e   : > { %939 = vst [vmem:[%s1518_s26 + $0x180] sm:$0xff] %v829_v58  ;;  %v832_v2 = vadd.f32 %v1511_v38, %v831_v0  ;;  %910 = vst [vmem:[%s1518_s26 + $0x98] sm:$0xff] %v712_v61 }
 0x11f   : > { %942 = vst [vmem:[%s1518_s26 + $0x198] sm:$0xff] %v840_v62  ;;  %908 = vst [vmem:[%s1518_s26 + $0x88] sm:$0xff] %v704_v1 }
 0x120   : > { %940 = vst [vmem:[%s1518_s26 + $0x188] sm:$0xff] %v832_v2 }
 0x121   : > { %v1111_v3 = vpop.f32.mrb[20].mxu0 }
 0x122   : > { %v1143_v4 = vpop.f32.mrb[20].mxu1  ;;  %v725_v5 = vadd.f32 %v1111_v3, %v1511_v38  ;;  %v716_v8 = vpop.f32.mrb[21].mxu0 }
 0x123   : > { %v853_v7 = vadd.f32 %v1143_v4, %v1511_v38  ;;  %v844_v10 = vpop.f32.mrb[21].mxu1  ;;  %v717_v11 = vadd.f32 %v1511_v38, %v716_v8  ;;  %v1112_v12 = vpop.f32.mrb[22].mxu0 }
 0x124   : > { %v845_v42 = vadd.f32 %v1511_v38, %v844_v10  ;;  %v1144_v13 = vpop.f32.mrb[22].mxu1  ;;  %913 = vst [vmem:[%s1518_s26 + $0xb0] sm:$0xff] %v725_v5  ;;  %v728_v14 = vadd.f32 %v1112_v12, %v1511_v38  ;;  %v719_v16 = vpop.f32.mrb[23].mxu0 }
 0x125   : > { %945 = vst [vmem:[%s1518_s26 + $0x1b0] sm:$0xff] %v853_v7  ;;  %v856_v15 = vadd.f32 %v1144_v13, %v1511_v38  ;;  %v847_v17 = vpop.f32.mrb[23].mxu1  ;;  %911 = vst [vmem:[%s1518_s26 + $0xa0] sm:$0xff] %v717_v11  ;;  %v720_v18 = vadd.f32 %v1511_v38, %v719_v16 }
 0x126   : > { %943 = vst [vmem:[%s1518_s26 + $0x1a0] sm:$0xff] %v845_v42  ;;  %v848_v19 = vadd.f32 %v1511_v38, %v847_v17  ;;  %914 = vst [vmem:[%s1518_s26 + $0xb8] sm:$0xff] %v728_v14 }
 0x127   : > { %946 = vst [vmem:[%s1518_s26 + $0x1b8] sm:$0xff] %v856_v15  ;;  %912 = vst [vmem:[%s1518_s26 + $0xa8] sm:$0xff] %v720_v18 }
 0x128   : > { %944 = vst [vmem:[%s1518_s26 + $0x1a8] sm:$0xff] %v848_v19 }
 0x129   : > { %v1115_v20 = vpop.f32.mrb[24].mxu0 }
 0x12a   : > { %v1147_v21 = vpop.f32.mrb[24].mxu1  ;;  %v741_v22 = vadd.f32 %v1115_v20, %v1511_v38  ;;  %v732_v25 = vpop.f32.mrb[25].mxu0 }
 0x12b   : > { %v869_v24 = vadd.f32 %v1147_v21, %v1511_v38  ;;  %v860_v26 = vpop.f32.mrb[25].mxu1  ;;  %v733_v27 = vadd.f32 %v1511_v38, %v732_v25  ;;  %v1116_v29 = vpop.f32.mrb[26].mxu0 }
 0x12c   : > { %v861_v28 = vadd.f32 %v1511_v38, %v860_v26  ;;  %v1148_v31 = vpop.f32.mrb[26].mxu1  ;;  %917 = vst [vmem:[%s1518_s26 + $0xd0] sm:$0xff] %v741_v22  ;;  %v744_v32 = vadd.f32 %v1116_v29, %v1511_v38  ;;  %v735_v35 = vpop.f32.mrb[27].mxu0 }
 0x12d   : > { %949 = vst [vmem:[%s1518_s26 + $0x1d0] sm:$0xff] %v869_v24  ;;  %v872_v30 = vadd.f32 %v1148_v31, %v1511_v38  ;;  %v863_v39 = vpop.f32.mrb[27].mxu1  ;;  %915 = vst [vmem:[%s1518_s26 + $0xc0] sm:$0xff] %v733_v27  ;;  %v736_v37 = vadd.f32 %v1511_v38, %v735_v35 }
 0x12e   : > { %947 = vst [vmem:[%s1518_s26 + $0x1c0] sm:$0xff] %v861_v28  ;;  %v864_v43 = vadd.f32 %v1511_v38, %v863_v39  ;;  %918 = vst [vmem:[%s1518_s26 + $0xd8] sm:$0xff] %v744_v32 }
 0x12f   : > { %950 = vst [vmem:[%s1518_s26 + $0x1d8] sm:$0xff] %v872_v30  ;;  %916 = vst [vmem:[%s1518_s26 + $0xc8] sm:$0xff] %v736_v37 }
 0x130   : > { %948 = vst [vmem:[%s1518_s26 + $0x1c8] sm:$0xff] %v864_v43 }
 0x131   : > { %v1119_v44 = vpop.f32.mrb[28].mxu0 }
 0x132   : > { %v1151_v45 = vpop.f32.mrb[28].mxu1  ;;  %v757_v6 = vadd.f32 %v1119_v44, %v1511_v38  ;;  %v748_v48 = vpop.f32.mrb[29].mxu0 }
 0x133   : > { %v885_v40 = vadd.f32 %v1151_v45, %v1511_v38  ;;  %v876_v49 = vpop.f32.mrb[29].mxu1  ;;  %v749_v47 = vadd.f32 %v1511_v38, %v748_v48  ;;  %v1120_v53 = vpop.f32.mrb[30].mxu0 }
 0x134   : > { %v877_v50 = vadd.f32 %v1511_v38, %v876_v49  ;;  %v1152_v54 = vpop.f32.mrb[30].mxu1  ;;  %921 = vst [vmem:[%s1518_s26 + $0xf0] sm:$0xff] %v757_v6  ;;  %v760_v9 = vadd.f32 %v1120_v53, %v1511_v38  ;;  %v751_v34 = vpop.f32.mrb[31].mxu0 }
 0x135   : > { %953 = vst [vmem:[%s1518_s26 + $0x1f0] sm:$0xff] %v885_v40  ;;  %v888_v33 = vadd.f32 %v1152_v54, %v1511_v38  ;;  %v879_v52 = vpop.f32.mrb[31].mxu1  ;;  %919 = vst [vmem:[%s1518_s26 + $0xe0] sm:$0xff] %v749_v47  ;;  %v752_v23 = vadd.f32 %v1511_v38, %v751_v34 }
 0x136   : > { %951 = vst [vmem:[%s1518_s26 + $0x1e0] sm:$0xff] %v877_v50  ;;  %v880_v46 = vadd.f32 %v1511_v38, %v879_v52  ;;  %922 = vst [vmem:[%s1518_s26 + $0xf8] sm:$0xff] %v760_v9 }
 0x137   : > { %954 = vst [vmem:[%s1518_s26 + $0x1f8] sm:$0xff] %v888_v33  ;;  %920 = vst [vmem:[%s1518_s26 + $0xe8] sm:$0xff] %v752_v23 }
 0x138   : > { %952 = vst [vmem:[%s1518_s26 + $0x1e8] sm:$0xff] %v880_v46 }
 0x139 PF: > { %s15_s18 = sadd.s32 1, %s1191_s18  }
 0x13a   : > { %p12_p4 = scmp.ge.s32.totalorder %s15_s18, 6  }
 0x13c   :  { %14 = sbr.rel (!%p12_p4) target bundleno = 1 (0x1), region = 70 }

// kernel: _lambda_.15
= control target key start
LH: loop header
LB: loop body
LE: loop exit
PB: predicated region body
PF: predicated region fallthrough
CT: control target
= control target key end

     0   :  { %s1611_s9 = smov 0   ;;  %s1613_s10 = smov 0   ;;  %s1845_s0 = inlined_call_operand.vmem [shape: bf16[9,2048,128], index: 0, kind: input, shape index: {}]   ;;  %s1846_s1 = inlined_call_operand.vmem [shape: bf16[9,128,128], index: 1, kind: input, shape index: {}]   ;;  %s1847_s2 = inlined_call_operand.vmem [shape: f32[2048,128], index: 2, kind: output, shape index: {}]  }
   0x1   :  { %s1615_s11 = smov 0   ;;  %s1617_s12 = smov 0  }
   0x2   :  { %s1619_s13 = smov 0  }
   0x3 LB: > { %s21_s14 = sadd.s32 1, %s1585_s11  ;;  %s24_s15 = sadd.s32 1, %s1589_s12  ;;  %s1593_s13 = sphi %s1619_s13, %s12_s13   ;;  %s1589_s12 = sphi %s1617_s12, %s1851_s12   ;;  %s1585_s11 = sphi %s1615_s11, %s1850_s11   ;;  %s1581_s10 = sphi %s1613_s10, %s1849_s10   ;;  %s1577_s9 = sphi %s1611_s9, %s1848_s9  }
   0x4   : > { %p22_p0 = scmp.ge.s32.totalorder %s21_s14, 9  ;;  %p1285_p1 = scmp.ge.s32.totalorder %s1593_s13, 1 }
   0x5   : > { %p141_p2 = scmp.lt.s32.totalorder %s1593_s13, 37 }
   0x6   : > { %s1853_s14 = smov (%p22_p0, %s21_s14), 0  ;;  %s1855_s15 = smov (!%p22_p0, %s24_s15), %s1589_s12 }
   0x7   : > { %p142_p3 = pnand %p1285_p1, %p141_p2  ;;  %p26_p4 = scmp.ge.s32.totalorder %s1855_s15, 4 }
   0x8   : > { %s1286_s16 = sshll.u32 (!%p142_p3), %s1581_s10, 6  ;;  %p173_p5 = scmp.lt.s32.totalorder (!%p142_p3), %s1577_s9, 8 }
   0x9   : > { %s1857_s15 = smov (%p26_p4, %s1855_s15), 0  ;;  %145 = sbr.rel (%p142_p3) target bundleno = 382 (0x17e), region = 28 }
   0xa   : > { %p175_p6 = scmp.lt.s32.totalorder (!%p142_p3), %s1286_s16, 255  ;;  %p1293_p7 = scmp.ne.s32.totalorder (!%p142_p3), %s1577_s9, 0 }
  0x10   : > { %s174_s17 = scalar_select %p173_p5, %s1577_s9, 8 }
  0x11   : > { %s1859_s16 = smov (!%p175_p6, %s1286_s16), 255  ;;  %197 = sbr.rel (%p1293_p7) target bundleno = 51 (0x33), region = 32 }
  0x12   : > { %s1287_s18 = sshll.u32 %s174_s17, 8  ;;  %s1337_s19 = sshll.u32 %s174_s17, 6  ;;  %v1595_v0 = vmov (!%p1293_p7), 0.0  }
  0x13   : > { %s178_s20 = sadd.s32 %s1287_s18, %s1859_s16  ;;  %s1648_s23 = scalar_lea.vmem %s1846_s1, %s1337_s19  ;;  %198 = vst [vmem:[#allocation2] sm:$0xff] (!%p1293_p7), %v1595_v0  ;;  %199 = vst [vmem:[#allocation2 + $0x8] sm:$0xff] (!%p1293_p7), %v1595_v0 }
  0x14   : > { %s1288_s24 = sshll.u32 %s178_s20, 2  ;;  %s1292_s25 = sshll.u32 %s1859_s16, 3  ;;  %200 = vst [vmem:[#allocation2 + $0x10] sm:$0xff] (!%p1293_p7), %v1595_v0  ;;  %201 = vst [vmem:[#allocation2 + $0x18] sm:$0xff] (!%p1293_p7), %v1595_v0 }
  0x15   : > { %s1653_s28 = scalar_lea.vmem %s1845_s0, %s1288_s24  ;;  %s1658_s3 = scalar_lea.vmem %s1847_s2, %s1292_s25  ;;  %202 = vst [vmem:[#allocation2 + $0x20] sm:$0xff] (!%p1293_p7), %v1595_v0  ;;  %203 = vst [vmem:[#allocation2 + $0x28] sm:$0xff] (!%p1293_p7), %v1595_v0 }
  0x16   : > { %204 = vst [vmem:[#allocation2 + $0x30] sm:$0xff] (!%p1293_p7), %v1595_v0  ;;  %205 = vst [vmem:[#allocation2 + $0x38] sm:$0xff] (!%p1293_p7), %v1595_v0 }
  0x17   : > { %206 = vst [vmem:[#allocation2 + $0x40] sm:$0xff] (!%p1293_p7), %v1595_v0  ;;  %207 = vst [vmem:[#allocation2 + $0x48] sm:$0xff] (!%p1293_p7), %v1595_v0 }
  0x18   : > { %208 = vst [vmem:[#allocation2 + $0x50] sm:$0xff] %v1595_v0  ;;  %209 = vst [vmem:[#allocation2 + $0x58] sm:$0xff] %v1595_v0 }
  0x19   : > { %210 = vst [vmem:[#allocation2 + $0x60] sm:$0xff] %v1595_v0  ;;  %211 = vst [vmem:[#allocation2 + $0x68] sm:$0xff] %v1595_v0 }
  0x1a   : > { %212 = vst [vmem:[#allocation2 + $0x70] sm:$0xff] %v1595_v0  ;;  %213 = vst [vmem:[#allocation2 + $0x78] sm:$0xff] %v1595_v0 }
  0x1b   : > { %214 = vst [vmem:[#allocation2 + $0x80] sm:$0xff] %v1595_v0  ;;  %215 = vst [vmem:[#allocation2 + $0x88] sm:$0xff] %v1595_v0 }
  0x1c   : > { %216 = vst [vmem:[#allocation2 + $0x90] sm:$0xff] %v1595_v0  ;;  %217 = vst [vmem:[#allocation2 + $0x98] sm:$0xff] %v1595_v0 }
  0x1d   : > { %218 = vst [vmem:[#allocation2 + $0xa0] sm:$0xff] %v1595_v0  ;;  %219 = vst [vmem:[#allocation2 + $0xa8] sm:$0xff] %v1595_v0 }
  0x1e   : > { %220 = vst [vmem:[#allocation2 + $0xb0] sm:$0xff] %v1595_v0  ;;  %221 = vst [vmem:[#allocation2 + $0xb8] sm:$0xff] %v1595_v0 }
  0x1f   : > { %222 = vst [vmem:[#allocation2 + $0xc0] sm:$0xff] %v1595_v0  ;;  %223 = vst [vmem:[#allocation2 + $0xc8] sm:$0xff] %v1595_v0 }
  0x20   : > { %224 = vst [vmem:[#allocation2 + $0xd0] sm:$0xff] %v1595_v0  ;;  %225 = vst [vmem:[#allocation2 + $0xd8] sm:$0xff] %v1595_v0 }
  0x21   : > { %226 = vst [vmem:[#allocation2 + $0xe0] sm:$0xff] %v1595_v0  ;;  %227 = vst [vmem:[#allocation2 + $0xe8] sm:$0xff] %v1595_v0 }
  0x22   : > { %228 = vst [vmem:[#allocation2 + $0xf0] sm:$0xff] %v1595_v0  ;;  %229 = vst [vmem:[#allocation2 + $0xf8] sm:$0xff] %v1595_v0 }
  0x23   : > { %230 = vst [vmem:[#allocation2 + $0x100] sm:$0xff] %v1595_v0  ;;  %231 = vst [vmem:[#allocation2 + $0x108] sm:$0xff] %v1595_v0 }
  0x24   : > { %232 = vst [vmem:[#allocation2 + $0x110] sm:$0xff] %v1595_v0  ;;  %233 = vst [vmem:[#allocation2 + $0x118] sm:$0xff] %v1595_v0 }
  0x25   : > { %234 = vst [vmem:[#allocation2 + $0x120] sm:$0xff] %v1595_v0  ;;  %235 = vst [vmem:[#allocation2 + $0x128] sm:$0xff] %v1595_v0 }
  0x26   : > { %236 = vst [vmem:[#allocation2 + $0x130] sm:$0xff] %v1595_v0  ;;  %237 = vst [vmem:[#allocation2 + $0x138] sm:$0xff] %v1595_v0 }
  0x27   : > { %238 = vst [vmem:[#allocation2 + $0x140] sm:$0xff] %v1595_v0  ;;  %239 = vst [vmem:[#allocation2 + $0x148] sm:$0xff] %v1595_v0 }
  0x28   : > { %240 = vst [vmem:[#allocation2 + $0x150] sm:$0xff] %v1595_v0  ;;  %241 = vst [vmem:[#allocation2 + $0x158] sm:$0xff] %v1595_v0 }
  0x29   : > { %242 = vst [vmem:[#allocation2 + $0x160] sm:$0xff] %v1595_v0  ;;  %243 = vst [vmem:[#allocation2 + $0x168] sm:$0xff] %v1595_v0 }
  0x2a   : > { %244 = vst [vmem:[#allocation2 + $0x170] sm:$0xff] %v1595_v0  ;;  %245 = vst [vmem:[#allocation2 + $0x178] sm:$0xff] %v1595_v0 }
  0x2b   : > { %246 = vst [vmem:[#allocation2 + $0x180] sm:$0xff] %v1595_v0  ;;  %247 = vst [vmem:[#allocation2 + $0x188] sm:$0xff] %v1595_v0 }
  0x2c   : > { %248 = vst [vmem:[#allocation2 + $0x190] sm:$0xff] %v1595_v0  ;;  %249 = vst [vmem:[#allocation2 + $0x198] sm:$0xff] %v1595_v0 }
  0x2d   : > { %250 = vst [vmem:[#allocation2 + $0x1a0] sm:$0xff] %v1595_v0  ;;  %251 = vst [vmem:[#allocation2 + $0x1a8] sm:$0xff] %v1595_v0 }
  0x2e   : > { %252 = vst [vmem:[#allocation2 + $0x1b0] sm:$0xff] %v1595_v0  ;;  %253 = vst [vmem:[#allocation2 + $0x1b8] sm:$0xff] %v1595_v0 }
  0x2f   : > { %254 = vst [vmem:[#allocation2 + $0x1c0] sm:$0xff] %v1595_v0  ;;  %255 = vst [vmem:[#allocation2 + $0x1c8] sm:$0xff] %v1595_v0 }
  0x30   : > { %256 = vst [vmem:[#allocation2 + $0x1d0] sm:$0xff] %v1595_v0  ;;  %257 = vst [vmem:[#allocation2 + $0x1d8] sm:$0xff] %v1595_v0 }
  0x31   : > { %258 = vst [vmem:[#allocation2 + $0x1e0] sm:$0xff] %v1595_v0  ;;  %259 = vst [vmem:[#allocation2 + $0x1e8] sm:$0xff] %v1595_v0 }
  0x32   : > { %260 = vst [vmem:[#allocation2 + $0x1f0] sm:$0xff] %v1595_v0  ;;  %261 = vst [vmem:[#allocation2 + $0x1f8] sm:$0xff] %v1595_v0 }
  0x33 PF: > { %v1515_v1 = vld [vmem:[%s1648_s23] sm:$0xff]   ;;  %v1516_v2 = vld [vmem:[%s1648_s23 + $0x8] sm:$0xff]   ;;  %v1517_v3 = vld [vmem:[%s1648_s23 + $0x10] sm:$0xff]   ;;  %p1334_p8 = scmp.ne.s32.totalorder %s1577_s9, 8 }
  0x34   : > { %1378 = vmatprep.subr.bf16.mxu0 %v1515_v1  ;;  %1458 = vmatprep.subr.bf16.mxu1 %v1515_v1  ;;  %v1518_v4 = vld [vmem:[%s1648_s23 + $0x18] sm:$0xff]   ;;  %v1523_v5 = vld [vmem:[%s1653_s28] sm:$0xff]   ;;  %v1520_v8 = vld [vmem:[%s1648_s23 + $0x28] sm:$0xff]  }
  0x35   : > { %1379 = vmatpush3.bf16.msra.mxu0 %v1515_v1  ;;  %1466 = vmatpush3.bf16.msra.mxu1 %v1515_v1  ;;  %v1524_v6 = vld [vmem:[%s1653_s28 + $0x80] sm:$0xff]   ;;  %v1521_v9 = vld [vmem:[%s1648_s23 + $0x30] sm:$0xff]   ;;  %v1522_v10 = vld [vmem:[%s1648_s23 + $0x38] sm:$0xff]  }
  0x36   : > { %1380 = vmatprep.subr.bf16.mxu0 %v1516_v2  ;;  %1459 = vmatprep.subr.bf16.mxu1 %v1516_v2  ;;  %v1519_v7 = vld [vmem:[%s1648_s23 + $0x20] sm:$0xff]   ;;  %v1525_v11 = vld [vmem:[%s1653_s28 + $0x8] sm:$0xff]   ;;  %v1527_v13 = vld [vmem:[%s1653_s28 + $0x10] sm:$0xff]  }
  0x37   : > { %1394 = vmatprep.mubr.bf16.mxu0 %v1523_v5  ;;  %1426 = vmatprep.mubr.bf16.mxu1 %v1524_v6  ;;  %v1526_v12 = vld [vmem:[%s1653_s28 + $0x88] sm:$0xff]   ;;  %v1528_v14 = vld [vmem:[%s1653_s28 + $0x90] sm:$0xff]   ;;  %v1529_v15 = vld [vmem:[%s1653_s28 + $0x18] sm:$0xff]  }
  0x38   : > { %v1530_v16 = vld [vmem:[%s1653_s28 + $0x98] sm:$0xff]   ;;  %v1531_v17 = vld [vmem:[%s1653_s28 + $0x20] sm:$0xff]   ;;  %v1533_v19 = vld [vmem:[%s1653_s28 + $0x28] sm:$0xff]  }
  0x39   : > { %1381 = vmatpush3.bf16.msra.mxu0 %v1516_v2  ;;  %1467 = vmatpush3.bf16.msra.mxu1 %v1516_v2  ;;  %v1532_v18 = vld [vmem:[%s1653_s28 + $0xa0] sm:$0xff]   ;;  %v1534_v20 = vld [vmem:[%s1653_s28 + $0xa8] sm:$0xff]   ;;  %v1535_v21 = vld [vmem:[%s1653_s28 + $0x30] sm:$0xff]  }
  0x3a   : > { %1382 = vmatprep.subr.bf16.mxu0 %v1517_v3  ;;  %1460 = vmatprep.subr.bf16.mxu1 %v1517_v3  ;;  %v1536_v22 = vld [vmem:[%s1653_s28 + $0xb0] sm:$0xff]   ;;  %v1537_v23 = vld [vmem:[%s1653_s28 + $0x38] sm:$0xff]   ;;  %v1539_v25 = vld [vmem:[%s1653_s28 + $0x40] sm:$0xff]  }
  0x3b   : > { %v1538_v24 = vld [vmem:[%s1653_s28 + $0xb8] sm:$0xff]   ;;  %v1540_v26 = vld [vmem:[%s1653_s28 + $0xc0] sm:$0xff]   ;;  %v1541_v27 = vld [vmem:[%s1653_s28 + $0x48] sm:$0xff]  }
  0x3c   : > { %v1542_v28 = vld [vmem:[%s1653_s28 + $0xc8] sm:$0xff]   ;;  %v1543_v29 = vld [vmem:[%s1653_s28 + $0x50] sm:$0xff]   ;;  %v1545_v31 = vld [vmem:[%s1653_s28 + $0x58] sm:$0xff]  }
  0x3d   : > { %1383 = vmatpush3.bf16.msra.mxu0 %v1517_v3  ;;  %1468 = vmatpush3.bf16.msra.mxu1 %v1517_v3  ;;  %v1544_v30 = vld [vmem:[%s1653_s28 + $0xd0] sm:$0xff]   ;;  %v1546_v32 = vld [vmem:[%s1653_s28 + $0xd8] sm:$0xff]   ;;  %v1547_v33 = vld [vmem:[%s1653_s28 + $0x60] sm:$0xff]  }
  0x3e   : > { %1384 = vmatprep.subr.bf16.mxu0 %v1518_v4  ;;  %1461 = vmatprep.subr.bf16.mxu1 %v1518_v4  ;;  %v1548_v34 = vld [vmem:[%s1653_s28 + $0xe0] sm:$0xff]   ;;  %v1549_v35 = vld [vmem:[%s1653_s28 + $0x68] sm:$0xff]   ;;  %v1551_v37 = vld [vmem:[%s1653_s28 + $0x70] sm:$0xff]  }
  0x3f   : > { %v1550_v36 = vld [vmem:[%s1653_s28 + $0xe8] sm:$0xff]   ;;  %v1552_v38 = vld [vmem:[%s1653_s28 + $0xf0] sm:$0xff]   ;;  %v1553_v39 = vld [vmem:[%s1653_s28 + $0x78] sm:$0xff]  }
  0x40   : > { %v1554_v40 = vld [vmem:[%s1653_s28 + $0xf8] sm:$0xff]   ;;  %v264_v41 = vld [vmem:[#allocation2 + $0x10] sm:$0xff]  ;;  %v262_v43 = vld [vmem:[#allocation2] sm:$0xff] }
  0x41   : > { %1385 = vmatpush3.bf16.msra.mxu0 %v1518_v4  ;;  %1469 = vmatpush3.bf16.msra.mxu1 %v1518_v4  ;;  %v296_v42 = vld [vmem:[#allocation2 + $0x110] sm:$0xff]  ;;  %v294_v44 = vld [vmem:[#allocation2 + $0x100] sm:$0xff]  ;;  %v265_v47 = vld [vmem:[#allocation2 + $0x18] sm:$0xff] }
  0x42   : > { %1386 = vmatprep.subr.bf16.mxu0 %v1519_v7  ;;  %1462 = vmatprep.subr.bf16.mxu1 %v1519_v7  ;;  %v297_v48 = vld [vmem:[#allocation2 + $0x118] sm:$0xff]  ;;  %v263_v53 = vld [vmem:[#allocation2 + $0x8] sm:$0xff]  ;;  %v268_v1 = vld [vmem:[#allocation2 + $0x30] sm:$0xff] }
  0x43   : > { %v295_v54 = vld [vmem:[#allocation2 + $0x108] sm:$0xff]  ;;  %v300_v2 = vld [vmem:[#allocation2 + $0x130] sm:$0xff]  ;;  %v266_v3 = vld [vmem:[#allocation2 + $0x20] sm:$0xff] }
  0x44   : > { %v298_v4 = vld [vmem:[#allocation2 + $0x120] sm:$0xff] }
  0x45   : > { %1387 = vmatpush3.bf16.msra.mxu0 %v1519_v7  ;;  %1470 = vmatpush3.bf16.msra.mxu1 %v1519_v7  ;;  %v269_v7 = vld [vmem:[#allocation2 + $0x38] sm:$0xff] }
  0x46   : > { %1388 = vmatprep.subr.bf16.mxu0 %v1520_v8  ;;  %1463 = vmatprep.subr.bf16.mxu1 %v1520_v8 }
  0x49   : > { %1389 = vmatpush3.bf16.msra.mxu0 %v1520_v8  ;;  %1471 = vmatpush3.bf16.msra.mxu1 %v1520_v8  ;;  %v301_v8 = vld [vmem:[#allocation2 + $0x138] sm:$0xff] }
  0x4a   : > { %1390 = vmatprep.subr.bf16.mxu0 %v1521_v9  ;;  %1464 = vmatprep.subr.bf16.mxu1 %v1521_v9 }
  0x4d   : > { %1391 = vmatpush3.bf16.msra.mxu0 %v1521_v9  ;;  %1472 = vmatpush3.bf16.msra.mxu1 %v1521_v9 }
  0x4e   : > { %1392 = vmatprep.subr.bf16.mxu0 %v1522_v10  ;;  %1465 = vmatprep.subr.bf16.mxu1 %v1522_v10 }
  0x51   : > { %1393 = vmatpush3.bf16.msra.mxu0 %v1522_v10  ;;  %1473 = vmatpush3.bf16.msra.mxu1 %v1522_v10 }
  0x54   : > { %1395 = vmatmul.mubr.bf16.vlgmr.msra.gmra.mrb[0].mxu0 %v1525_v11  ;;  %1427 = vmatmul.mubr.bf16.vlgmr.msra.gmra.mrb[0].mxu1 %v1526_v12 }
  0x55   : > { %1398 = vmatprep.mubr.bf16.mxu0 %v1527_v13  ;;  %1430 = vmatprep.mubr.bf16.mxu1 %v1528_v14  ;;  %v267_v13 = vld [vmem:[#allocation2 + $0x28] sm:$0xff] }
  0x56   : > { %v299_v14 = vld [vmem:[#allocation2 + $0x128] sm:$0xff] }
  0x5c   : > { %1399 = vmatmul.mubr.bf16.gmra.mrb[4].mxu0 %v1529_v15  ;;  %1431 = vmatmul.mubr.bf16.gmra.mrb[4].mxu1 %v1530_v16 }
  0x5d   : > { %1402 = vmatprep.mubr.bf16.mxu0 %v1531_v17  ;;  %1434 = vmatprep.mubr.bf16.mxu1 %v1532_v18 }
  0x64   : > { %1403 = vmatmul.mubr.bf16.gmra.mrb[8].mxu0 %v1533_v19  ;;  %1435 = vmatmul.mubr.bf16.gmra.mrb[8].mxu1 %v1534_v20 }
  0x65   : > { %1406 = vmatprep.mubr.bf16.mxu0 %v1535_v21  ;;  %1438 = vmatprep.mubr.bf16.mxu1 %v1536_v22 }
  0x6c   : > { %1407 = vmatmul.mubr.bf16.gmra.mrb[12].mxu0 %v1537_v23  ;;  %1439 = vmatmul.mubr.bf16.gmra.mrb[12].mxu1 %v1538_v24 }
  0x6d   : > { %1410 = vmatprep.mubr.bf16.mxu0 %v1539_v25  ;;  %1442 = vmatprep.mubr.bf16.mxu1 %v1540_v26  ;;  %v272_v25 = vld [vmem:[#allocation2 + $0x50] sm:$0xff] }
  0x6e   : > { %v304_v26 = vld [vmem:[#allocation2 + $0x150] sm:$0xff] }
  0x74   : > { %1411 = vmatmul.mubr.bf16.gmra.mrb[16].mxu0 %v1541_v27  ;;  %1443 = vmatmul.mubr.bf16.gmra.mrb[16].mxu1 %v1542_v28  ;;  %v270_v27 = vld [vmem:[#allocation2 + $0x40] sm:$0xff] }
  0x75   : > { %1414 = vmatprep.mubr.bf16.mxu0 %v1543_v29  ;;  %1446 = vmatprep.mubr.bf16.mxu1 %v1544_v30  ;;  %v302_v28 = vld [vmem:[#allocation2 + $0x140] sm:$0xff] }
  0x7c   : > { %1415 = vmatmul.mubr.bf16.gmra.mrb[20].mxu0 %v1545_v31  ;;  %1447 = vmatmul.mubr.bf16.gmra.mrb[20].mxu1 %v1546_v32  ;;  %v273_v31 = vld [vmem:[#allocation2 + $0x58] sm:$0xff] }
  0x7d   : > { %1418 = vmatprep.mubr.bf16.mxu0 %v1547_v33  ;;  %1450 = vmatprep.mubr.bf16.mxu1 %v1548_v34  ;;  %v305_v32 = vld [vmem:[#allocation2 + $0x158] sm:$0xff] }
  0x84   : > { %1419 = vmatmul.mubr.bf16.gmra.mrb[24].mxu0 %v1549_v35  ;;  %1451 = vmatmul.mubr.bf16.gmra.mrb[24].mxu1 %v1550_v36 }
  0x85   : > { %1422 = vmatprep.mubr.bf16.mxu0 %v1551_v37  ;;  %1454 = vmatprep.mubr.bf16.mxu1 %v1552_v38  ;;  %v271_v37 = vld [vmem:[#allocation2 + $0x48] sm:$0xff] }
  0x86   : > { %v303_v38 = vld [vmem:[#allocation2 + $0x148] sm:$0xff] }
  0x8c   : > { %1423 = vmatmul.mubr.bf16.gmra.mrb[28].mxu0 %v1553_v39  ;;  %1455 = vmatmul.mubr.bf16.gmra.mrb[28].mxu1 %v1554_v40 }
 0x127   : > { %v1396_v45 = vpop.f32.mrb[0].mxu0  ;;  %v1428_v46 = vpop.f32.mrb[0].mxu1 }
 0x128   : > { %v937_v49 = vadd.f32 %v1396_v45, %v264_v41  ;;  %v969_v50 = vadd.f32 %v1428_v46, %v296_v42  ;;  %v680_v51 = vpop.f32.mrb[1].mxu0  ;;  %v808_v52 = vpop.f32.mrb[1].mxu1 }
 0x129   : > { %v935_v55 = vadd.f32 %v680_v51, %v262_v43  ;;  %v967_v56 = vadd.f32 %v808_v52, %v294_v44  ;;  %v1397_v57 = vpop.f32.mrb[2].mxu0  ;;  %v1429_v58 = vpop.f32.mrb[2].mxu1  ;;  %v274_v51 = vld [vmem:[#allocation2 + $0x60] sm:$0xff] }
 0x12a   : > { %1001 = vst [vmem:[#allocation2 + $0x10] sm:$0xff] %v937_v49  ;;  %1033 = vst [vmem:[#allocation2 + $0x110] sm:$0xff] %v969_v50  ;;  %v938_v59 = vadd.f32 %v1397_v57, %v265_v47  ;;  %v970_v60 = vadd.f32 %v1429_v58, %v297_v48  ;;  %v683_v61 = vpop.f32.mrb[3].mxu0  ;;  %v811_v62 = vpop.f32.mrb[3].mxu1  ;;  %v276_v49 = vld [vmem:[#allocation2 + $0x70] sm:$0xff]  ;;  %v306_v52 = vld [vmem:[#allocation2 + $0x160] sm:$0xff] }
 0x12b   : > { %999 = vst [vmem:[#allocation2] sm:$0xff] %v935_v55  ;;  %1031 = vst [vmem:[#allocation2 + $0x100] sm:$0xff] %v967_v56  ;;  %v936_v63 = vadd.f32 %v683_v61, %v263_v53  ;;  %v968_v0 = vadd.f32 %v811_v62, %v295_v54  ;;  %v308_v50 = vld [vmem:[#allocation2 + $0x170] sm:$0xff]  ;;  %v277_v55 = vld [vmem:[#allocation2 + $0x78] sm:$0xff] }
 0x12c   : > { %1002 = vst [vmem:[#allocation2 + $0x18] sm:$0xff] %v938_v59  ;;  %1034 = vst [vmem:[#allocation2 + $0x118] sm:$0xff] %v970_v60  ;;  %v309_v56 = vld [vmem:[#allocation2 + $0x178] sm:$0xff]  ;;  %v275_v61 = vld [vmem:[#allocation2 + $0x68] sm:$0xff] }
 0x12d   : > { %1000 = vst [vmem:[#allocation2 + $0x8] sm:$0xff] %v936_v63  ;;  %1032 = vst [vmem:[#allocation2 + $0x108] sm:$0xff] %v968_v0  ;;  %v307_v62 = vld [vmem:[#allocation2 + $0x168] sm:$0xff] }
 0x12f   : > { %v1400_v5 = vpop.f32.mrb[4].mxu0  ;;  %v1432_v6 = vpop.f32.mrb[4].mxu1 }
 0x130   : > { %v941_v9 = vadd.f32 %v1400_v5, %v268_v1  ;;  %v973_v10 = vadd.f32 %v1432_v6, %v300_v2  ;;  %v696_v11 = vpop.f32.mrb[5].mxu0  ;;  %v824_v12 = vpop.f32.mrb[5].mxu1 }
 0x131   : > { %v939_v15 = vadd.f32 %v696_v11, %v266_v3  ;;  %v971_v16 = vadd.f32 %v824_v12, %v298_v4  ;;  %v1401_v17 = vpop.f32.mrb[6].mxu0  ;;  %v1433_v18 = vpop.f32.mrb[6].mxu1  ;;  %v278_v11 = vld [vmem:[#allocation2 + $0x80] sm:$0xff] }
 0x132   : > { %1005 = vst [vmem:[#allocation2 + $0x30] sm:$0xff] %v941_v9  ;;  %1037 = vst [vmem:[#allocation2 + $0x130] sm:$0xff] %v973_v10  ;;  %v942_v19 = vadd.f32 %v1401_v17, %v269_v7  ;;  %v974_v20 = vadd.f32 %v1433_v18, %v301_v8  ;;  %v699_v21 = vpop.f32.mrb[7].mxu0  ;;  %v827_v22 = vpop.f32.mrb[7].mxu1  ;;  %v280_v9 = vld [vmem:[#allocation2 + $0x90] sm:$0xff]  ;;  %v310_v12 = vld [vmem:[#allocation2 + $0x180] sm:$0xff] }
 0x133   : > { %1003 = vst [vmem:[#allocation2 + $0x20] sm:$0xff] %v939_v15  ;;  %1035 = vst [vmem:[#allocation2 + $0x120] sm:$0xff] %v971_v16  ;;  %v940_v23 = vadd.f32 %v699_v21, %v267_v13  ;;  %v972_v24 = vadd.f32 %v827_v22, %v299_v14  ;;  %v312_v10 = vld [vmem:[#allocation2 + $0x190] sm:$0xff]  ;;  %v281_v15 = vld [vmem:[#allocation2 + $0x98] sm:$0xff] }
 0x134   : > { %1006 = vst [vmem:[#allocation2 + $0x38] sm:$0xff] %v942_v19  ;;  %1038 = vst [vmem:[#allocation2 + $0x138] sm:$0xff] %v974_v20  ;;  %v313_v16 = vld [vmem:[#allocation2 + $0x198] sm:$0xff]  ;;  %v279_v21 = vld [vmem:[#allocation2 + $0x88] sm:$0xff] }
 0x135   : > { %1004 = vst [vmem:[#allocation2 + $0x28] sm:$0xff] %v940_v23  ;;  %1036 = vst [vmem:[#allocation2 + $0x128] sm:$0xff] %v972_v24  ;;  %v311_v22 = vld [vmem:[#allocation2 + $0x188] sm:$0xff] }
 0x137   : > { %v1404_v29 = vpop.f32.mrb[8].mxu0  ;;  %v1436_v30 = vpop.f32.mrb[8].mxu1 }
 0x138   : > { %v945_v33 = vadd.f32 %v1404_v29, %v272_v25  ;;  %v977_v34 = vadd.f32 %v1436_v30, %v304_v26  ;;  %v712_v35 = vpop.f32.mrb[9].mxu0  ;;  %v840_v36 = vpop.f32.mrb[9].mxu1 }
 0x139   : > { %v943_v39 = vadd.f32 %v712_v35, %v270_v27  ;;  %v975_v40 = vadd.f32 %v840_v36, %v302_v28  ;;  %v1405_v41 = vpop.f32.mrb[10].mxu0  ;;  %v1437_v42 = vpop.f32.mrb[10].mxu1  ;;  %v282_v35 = vld [vmem:[#allocation2 + $0xa0] sm:$0xff] }
 0x13a   : > { %1009 = vst [vmem:[#allocation2 + $0x50] sm:$0xff] %v945_v33  ;;  %1041 = vst [vmem:[#allocation2 + $0x150] sm:$0xff] %v977_v34  ;;  %v946_v43 = vadd.f32 %v1405_v41, %v273_v31  ;;  %v978_v44 = vadd.f32 %v1437_v42, %v305_v32  ;;  %v715_v45 = vpop.f32.mrb[11].mxu0  ;;  %v843_v46 = vpop.f32.mrb[11].mxu1  ;;  %v284_v33 = vld [vmem:[#allocation2 + $0xb0] sm:$0xff]  ;;  %v314_v36 = vld [vmem:[#allocation2 + $0x1a0] sm:$0xff] }
 0x13b   : > { %1007 = vst [vmem:[#allocation2 + $0x40] sm:$0xff] %v943_v39  ;;  %1039 = vst [vmem:[#allocation2 + $0x140] sm:$0xff] %v975_v40  ;;  %v944_v47 = vadd.f32 %v715_v45, %v271_v37  ;;  %v976_v48 = vadd.f32 %v843_v46, %v303_v38  ;;  %v316_v34 = vld [vmem:[#allocation2 + $0x1b0] sm:$0xff]  ;;  %v285_v39 = vld [vmem:[#allocation2 + $0xb8] sm:$0xff] }
 0x13c   : > { %1010 = vst [vmem:[#allocation2 + $0x58] sm:$0xff] %v946_v43  ;;  %1042 = vst [vmem:[#allocation2 + $0x158] sm:$0xff] %v978_v44  ;;  %v317_v40 = vld [vmem:[#allocation2 + $0x1b8] sm:$0xff]  ;;  %v283_v45 = vld [vmem:[#allocation2 + $0xa8] sm:$0xff] }
 0x13d   : > { %1008 = vst [vmem:[#allocation2 + $0x48] sm:$0xff] %v944_v47  ;;  %1040 = vst [vmem:[#allocation2 + $0x148] sm:$0xff] %v976_v48  ;;  %v315_v46 = vld [vmem:[#allocation2 + $0x1a8] sm:$0xff] }
 0x13f   : > { %v1408_v53 = vpop.f32.mrb[12].mxu0  ;;  %v1440_v54 = vpop.f32.mrb[12].mxu1 }
 0x140   : > { %v949_v57 = vadd.f32 %v1408_v53, %v276_v49  ;;  %v981_v58 = vadd.f32 %v1440_v54, %v308_v50  ;;  %v728_v59 = vpop.f32.mrb[13].mxu0  ;;  %v856_v60 = vpop.f32.mrb[13].mxu1 }
 0x141   : > { %v947_v63 = vadd.f32 %v728_v59, %v274_v51  ;;  %v979_v0 = vadd.f32 %v856_v60, %v306_v52  ;;  %v1409_v1 = vpop.f32.mrb[14].mxu0  ;;  %v1441_v2 = vpop.f32.mrb[14].mxu1  ;;  %v286_v59 = vld [vmem:[#allocation2 + $0xc0] sm:$0xff] }
 0x142   : > { %1013 = vst [vmem:[#allocation2 + $0x70] sm:$0xff] %v949_v57  ;;  %1045 = vst [vmem:[#allocation2 + $0x170] sm:$0xff] %v981_v58  ;;  %v950_v3 = vadd.f32 %v1409_v1, %v277_v55  ;;  %v982_v4 = vadd.f32 %v1441_v2, %v309_v56  ;;  %v731_v5 = vpop.f32.mrb[15].mxu0  ;;  %v859_v6 = vpop.f32.mrb[15].mxu1  ;;  %v288_v57 = vld [vmem:[#allocation2 + $0xd0] sm:$0xff]  ;;  %v318_v60 = vld [vmem:[#allocation2 + $0x1c0] sm:$0xff] }
 0x143   : > { %1011 = vst [vmem:[#allocation2 + $0x60] sm:$0xff] %v947_v63  ;;  %1043 = vst [vmem:[#allocation2 + $0x160] sm:$0xff] %v979_v0  ;;  %v948_v7 = vadd.f32 %v731_v5, %v275_v61  ;;  %v980_v8 = vadd.f32 %v859_v6, %v307_v62  ;;  %v320_v58 = vld [vmem:[#allocation2 + $0x1d0] sm:$0xff]  ;;  %v289_v63 = vld [vmem:[#allocation2 + $0xd8] sm:$0xff] }
 0x144   : > { %1014 = vst [vmem:[#allocation2 + $0x78] sm:$0xff] %v950_v3  ;;  %1046 = vst [vmem:[#allocation2 + $0x178] sm:$0xff] %v982_v4  ;;  %v321_v0 = vld [vmem:[#allocation2 + $0x1d8] sm:$0xff]  ;;  %v287_v5 = vld [vmem:[#allocation2 + $0xc8] sm:$0xff] }
 0x145   : > { %1012 = vst [vmem:[#allocation2 + $0x68] sm:$0xff] %v948_v7  ;;  %1044 = vst [vmem:[#allocation2 + $0x168] sm:$0xff] %v980_v8  ;;  %v319_v6 = vld [vmem:[#allocation2 + $0x1c8] sm:$0xff] }
 0x147   : > { %v1412_v13 = vpop.f32.mrb[16].mxu0  ;;  %v1444_v14 = vpop.f32.mrb[16].mxu1 }
 0x148   : > { %v953_v17 = vadd.f32 %v1412_v13, %v280_v9  ;;  %v985_v18 = vadd.f32 %v1444_v14, %v312_v10  ;;  %v744_v19 = vpop.f32.mrb[17].mxu0  ;;  %v872_v20 = vpop.f32.mrb[17].mxu1 }
 0x149   : > { %v951_v23 = vadd.f32 %v744_v19, %v278_v11  ;;  %v983_v24 = vadd.f32 %v872_v20, %v310_v12  ;;  %v1413_v25 = vpop.f32.mrb[18].mxu0  ;;  %v1445_v26 = vpop.f32.mrb[18].mxu1  ;;  %v290_v19 = vld [vmem:[#allocation2 + $0xe0] sm:$0xff] }
 0x14a   : > { %1017 = vst [vmem:[#allocation2 + $0x90] sm:$0xff] %v953_v17  ;;  %1049 = vst [vmem:[#allocation2 + $0x190] sm:$0xff] %v985_v18  ;;  %v954_v27 = vadd.f32 %v1413_v25, %v281_v15  ;;  %v986_v28 = vadd.f32 %v1445_v26, %v313_v16  ;;  %v747_v29 = vpop.f32.mrb[19].mxu0  ;;  %v875_v30 = vpop.f32.mrb[19].mxu1  ;;  %v292_v17 = vld [vmem:[#allocation2 + $0xf0] sm:$0xff]  ;;  %v322_v20 = vld [vmem:[#allocation2 + $0x1e0] sm:$0xff] }
 0x14b   : > { %1015 = vst [vmem:[#allocation2 + $0x80] sm:$0xff] %v951_v23  ;;  %1047 = vst [vmem:[#allocation2 + $0x180] sm:$0xff] %v983_v24  ;;  %v952_v31 = vadd.f32 %v747_v29, %v279_v21  ;;  %v984_v32 = vadd.f32 %v875_v30, %v311_v22  ;;  %v324_v18 = vld [vmem:[#allocation2 + $0x1f0] sm:$0xff]  ;;  %v293_v23 = vld [vmem:[#allocation2 + $0xf8] sm:$0xff] }
 0x14c   : > { %1018 = vst [vmem:[#allocation2 + $0x98] sm:$0xff] %v954_v27  ;;  %1050 = vst [vmem:[#allocation2 + $0x198] sm:$0xff] %v986_v28  ;;  %v325_v24 = vld [vmem:[#allocation2 + $0x1f8] sm:$0xff]  ;;  %v291_v29 = vld [vmem:[#allocation2 + $0xe8] sm:$0xff] }
 0x14d   : > { %1016 = vst [vmem:[#allocation2 + $0x88] sm:$0xff] %v952_v31  ;;  %1048 = vst [vmem:[#allocation2 + $0x188] sm:$0xff] %v984_v32  ;;  %v323_v30 = vld [vmem:[#allocation2 + $0x1e8] sm:$0xff] }
 0x14f   : > { %v1416_v37 = vpop.f32.mrb[20].mxu0  ;;  %v1448_v38 = vpop.f32.mrb[20].mxu1 }
 0x150   : > { %v957_v41 = vadd.f32 %v1416_v37, %v284_v33  ;;  %v989_v42 = vadd.f32 %v1448_v38, %v316_v34  ;;  %v760_v43 = vpop.f32.mrb[21].mxu0  ;;  %v888_v44 = vpop.f32.mrb[21].mxu1 }
 0x151   : > { %v955_v47 = vadd.f32 %v760_v43, %v282_v35  ;;  %v987_v48 = vadd.f32 %v888_v44, %v314_v36  ;;  %v1417_v49 = vpop.f32.mrb[22].mxu0  ;;  %v1449_v50 = vpop.f32.mrb[22].mxu1  ;;  %v1069_v43 = vld [vmem:[#allocation2 + $0x10] sm:$0xff] (!%p1334_p8)  ;;  %v1070_v44 = vld [vmem:[#allocation2 + $0x18] sm:$0xff] (!%p1334_p8) }
 0x152   : > { %1021 = vst [vmem:[#allocation2 + $0xb0] sm:$0xff] %v957_v41  ;;  %1053 = vst [vmem:[#allocation2 + $0x1b0] sm:$0xff] %v989_v42  ;;  %v958_v51 = vadd.f32 %v1417_v49, %v285_v39  ;;  %v990_v52 = vadd.f32 %v1449_v50, %v317_v40  ;;  %v763_v53 = vpop.f32.mrb[23].mxu0  ;;  %v891_v54 = vpop.f32.mrb[23].mxu1  ;;  %v1067_v41 = vld [vmem:[#allocation2] sm:$0xff] (!%p1334_p8)  ;;  %v1068_v42 = vld [vmem:[#allocation2 + $0x8] sm:$0xff] (!%p1334_p8) }
 0x153   : > { %1019 = vst [vmem:[#allocation2 + $0xa0] sm:$0xff] %v955_v47  ;;  %1051 = vst [vmem:[#allocation2 + $0x1a0] sm:$0xff] %v987_v48  ;;  %v956_v55 = vadd.f32 %v763_v53, %v283_v45  ;;  %v988_v56 = vadd.f32 %v891_v54, %v315_v46  ;;  %v1071_v45 = vld [vmem:[#allocation2 + $0x20] sm:$0xff] (!%p1334_p8)  ;;  %v1072_v46 = vld [vmem:[#allocation2 + $0x28] sm:$0xff] (!%p1334_p8) }
 0x154   : > { %1022 = vst [vmem:[#allocation2 + $0xb8] sm:$0xff] %v958_v51  ;;  %1054 = vst [vmem:[#allocation2 + $0x1b8] sm:$0xff] %v990_v52  ;;  %v1073_v47 = vld [vmem:[#allocation2 + $0x30] sm:$0xff] (!%p1334_p8)  ;;  %v1074_v48 = vld [vmem:[#allocation2 + $0x38] sm:$0xff] (!%p1334_p8) }
 0x155   : > { %1020 = vst [vmem:[#allocation2 + $0xa8] sm:$0xff] %v956_v55  ;;  %1052 = vst [vmem:[#allocation2 + $0x1a8] sm:$0xff] %v988_v56  ;;  %v1075_v49 = vld [vmem:[#allocation2 + $0x40] sm:$0xff] (!%p1334_p8)  ;;  %v1076_v50 = vld [vmem:[#allocation2 + $0x48] sm:$0xff] (!%p1334_p8) }
 0x156   : > { %1131 = vst [vmem:[%s1658_s3] sm:$0xff] (!%p1334_p8), %v1067_v41  ;;  %1132 = vst [vmem:[%s1658_s3 + $0x8] sm:$0xff] (!%p1334_p8), %v1068_v42  ;;  %v1077_v51 = vld [vmem:[#allocation2 + $0x50] sm:$0xff] (!%p1334_p8)  ;;  %v1078_v52 = vld [vmem:[#allocation2 + $0x58] sm:$0xff] (!%p1334_p8) }
 0x157   : > { %v1420_v61 = vpop.f32.mrb[24].mxu0  ;;  %v1452_v62 = vpop.f32.mrb[24].mxu1  ;;  %1133 = vst [vmem:[%s1658_s3 + $0x10] sm:$0xff] (!%p1334_p8), %v1069_v43  ;;  %1134 = vst [vmem:[%s1658_s3 + $0x18] sm:$0xff] (!%p1334_p8), %v1070_v44  ;;  %v1079_v53 = vld [vmem:[#allocation2 + $0x60] sm:$0xff] (!%p1334_p8)  ;;  %v1080_v54 = vld [vmem:[#allocation2 + $0x68] sm:$0xff] (!%p1334_p8) }
 0x158   : > { %v961_v1 = vadd.f32 %v1420_v61, %v288_v57  ;;  %v993_v2 = vadd.f32 %v1452_v62, %v320_v58  ;;  %v776_v3 = vpop.f32.mrb[25].mxu0  ;;  %v904_v4 = vpop.f32.mrb[25].mxu1  ;;  %1135 = vst [vmem:[%s1658_s3 + $0x20] sm:$0xff] (!%p1334_p8), %v1071_v45  ;;  %1136 = vst [vmem:[%s1658_s3 + $0x28] sm:$0xff] (!%p1334_p8), %v1072_v46  ;;  %v1081_v55 = vld [vmem:[#allocation2 + $0x70] sm:$0xff] (!%p1334_p8)  ;;  %v1082_v56 = vld [vmem:[#allocation2 + $0x78] sm:$0xff] (!%p1334_p8) }
 0x159   : > { %v959_v7 = vadd.f32 %v776_v3, %v286_v59  ;;  %v991_v8 = vadd.f32 %v904_v4, %v318_v60  ;;  %v1421_v9 = vpop.f32.mrb[26].mxu0  ;;  %v1453_v10 = vpop.f32.mrb[26].mxu1  ;;  %1137 = vst [vmem:[%s1658_s3 + $0x30] sm:$0xff] (!%p1334_p8), %v1073_v47  ;;  %1138 = vst [vmem:[%s1658_s3 + $0x38] sm:$0xff] (!%p1334_p8), %v1074_v48  ;;  %v1083_v57 = vld [vmem:[#allocation2 + $0x80] sm:$0xff] (!%p1334_p8)  ;;  %v1084_v58 = vld [vmem:[#allocation2 + $0x88] sm:$0xff] (!%p1334_p8) }
 0x15a   : > { %1025 = vst [vmem:[#allocation2 + $0xd0] sm:$0xff] %v961_v1  ;;  %1057 = vst [vmem:[#allocation2 + $0x1d0] sm:$0xff] %v993_v2  ;;  %v962_v11 = vadd.f32 %v1421_v9, %v289_v63  ;;  %v994_v12 = vadd.f32 %v1453_v10, %v321_v0  ;;  %v779_v13 = vpop.f32.mrb[27].mxu0  ;;  %v907_v14 = vpop.f32.mrb[27].mxu1  ;;  %v1085_v59 = vld [vmem:[#allocation2 + $0x90] sm:$0xff] (!%p1334_p8)  ;;  %v1086_v60 = vld [vmem:[#allocation2 + $0x98] sm:$0xff] (!%p1334_p8) }
 0x15b   : > { %1023 = vst [vmem:[#allocation2 + $0xc0] sm:$0xff] %v959_v7  ;;  %1055 = vst [vmem:[#allocation2 + $0x1c0] sm:$0xff] %v991_v8  ;;  %v960_v15 = vadd.f32 %v779_v13, %v287_v5  ;;  %v992_v16 = vadd.f32 %v907_v14, %v319_v6  ;;  %v1087_v61 = vld [vmem:[#allocation2 + $0xa0] sm:$0xff] (!%p1334_p8)  ;;  %v1089_v63 = vld [vmem:[#allocation2 + $0xb0] sm:$0xff] (!%p1334_p8) }
 0x15c   : > { %1026 = vst [vmem:[#allocation2 + $0xd8] sm:$0xff] %v962_v11  ;;  %1058 = vst [vmem:[#allocation2 + $0x1d8] sm:$0xff] %v994_v12  ;;  %v1088_v62 = vld [vmem:[#allocation2 + $0xa8] sm:$0xff] (!%p1334_p8)  ;;  %v1090_v0 = vld [vmem:[#allocation2 + $0xb8] sm:$0xff] (!%p1334_p8) }
 0x15d   : > { %1024 = vst [vmem:[#allocation2 + $0xc8] sm:$0xff] %v960_v15  ;;  %1056 = vst [vmem:[#allocation2 + $0x1c8] sm:$0xff] %v992_v16  ;;  %v1099_v9 = vld [vmem:[#allocation2 + $0x100] sm:$0xff] (!%p1334_p8)  ;;  %v1100_v10 = vld [vmem:[#allocation2 + $0x108] sm:$0xff] (!%p1334_p8) }
 0x15e   : > { %1139 = vst [vmem:[%s1658_s3 + $0x40] sm:$0xff] (!%p1334_p8), %v1075_v49  ;;  %1140 = vst [vmem:[%s1658_s3 + $0x48] sm:$0xff] (!%p1334_p8), %v1076_v50  ;;  %v1101_v11 = vld [vmem:[#allocation2 + $0x110] sm:$0xff] (!%p1334_p8)  ;;  %v1102_v12 = vld [vmem:[#allocation2 + $0x118] sm:$0xff] (!%p1334_p8) }
 0x15f   : > { %v1424_v21 = vpop.f32.mrb[28].mxu0  ;;  %v1456_v22 = vpop.f32.mrb[28].mxu1  ;;  %1066 = sbr.rel (%p1334_p8) target bundleno = 382 (0x17e), region = 36  ;;  %1141 = vst [vmem:[%s1658_s3 + $0x50] sm:$0xff] (!%p1334_p8), %v1077_v51  ;;  %1142 = vst [vmem:[%s1658_s3 + $0x58] sm:$0xff] (!%p1334_p8), %v1078_v52  ;;  %v1103_v13 = vld [vmem:[#allocation2 + $0x120] sm:$0xff] (!%p1334_p8) }
 0x160   : > { %v965_v25 = vadd.f32 %v1424_v21, %v292_v17  ;;  %v997_v26 = vadd.f32 %v1456_v22, %v324_v18  ;;  %v792_v27 = vpop.f32.mrb[29].mxu0  ;;  %v920_v28 = vpop.f32.mrb[29].mxu1  ;;  %1143 = vst [vmem:[%s1658_s3 + $0x60] sm:$0xff] (!%p1334_p8), %v1079_v53  ;;  %1144 = vst [vmem:[%s1658_s3 + $0x68] sm:$0xff] (!%p1334_p8), %v1080_v54  ;;  %v1104_v14 = vld [vmem:[#allocation2 + $0x128] sm:$0xff] (!%p1334_p8)  ;;  %v1105_v15 = vld [vmem:[#allocation2 + $0x130] sm:$0xff] (!%p1334_p8) }
 0x161   : > { %v963_v31 = vadd.f32 %v792_v27, %v290_v19  ;;  %v995_v32 = vadd.f32 %v920_v28, %v322_v20  ;;  %v1425_v33 = vpop.f32.mrb[30].mxu0  ;;  %v1457_v34 = vpop.f32.mrb[30].mxu1  ;;  %1145 = vst [vmem:[%s1658_s3 + $0x70] sm:$0xff] (!%p1334_p8), %v1081_v55  ;;  %1146 = vst [vmem:[%s1658_s3 + $0x78] sm:$0xff] (!%p1334_p8), %v1082_v56  ;;  %v1093_v3 = vld [vmem:[#allocation2 + $0xd0] sm:$0xff] (!%p1334_p8)  ;;  %v1106_v16 = vld [vmem:[#allocation2 + $0x138] sm:$0xff] (!%p1334_p8) }
 0x162   : > { %1029 = vst [vmem:[#allocation2 + $0xf0] sm:$0xff] %v965_v25  ;;  %1061 = vst [vmem:[#allocation2 + $0x1f0] sm:$0xff] %v997_v26  ;;  %v966_v35 = vadd.f32 %v1425_v33, %v293_v23  ;;  %v998_v36 = vadd.f32 %v1457_v34, %v325_v24  ;;  %v795_v37 = vpop.f32.mrb[31].mxu0  ;;  %v923_v38 = vpop.f32.mrb[31].mxu1  ;;  %v1091_v1 = vld [vmem:[#allocation2 + $0xc0] sm:$0xff] (!%p1334_p8)  ;;  %v1108_v18 = vld [vmem:[#allocation2 + $0x148] sm:$0xff] (!%p1334_p8) }
 0x163   : > { %1027 = vst [vmem:[#allocation2 + $0xe0] sm:$0xff] %v963_v31  ;;  %1059 = vst [vmem:[#allocation2 + $0x1e0] sm:$0xff] %v995_v32  ;;  %v964_v39 = vadd.f32 %v795_v37, %v291_v29  ;;  %v996_v40 = vadd.f32 %v923_v38, %v323_v30  ;;  %v1094_v4 = vld [vmem:[#allocation2 + $0xd8] sm:$0xff] (!%p1334_p8)  ;;  %v1107_v17 = vld [vmem:[#allocation2 + $0x140] sm:$0xff] (!%p1334_p8) }
 0x164   : > { %1030 = vst [vmem:[#allocation2 + $0xf8] sm:$0xff] %v966_v35  ;;  %1062 = vst [vmem:[#allocation2 + $0x1f8] sm:$0xff] %v998_v36  ;;  %v1092_v2 = vld [vmem:[#allocation2 + $0xc8] sm:$0xff] (!%p1334_p8)  ;;  %v1109_v19 = vld [vmem:[#allocation2 + $0x150] sm:$0xff] (!%p1334_p8) }
 0x165   : > { %1028 = vst [vmem:[#allocation2 + $0xe8] sm:$0xff] %v964_v39  ;;  %1060 = vst [vmem:[#allocation2 + $0x1e8] sm:$0xff] %v996_v40  ;;  %v1110_v20 = vld [vmem:[#allocation2 + $0x158] sm:$0xff] (!%p1334_p8)  ;;  %v1111_v21 = vld [vmem:[#allocation2 + $0x160] sm:$0xff] (!%p1334_p8) }
 0x166   : > { %1147 = vst [vmem:[%s1658_s3 + $0x80] sm:$0xff] %v1083_v57  ;;  %1148 = vst [vmem:[%s1658_s3 + $0x88] sm:$0xff] %v1084_v58  ;;  %v1112_v22 = vld [vmem:[#allocation2 + $0x168] sm:$0xff]  ;;  %v1113_v23 = vld [vmem:[#allocation2 + $0x170] sm:$0xff] }
 0x167   : > { %1149 = vst [vmem:[%s1658_s3 + $0x90] sm:$0xff] %v1085_v59  ;;  %1150 = vst [vmem:[%s1658_s3 + $0x98] sm:$0xff] %v1086_v60  ;;  %v1114_v24 = vld [vmem:[#allocation2 + $0x178] sm:$0xff]  ;;  %v1115_v25 = vld [vmem:[#allocation2 + $0x180] sm:$0xff] }
 0x168   : > { %1151 = vst [vmem:[%s1658_s3 + $0xa0] sm:$0xff] %v1087_v61  ;;  %1152 = vst [vmem:[%s1658_s3 + $0xa8] sm:$0xff] %v1088_v62  ;;  %v1116_v26 = vld [vmem:[#allocation2 + $0x188] sm:$0xff]  ;;  %v1117_v27 = vld [vmem:[#allocation2 + $0x190] sm:$0xff] }
 0x169   : > { %1153 = vst [vmem:[%s1658_s3 + $0xb0] sm:$0xff] %v1089_v63  ;;  %1154 = vst [vmem:[%s1658_s3 + $0xb8] sm:$0xff] %v1090_v0  ;;  %v1097_v7 = vld [vmem:[#allocation2 + $0xf0] sm:$0xff]  ;;  %v1118_v28 = vld [vmem:[#allocation2 + $0x198] sm:$0xff] }
 0x16a   : > { %1155 = vst [vmem:[%s1658_s3 + $0xc0] sm:$0xff] %v1091_v1  ;;  %1156 = vst [vmem:[%s1658_s3 + $0xc8] sm:$0xff] %v1092_v2  ;;  %v1095_v5 = vld [vmem:[#allocation2 + $0xe0] sm:$0xff]  ;;  %v1120_v30 = vld [vmem:[#allocation2 + $0x1a8] sm:$0xff] }
 0x16b   : > { %1157 = vst [vmem:[%s1658_s3 + $0xd0] sm:$0xff] %v1093_v3  ;;  %1158 = vst [vmem:[%s1658_s3 + $0xd8] sm:$0xff] %v1094_v4  ;;  %v1098_v8 = vld [vmem:[#allocation2 + $0xf8] sm:$0xff]  ;;  %v1119_v29 = vld [vmem:[#allocation2 + $0x1a0] sm:$0xff] }
 0x16c   : > { %v1096_v6 = vld [vmem:[#allocation2 + $0xe8] sm:$0xff]  ;;  %1159 = vst [vmem:[%s1658_s3 + $0xe0] sm:$0xff] %v1095_v5  ;;  %1161 = vst [vmem:[%s1658_s3 + $0xf0] sm:$0xff] %v1097_v7  ;;  %v1121_v31 = vld [vmem:[#allocation2 + $0x1b0] sm:$0xff] }
 0x16d   : > { %1160 = vst [vmem:[%s1658_s3 + $0xe8] sm:$0xff] %v1096_v6  ;;  %1162 = vst [vmem:[%s1658_s3 + $0xf8] sm:$0xff] %v1098_v8  ;;  %v1122_v32 = vld [vmem:[#allocation2 + $0x1b8] sm:$0xff]  ;;  %v1123_v33 = vld [vmem:[#allocation2 + $0x1c0] sm:$0xff] }
 0x16e   : > { %1163 = vst [vmem:[%s1658_s3 + $0x100] sm:$0xff] %v1099_v9  ;;  %1164 = vst [vmem:[%s1658_s3 + $0x108] sm:$0xff] %v1100_v10  ;;  %v1124_v34 = vld [vmem:[#allocation2 + $0x1c8] sm:$0xff]  ;;  %v1125_v35 = vld [vmem:[#allocation2 + $0x1d0] sm:$0xff] }
 0x16f   : > { %1165 = vst [vmem:[%s1658_s3 + $0x110] sm:$0xff] %v1101_v11  ;;  %1166 = vst [vmem:[%s1658_s3 + $0x118] sm:$0xff] %v1102_v12  ;;  %v1126_v36 = vld [vmem:[#allocation2 + $0x1d8] sm:$0xff]  ;;  %v1127_v37 = vld [vmem:[#allocation2 + $0x1e0] sm:$0xff] }
 0x170   : > { %1167 = vst [vmem:[%s1658_s3 + $0x120] sm:$0xff] %v1103_v13  ;;  %1168 = vst [vmem:[%s1658_s3 + $0x128] sm:$0xff] %v1104_v14  ;;  %v1128_v38 = vld [vmem:[#allocation2 + $0x1e8] sm:$0xff]  ;;  %v1129_v39 = vld [vmem:[#allocation2 + $0x1f0] sm:$0xff] }
 0x171   : > { %1169 = vst [vmem:[%s1658_s3 + $0x130] sm:$0xff] %v1105_v15  ;;  %1170 = vst [vmem:[%s1658_s3 + $0x138] sm:$0xff] %v1106_v16  ;;  %v1130_v40 = vld [vmem:[#allocation2 + $0x1f8] sm:$0xff] }
 0x172   : > { %1171 = vst [vmem:[%s1658_s3 + $0x140] sm:$0xff] %v1107_v17  ;;  %1172 = vst [vmem:[%s1658_s3 + $0x148] sm:$0xff] %v1108_v18 }
 0x173   : > { %1173 = vst [vmem:[%s1658_s3 + $0x150] sm:$0xff] %v1109_v19  ;;  %1174 = vst [vmem:[%s1658_s3 + $0x158] sm:$0xff] %v1110_v20 }
 0x174   : > { %1175 = vst [vmem:[%s1658_s3 + $0x160] sm:$0xff] %v1111_v21  ;;  %1176 = vst [vmem:[%s1658_s3 + $0x168] sm:$0xff] %v1112_v22 }
 0x175   : > { %1177 = vst [vmem:[%s1658_s3 + $0x170] sm:$0xff] %v1113_v23  ;;  %1178 = vst [vmem:[%s1658_s3 + $0x178] sm:$0xff] %v1114_v24 }
 0x176   : > { %1179 = vst [vmem:[%s1658_s3 + $0x180] sm:$0xff] %v1115_v25  ;;  %1180 = vst [vmem:[%s1658_s3 + $0x188] sm:$0xff] %v1116_v26 }
 0x177   : > { %1181 = vst [vmem:[%s1658_s3 + $0x190] sm:$0xff] %v1117_v27  ;;  %1182 = vst [vmem:[%s1658_s3 + $0x198] sm:$0xff] %v1118_v28 }
 0x178   : > { %1183 = vst [vmem:[%s1658_s3 + $0x1a0] sm:$0xff] %v1119_v29  ;;  %1184 = vst [vmem:[%s1658_s3 + $0x1a8] sm:$0xff] %v1120_v30 }
 0x179   : > { %1185 = vst [vmem:[%s1658_s3 + $0x1b0] sm:$0xff] %v1121_v31  ;;  %1186 = vst [vmem:[%s1658_s3 + $0x1b8] sm:$0xff] %v1122_v32 }
 0x17a   : > { %1187 = vst [vmem:[%s1658_s3 + $0x1c0] sm:$0xff] %v1123_v33  ;;  %1188 = vst [vmem:[%s1658_s3 + $0x1c8] sm:$0xff] %v1124_v34 }
 0x17b   : > { %1189 = vst [vmem:[%s1658_s3 + $0x1d0] sm:$0xff] %v1125_v35  ;;  %1190 = vst [vmem:[%s1658_s3 + $0x1d8] sm:$0xff] %v1126_v36 }
 0x17c   : > { %1191 = vst [vmem:[%s1658_s3 + $0x1e0] sm:$0xff] %v1127_v37  ;;  %1192 = vst [vmem:[%s1658_s3 + $0x1e8] sm:$0xff] %v1128_v38 }
 0x17d   : > { %1193 = vst [vmem:[%s1658_s3 + $0x1f0] sm:$0xff] %v1129_v39  ;;  %1194 = vst [vmem:[%s1658_s3 + $0x1f8] sm:$0xff] %v1130_v40 }
 0x17e PF: > { %s12_s13 = sadd.s32 1, %s1593_s13   ;;  %s1848_s9 = smov %s1585_s11 }
 0x17f   : > { %p9_p9 = scmp.ge.s32.totalorder %s12_s13, 38   ;;  %s1849_s10 = smov %s1589_s12 }
 0x180   : > { %s1850_s11 = smov %s1853_s14  ;;  %s1851_s12 = smov %s1857_s15 }
 0x181   :  { %11 = sbr.rel (!%p9_p9) target bundleno = 3 (0x3), region = 69 }

// kernel: _lambda_.17
= control target key start
LH: loop header
LB: loop body
LE: loop exit
PB: predicated region body
PF: predicated region fallthrough
CT: control target
= control target key end

     0   :  { %s871_s18 = smov 0   ;;  %s1098_s0 = inlined_call_operand.vmem [shape: f32[512,128], index: 0, kind: input, shape index: {}]   ;;  %s1099_s1 = inlined_call_operand.vmem [shape: f32[1,128], index: 1, kind: input, shape index: {}]   ;;  %s1100_s2 = inlined_call_operand.vmem [shape: f32[1,128], index: 2, kind: input, shape index: {}]   ;;  %s1101_s3 = inlined_call_operand.vmem [shape: bf16[128,128], index: 3, kind: input, shape index: {}]   ;;  %s1102_s4 = inlined_call_operand.vmem [shape: f32[1,128], index: 4, kind: input, shape index: {}]   ;;  %s1103_s5 = inlined_call_operand.vmem [shape: f32[512,128], index: 5, kind: output, shape index: {}]  }
   0x1 LB: > { %s707_s19 = sadd.s32 4294967295, %s839_s18   ;;  %p711_p0 = scmp.ge.s32.totalorder %s839_s18, 1  ;;  %s839_s18 = sphi %s871_s18, %s15_s18  }
   0x2   : > { %p188_p1 = scmp.lt.s32.totalorder %s839_s18, 3 }
   0x4   : > { %p189_p2 = pnand %p711_p0, %p188_p1 }
   0x5   : > { %v825_v0 = vld [vmem:[%s1101_s3] sm:$0xff] (!%p189_p2)   ;;  %s712_s22 = sshll.u32 (!%p189_p2), %s707_s19, 5  ;;  %v826_v1 = vld [vmem:[%s1101_s3 + $0x8] sm:$0xff] (!%p189_p2)   ;;  %v827_v2 = vld [vmem:[%s1101_s3 + $0x10] sm:$0xff] (!%p189_p2)  }
   0x6   : > { %192 = sbr.rel (%p189_p2) target bundleno = 280 (0x118), region = 40  ;;  %p217_p3 = scmp.lt.s32.totalorder (!%p189_p2), %s712_s22, 63  ;;  %753 = vmatprep.subr.bf16.mxu0 (!%p189_p2), %v825_v0  ;;  %801 = vmatprep.subr.bf16.mxu1 (!%p189_p2), %v825_v0  ;;  %v828_v3 = vld [vmem:[%s1101_s3 + $0x18] sm:$0xff] (!%p189_p2)   ;;  %v906_v6 = vld [vmem:[%s1099_s1] ss:$0 sm:$0xff] (!%p189_p2)  ;;  %v830_v30 = vld [vmem:[%s1101_s3 + $0x28] sm:$0xff] (!%p189_p2)  }
   0x7   : > { %754 = vmatpush3.bf16.msra.mxu0 (!%p189_p2), %v825_v0  ;;  %809 = vmatpush3.bf16.msra.mxu1 (!%p189_p2), %v825_v0  ;;  %v913_v9 = vld [vmem:[%s1100_s2] ss:$0 sm:$0xff] (!%p189_p2)  ;;  %v831_v42 = vld [vmem:[%s1101_s3 + $0x30] sm:$0xff] (!%p189_p2)   ;;  %v832_v60 = vld [vmem:[%s1101_s3 + $0x38] sm:$0xff] (!%p189_p2)  }
   0x8   : > { %755 = vmatprep.subr.bf16.mxu0 (!%p189_p2), %v826_v1  ;;  %802 = vmatprep.subr.bf16.mxu1 (!%p189_p2), %v826_v1  ;;  %v829_v16 = vld [vmem:[%s1101_s3 + $0x20] sm:$0xff] (!%p189_p2)  }
   0xb   : > { %756 = vmatpush3.bf16.msra.mxu0 (!%p189_p2), %v826_v1  ;;  %810 = vmatpush3.bf16.msra.mxu1 (!%p189_p2), %v826_v1 }
   0xc   : > { %757 = vmatprep.subr.bf16.mxu0 (!%p189_p2), %v827_v2  ;;  %803 = vmatprep.subr.bf16.mxu1 (!%p189_p2), %v827_v2 }
   0xd   : > { %s1105_s22 = smov (!%p217_p3, %s712_s22), 63 }
   0xe   : > { %s713_s27 = sshll.u32 %s1105_s22, 3 }
   0xf   : > { %s896_s30 = scalar_lea.vmem %s1098_s0, %s713_s27  ;;  %758 = vmatpush3.bf16.msra.mxu0 %v827_v2  ;;  %811 = vmatpush3.bf16.msra.mxu1 %v827_v2  ;;  %s1029_s26 = scalar_lea.vmem %s1103_s5, %s713_s27 }
  0x10   : > { %v229_v4 = vld [vmem:[%s896_s30] sm:$0xff]  ;;  %v230_v5 = vld [vmem:[%s896_s30 + $0x8] sm:$0xff]  ;;  %759 = vmatprep.subr.bf16.mxu0 %v828_v3  ;;  %804 = vmatprep.subr.bf16.mxu1 %v828_v3  ;;  %v231_v21 = vld [vmem:[%s896_s30 + $0x10] sm:$0xff] }
  0x11   : > { %v268_v7 = vmul.f32 %v906_v6, %v229_v4  ;;  %v269_v8 = vmul.f32 %v906_v6, %v230_v5  ;;  %v245_v10 = vld [vmem:[%s896_s30 + $0x80] sm:$0xff]  ;;  %v246_v11 = vld [vmem:[%s896_s30 + $0x88] sm:$0xff]  ;;  %v232_v24 = vld [vmem:[%s896_s30 + $0x18] sm:$0xff]  ;;  %v270_v32 = vmul.f32 %v906_v6, %v231_v21 }
  0x12   : > { %v284_v12 = vmul.f32 %v906_v6, %v245_v10  ;;  %v285_v13 = vmul.f32 %v906_v6, %v246_v11  ;;  %v247_v25 = vld [vmem:[%s896_s30 + $0x90] sm:$0xff]  ;;  %v248_v26 = vld [vmem:[%s896_s30 + $0x98] sm:$0xff]  ;;  %v233_v28 = vld [vmem:[%s896_s30 + $0x20] sm:$0xff]  ;;  %v271_v35 = vmul.f32 %v906_v6, %v232_v24 }
  0x13   : > { %v307_v14 = vadd.f32 %v913_v9, %v268_v7  ;;  %v308_v15 = vadd.f32 %v913_v9, %v269_v8  ;;  %760 = vmatpush3.bf16.msra.mxu0 %v828_v3  ;;  %812 = vmatpush3.bf16.msra.mxu1 %v828_v3  ;;  %v234_v29 = vld [vmem:[%s896_s30 + $0x28] sm:$0xff]  ;;  %v249_v33 = vld [vmem:[%s896_s30 + $0xa0] sm:$0xff]  ;;  %v286_v36 = vmul.f32 %v906_v6, %v247_v25  ;;  %v235_v44 = vld [vmem:[%s896_s30 + $0x30] sm:$0xff] }
  0x14   : > { %v323_v17 = vadd.f32 %v913_v9, %v284_v12  ;;  %v324_v18 = vadd.f32 %v913_v9, %v285_v13  ;;  %761 = vmatprep.subr.bf16.mxu0 %v829_v16  ;;  %805 = vmatprep.subr.bf16.mxu1 %v829_v16  ;;  %v250_v34 = vld [vmem:[%s896_s30 + $0xa8] sm:$0xff]  ;;  %v287_v37 = vmul.f32 %v906_v6, %v248_v26  ;;  %v236_v48 = vld [vmem:[%s896_s30 + $0x38] sm:$0xff]  ;;  %v251_v49 = vld [vmem:[%s896_s30 + $0xb0] sm:$0xff] }
  0x15   : > { %v339_v19 = vmax.f32 %v307_v14, 0.0  ;;  %v340_v20 = vmax.f32 %v308_v15, 0.0  ;;  %v272_v38 = vmul.f32 %v906_v6, %v233_v28  ;;  %v273_v39 = vmul.f32 %v906_v6, %v234_v29  ;;  %v252_v50 = vld [vmem:[%s896_s30 + $0xb8] sm:$0xff]  ;;  %v237_v53 = vld [vmem:[%s896_s30 + $0x40] sm:$0xff]  ;;  %v238_v57 = vld [vmem:[%s896_s30 + $0x48] sm:$0xff] }
  0x16   : > { %v355_v22 = vmax.f32 %v323_v17, 0.0  ;;  %v356_v23 = vmax.f32 %v324_v18, 0.0  ;;  %v288_v40 = vmul.f32 %v906_v6, %v249_v33  ;;  %v289_v41 = vmul.f32 %v906_v6, %v250_v34  ;;  %v253_v58 = vld [vmem:[%s896_s30 + $0xc0] sm:$0xff]  ;;  %v254_v59 = vld [vmem:[%s896_s30 + $0xc8] sm:$0xff]  ;;  %v240_v25 = vld [vmem:[%s896_s30 + $0x58] sm:$0xff] }
  0x17   : > { %v371_v27 = vpack.c.bf16 %v340_v20, %v339_v19  ;;  %762 = vmatpush3.bf16.msra.mxu0 %v829_v16  ;;  %813 = vmatpush3.bf16.msra.mxu1 %v829_v16  ;;  %v309_v43 = vadd.f32 %v913_v9, %v270_v32  ;;  %v310_v45 = vadd.f32 %v913_v9, %v271_v35  ;;  %v239_v20 = vld [vmem:[%s896_s30 + $0x50] sm:$0xff] }
  0x18   : > { %v379_v31 = vpack.c.bf16 %v356_v23, %v355_v22  ;;  %763 = vmatprep.subr.bf16.mxu0 %v830_v30  ;;  %806 = vmatprep.subr.bf16.mxu1 %v830_v30  ;;  %v325_v46 = vadd.f32 %v913_v9, %v286_v36  ;;  %v326_v47 = vadd.f32 %v913_v9, %v287_v37  ;;  %v255_v26 = vld [vmem:[%s896_s30 + $0xd0] sm:$0xff]  ;;  %v242_v36 = vld [vmem:[%s896_s30 + $0x68] sm:$0xff]  ;;  %v257_v37 = vld [vmem:[%s896_s30 + $0xe0] sm:$0xff] }
  0x19   : > { %769 = vmatprep.mubr.bf16.mxu0 %v371_v27  ;;  %v311_v51 = vadd.f32 %v913_v9, %v272_v38  ;;  %v312_v52 = vadd.f32 %v913_v9, %v273_v39  ;;  %v327_v54 = vadd.f32 %v913_v9, %v288_v40  ;;  %v328_v55 = vadd.f32 %v913_v9, %v289_v41  ;;  %v256_v27 = vld [vmem:[%s896_s30 + $0xd8] sm:$0xff]  ;;  %v258_v38 = vld [vmem:[%s896_s30 + $0xe8] sm:$0xff] }
  0x1a   : > { %785 = vmatprep.mubr.bf16.mxu1 %v379_v31  ;;  %v274_v56 = vmul.f32 %v906_v6, %v235_v44  ;;  %v341_v61 = vmax.f32 %v309_v43, 0.0  ;;  %v275_v62 = vmul.f32 %v906_v6, %v236_v48  ;;  %v290_v63 = vmul.f32 %v906_v6, %v251_v49  ;;  %v241_v31 = vld [vmem:[%s896_s30 + $0x60] sm:$0xff] }
  0x1b   : > { %764 = vmatpush3.bf16.msra.mxu0 %v830_v30  ;;  %814 = vmatpush3.bf16.msra.mxu1 %v830_v30  ;;  %v291_v0 = vmul.f32 %v906_v6, %v252_v50  ;;  %v342_v1 = vmax.f32 %v310_v45, 0.0  ;;  %v357_v2 = vmax.f32 %v325_v46, 0.0  ;;  %v358_v3 = vmax.f32 %v326_v47, 0.0 }
  0x1c   : > { %765 = vmatprep.subr.bf16.mxu0 %v831_v42  ;;  %807 = vmatprep.subr.bf16.mxu1 %v831_v42  ;;  %v276_v4 = vmul.f32 %v906_v6, %v237_v53  ;;  %v343_v5 = vmax.f32 %v311_v51, 0.0  ;;  %v277_v7 = vmul.f32 %v906_v6, %v238_v57  ;;  %v292_v8 = vmul.f32 %v906_v6, %v253_v58  ;;  %v243_v58 = vld [vmem:[%s896_s30 + $0x70] sm:$0xff] }
  0x1d   : > { %v293_v10 = vmul.f32 %v906_v6, %v254_v59  ;;  %v344_v11 = vmax.f32 %v312_v52, 0.0  ;;  %v359_v12 = vmax.f32 %v327_v54, 0.0  ;;  %v360_v13 = vmax.f32 %v328_v55, 0.0 }
  0x1e   : > { %v313_v14 = vadd.f32 %v913_v9, %v274_v56  ;;  %v314_v15 = vadd.f32 %v913_v9, %v275_v62  ;;  %v329_v16 = vadd.f32 %v913_v9, %v290_v63  ;;  %v330_v17 = vadd.f32 %v913_v9, %v291_v0  ;;  %v244_v63 = vld [vmem:[%s896_s30 + $0x78] sm:$0xff]  ;;  %v259_v0 = vld [vmem:[%s896_s30 + $0xf0] sm:$0xff] }
  0x1f   : > { %766 = vmatpush3.bf16.msra.mxu0 %v831_v42  ;;  %815 = vmatpush3.bf16.msra.mxu1 %v831_v42  ;;  %v372_v18 = vpack.c.bf16 %v342_v1, %v341_v61  ;;  %v315_v19 = vadd.f32 %v913_v9, %v276_v4  ;;  %v380_v21 = vpack.c.bf16 %v358_v3, %v357_v2  ;;  %v260_v1 = vld [vmem:[%s896_s30 + $0xf8] sm:$0xff] }
  0x20   : > { %767 = vmatprep.subr.bf16.mxu0 %v832_v60  ;;  %808 = vmatprep.subr.bf16.mxu1 %v832_v60  ;;  %v316_v22 = vadd.f32 %v913_v9, %v277_v7  ;;  %v331_v23 = vadd.f32 %v913_v9, %v292_v8  ;;  %v332_v24 = vadd.f32 %v913_v9, %v293_v10  ;;  %v345_v30 = vmax.f32 %v313_v14, 0.0 }
  0x21   : > { %v373_v28 = vpack.c.bf16 %v344_v11, %v343_v5  ;;  %v381_v29 = vpack.c.bf16 %v360_v13, %v359_v12  ;;  %v346_v32 = vmax.f32 %v314_v15, 0.0  ;;  %v361_v33 = vmax.f32 %v329_v16, 0.0 }
  0x22   : > { %v362_v34 = vmax.f32 %v330_v17, 0.0  ;;  %v278_v35 = vmul.f32 %v906_v6, %v239_v20  ;;  %v347_v39 = vmax.f32 %v315_v19, 0.0  ;;  %v279_v40 = vmul.f32 %v906_v6, %v240_v25 }
  0x23   : > { %768 = vmatpush3.bf16.msra.mxu0 %v832_v60  ;;  %816 = vmatpush3.bf16.msra.mxu1 %v832_v60  ;;  %v294_v41 = vmul.f32 %v906_v6, %v255_v26  ;;  %v295_v42 = vmul.f32 %v906_v6, %v256_v27  ;;  %v348_v43 = vmax.f32 %v316_v22, 0.0  ;;  %v363_v44 = vmax.f32 %v331_v23, 0.0 }
  0x24   : > { %v364_v45 = vmax.f32 %v332_v24, 0.0  ;;  %v280_v46 = vmul.f32 %v906_v6, %v241_v31  ;;  %v281_v47 = vmul.f32 %v906_v6, %v242_v36  ;;  %v296_v48 = vmul.f32 %v906_v6, %v257_v37 }
  0x25   : > { %v297_v49 = vmul.f32 %v906_v6, %v258_v38  ;;  %v317_v50 = vadd.f32 %v913_v9, %v278_v35  ;;  %v318_v51 = vadd.f32 %v913_v9, %v279_v40  ;;  %v333_v52 = vadd.f32 %v913_v9, %v294_v41 }
  0x26   : > { %770 = vmatmul.mubr.bf16.vlgmr.msra.gmra.mrb[0].mxu0 %v372_v18  ;;  %786 = vmatmul.mubr.bf16.vlgmr.msra.gmra.mrb[0].mxu1 %v380_v21  ;;  %v334_v53 = vadd.f32 %v913_v9, %v295_v42  ;;  %v374_v54 = vpack.c.bf16 %v346_v32, %v345_v30  ;;  %v382_v55 = vpack.c.bf16 %v362_v34, %v361_v33 }
  0x27   : > { %773 = vmatprep.mubr.bf16.mxu0 %v373_v28  ;;  %789 = vmatprep.mubr.bf16.mxu1 %v381_v29  ;;  %v375_v56 = vpack.c.bf16 %v348_v43, %v347_v39  ;;  %v383_v57 = vpack.c.bf16 %v364_v45, %v363_v44  ;;  %v319_v59 = vadd.f32 %v913_v9, %v280_v46  ;;  %v349_v2 = vmax.f32 %v317_v50, 0.0  ;;  %v1022_v29 = vld [vmem:[%s1102_s4] ss:$0 sm:$0xff] }
  0x28   : > { %v320_v60 = vadd.f32 %v913_v9, %v281_v47  ;;  %v335_v61 = vadd.f32 %v913_v9, %v296_v48  ;;  %v336_v62 = vadd.f32 %v913_v9, %v297_v49  ;;  %v350_v3 = vmax.f32 %v318_v51, 0.0 }
  0x29   : > { %v365_v4 = vmax.f32 %v333_v52, 0.0  ;;  %v366_v5 = vmax.f32 %v334_v53, 0.0  ;;  %v282_v7 = vmul.f32 %v906_v6, %v243_v58  ;;  %v283_v8 = vmul.f32 %v906_v6, %v244_v63 }
  0x2a   : > { %v298_v10 = vmul.f32 %v906_v6, %v259_v0  ;;  %v299_v11 = vmul.f32 %v906_v6, %v260_v1  ;;  %v351_v12 = vmax.f32 %v319_v59, 0.0  ;;  %v352_v13 = vmax.f32 %v320_v60, 0.0 }
  0x2b   : > { %v367_v14 = vmax.f32 %v335_v61, 0.0  ;;  %v368_v15 = vmax.f32 %v336_v62, 0.0  ;;  %v376_v16 = vpack.c.bf16 %v350_v3, %v349_v2  ;;  %v384_v17 = vpack.c.bf16 %v366_v5, %v365_v4 }
  0x2c   : > { %v321_v18 = vadd.f32 %v913_v9, %v282_v7  ;;  %v322_v19 = vadd.f32 %v913_v9, %v283_v8  ;;  %v337_v20 = vadd.f32 %v913_v9, %v298_v10  ;;  %v338_v21 = vadd.f32 %v913_v9, %v299_v11 }
  0x2d   : > { %v377_v22 = vpack.c.bf16 %v352_v13, %v351_v12  ;;  %v385_v23 = vpack.c.bf16 %v368_v15, %v367_v14 }
  0x2e   : > { %774 = vmatmul.mubr.bf16.gmra.mrb[4].mxu0 %v374_v54  ;;  %790 = vmatmul.mubr.bf16.gmra.mrb[4].mxu1 %v382_v55  ;;  %v353_v6 = vmax.f32 %v321_v18, 0.0  ;;  %v354_v24 = vmax.f32 %v322_v19, 0.0  ;;  %v369_v25 = vmax.f32 %v337_v20, 0.0  ;;  %v370_v26 = vmax.f32 %v338_v21, 0.0 }
  0x2f   : > { %777 = vmatprep.mubr.bf16.mxu0 %v375_v56  ;;  %793 = vmatprep.mubr.bf16.mxu1 %v383_v57 }
  0x30   : > { %v378_v27 = vpack.c.bf16 %v354_v24, %v353_v6  ;;  %v386_v28 = vpack.c.bf16 %v370_v26, %v369_v25 }
  0x36   : > { %778 = vmatmul.mubr.bf16.gmra.mrb[8].mxu0 %v376_v16  ;;  %794 = vmatmul.mubr.bf16.gmra.mrb[8].mxu1 %v384_v17 }
  0x37   : > { %781 = vmatprep.mubr.bf16.mxu0 %v377_v22  ;;  %797 = vmatprep.mubr.bf16.mxu1 %v385_v23 }
  0x3e   : > { %782 = vmatmul.mubr.bf16.gmra.mrb[12].mxu0 %v378_v27  ;;  %798 = vmatmul.mubr.bf16.gmra.mrb[12].mxu1 %v386_v28 }
  0xf9   : > { %v771_v9 = vpop.f32.mrb[0].mxu0  ;;  %v787_v30 = vpop.f32.mrb[0].mxu1 }
  0xfa   : > { %v501_v31 = vadd.f32 %v771_v9, %v1022_v29  ;;  %v565_v32 = vadd.f32 %v787_v30, %v1022_v29  ;;  %v492_v33 = vpop.f32.mrb[1].mxu0  ;;  %v556_v34 = vpop.f32.mrb[1].mxu1 }
  0xfb   : > { %v493_v35 = vadd.f32 %v1022_v29, %v492_v33  ;;  %v557_v36 = vadd.f32 %v1022_v29, %v556_v34  ;;  %v772_v37 = vpop.f32.mrb[2].mxu0  ;;  %v788_v38 = vpop.f32.mrb[2].mxu1 }
  0xfc   : > { %621 = vst [vmem:[%s1029_s26 + $0x10] sm:$0xff] %v501_v31  ;;  %637 = vst [vmem:[%s1029_s26 + $0x90] sm:$0xff] %v565_v32  ;;  %v504_v39 = vadd.f32 %v772_v37, %v1022_v29  ;;  %v568_v40 = vadd.f32 %v788_v38, %v1022_v29  ;;  %v495_v41 = vpop.f32.mrb[3].mxu0  ;;  %v559_v42 = vpop.f32.mrb[3].mxu1 }
  0xfd   : > { %619 = vst [vmem:[%s1029_s26] sm:$0xff] %v493_v35  ;;  %635 = vst [vmem:[%s1029_s26 + $0x80] sm:$0xff] %v557_v36  ;;  %v496_v43 = vadd.f32 %v1022_v29, %v495_v41  ;;  %v560_v44 = vadd.f32 %v1022_v29, %v559_v42 }
  0xfe   : > { %622 = vst [vmem:[%s1029_s26 + $0x18] sm:$0xff] %v504_v39  ;;  %638 = vst [vmem:[%s1029_s26 + $0x98] sm:$0xff] %v568_v40 }
  0xff   : > { %620 = vst [vmem:[%s1029_s26 + $0x8] sm:$0xff] %v496_v43  ;;  %636 = vst [vmem:[%s1029_s26 + $0x88] sm:$0xff] %v560_v44 }
 0x101   : > { %v775_v45 = vpop.f32.mrb[4].mxu0  ;;  %v791_v46 = vpop.f32.mrb[4].mxu1 }
 0x102   : > { %v517_v47 = vadd.f32 %v775_v45, %v1022_v29  ;;  %v581_v48 = vadd.f32 %v791_v46, %v1022_v29  ;;  %v508_v49 = vpop.f32.mrb[5].mxu0  ;;  %v572_v50 = vpop.f32.mrb[5].mxu1 }
 0x103   : > { %v509_v51 = vadd.f32 %v1022_v29, %v508_v49  ;;  %v573_v52 = vadd.f32 %v1022_v29, %v572_v50  ;;  %v776_v53 = vpop.f32.mrb[6].mxu0  ;;  %v792_v54 = vpop.f32.mrb[6].mxu1 }
 0x104   : > { %625 = vst [vmem:[%s1029_s26 + $0x30] sm:$0xff] %v517_v47  ;;  %641 = vst [vmem:[%s1029_s26 + $0xb0] sm:$0xff] %v581_v48  ;;  %v520_v55 = vadd.f32 %v776_v53, %v1022_v29  ;;  %v584_v56 = vadd.f32 %v792_v54, %v1022_v29  ;;  %v511_v57 = vpop.f32.mrb[7].mxu0  ;;  %v575_v58 = vpop.f32.mrb[7].mxu1 }
 0x105   : > { %623 = vst [vmem:[%s1029_s26 + $0x20] sm:$0xff] %v509_v51  ;;  %639 = vst [vmem:[%s1029_s26 + $0xa0] sm:$0xff] %v573_v52  ;;  %v512_v59 = vadd.f32 %v1022_v29, %v511_v57  ;;  %v576_v60 = vadd.f32 %v1022_v29, %v575_v58 }
 0x106   : > { %626 = vst [vmem:[%s1029_s26 + $0x38] sm:$0xff] %v520_v55  ;;  %642 = vst [vmem:[%s1029_s26 + $0xb8] sm:$0xff] %v584_v56 }
 0x107   : > { %624 = vst [vmem:[%s1029_s26 + $0x28] sm:$0xff] %v512_v59  ;;  %640 = vst [vmem:[%s1029_s26 + $0xa8] sm:$0xff] %v576_v60 }
 0x109   : > { %v779_v61 = vpop.f32.mrb[8].mxu0  ;;  %v795_v62 = vpop.f32.mrb[8].mxu1 }
 0x10a   : > { %v533_v63 = vadd.f32 %v779_v61, %v1022_v29  ;;  %v597_v0 = vadd.f32 %v795_v62, %v1022_v29  ;;  %v524_v1 = vpop.f32.mrb[9].mxu0  ;;  %v588_v2 = vpop.f32.mrb[9].mxu1 }
 0x10b   : > { %v525_v3 = vadd.f32 %v1022_v29, %v524_v1  ;;  %v589_v4 = vadd.f32 %v1022_v29, %v588_v2  ;;  %v780_v5 = vpop.f32.mrb[10].mxu0  ;;  %v796_v7 = vpop.f32.mrb[10].mxu1 }
 0x10c   : > { %629 = vst [vmem:[%s1029_s26 + $0x50] sm:$0xff] %v533_v63  ;;  %645 = vst [vmem:[%s1029_s26 + $0xd0] sm:$0xff] %v597_v0  ;;  %v536_v8 = vadd.f32 %v780_v5, %v1022_v29  ;;  %v600_v10 = vadd.f32 %v796_v7, %v1022_v29  ;;  %v527_v11 = vpop.f32.mrb[11].mxu0  ;;  %v591_v12 = vpop.f32.mrb[11].mxu1 }
 0x10d   : > { %627 = vst [vmem:[%s1029_s26 + $0x40] sm:$0xff] %v525_v3  ;;  %643 = vst [vmem:[%s1029_s26 + $0xc0] sm:$0xff] %v589_v4  ;;  %v528_v13 = vadd.f32 %v1022_v29, %v527_v11  ;;  %v592_v14 = vadd.f32 %v1022_v29, %v591_v12 }
 0x10e   : > { %630 = vst [vmem:[%s1029_s26 + $0x58] sm:$0xff] %v536_v8  ;;  %646 = vst [vmem:[%s1029_s26 + $0xd8] sm:$0xff] %v600_v10 }
 0x10f   : > { %628 = vst [vmem:[%s1029_s26 + $0x48] sm:$0xff] %v528_v13  ;;  %644 = vst [vmem:[%s1029_s26 + $0xc8] sm:$0xff] %v592_v14 }
 0x111   : > { %v783_v15 = vpop.f32.mrb[12].mxu0  ;;  %v799_v16 = vpop.f32.mrb[12].mxu1 }
 0x112   : > { %v549_v17 = vadd.f32 %v783_v15, %v1022_v29  ;;  %v613_v18 = vadd.f32 %v799_v16, %v1022_v29  ;;  %v540_v19 = vpop.f32.mrb[13].mxu0  ;;  %v604_v20 = vpop.f32.mrb[13].mxu1 }
 0x113   : > { %v541_v21 = vadd.f32 %v1022_v29, %v540_v19  ;;  %v605_v22 = vadd.f32 %v1022_v29, %v604_v20  ;;  %v784_v23 = vpop.f32.mrb[14].mxu0  ;;  %v800_v6 = vpop.f32.mrb[14].mxu1 }
 0x114   : > { %633 = vst [vmem:[%s1029_s26 + $0x70] sm:$0xff] %v549_v17  ;;  %649 = vst [vmem:[%s1029_s26 + $0xf0] sm:$0xff] %v613_v18  ;;  %v552_v24 = vadd.f32 %v784_v23, %v1022_v29  ;;  %v616_v25 = vadd.f32 %v800_v6, %v1022_v29  ;;  %v543_v26 = vpop.f32.mrb[15].mxu0  ;;  %v607_v27 = vpop.f32.mrb[15].mxu1 }
 0x115   : > { %631 = vst [vmem:[%s1029_s26 + $0x60] sm:$0xff] %v541_v21  ;;  %647 = vst [vmem:[%s1029_s26 + $0xe0] sm:$0xff] %v605_v22  ;;  %v544_v28 = vadd.f32 %v1022_v29, %v543_v26  ;;  %v608_v9 = vadd.f32 %v1022_v29, %v607_v27 }
 0x116   : > { %634 = vst [vmem:[%s1029_s26 + $0x78] sm:$0xff] %v552_v24  ;;  %650 = vst [vmem:[%s1029_s26 + $0xf8] sm:$0xff] %v616_v25 }
 0x117   : > { %632 = vst [vmem:[%s1029_s26 + $0x68] sm:$0xff] %v544_v28  ;;  %648 = vst [vmem:[%s1029_s26 + $0xe8] sm:$0xff] %v608_v9 }
 0x118 PF: > { %s15_s18 = sadd.s32 1, %s839_s18  }
 0x119   : > { %p12_p4 = scmp.ge.s32.totalorder %s15_s18, 4  }
 0x11b   :  { %14 = sbr.rel (!%p12_p4) target bundleno = 1 (0x1), region = 70 }

// kernel: _lambda_.18
= control target key start
LH: loop header
LB: loop body
LE: loop exit
PB: predicated region body
PF: predicated region fallthrough
CT: control target
= control target key end

     0   :  { %s1083_s9 = smov 0   ;;  %s1085_s10 = smov 0   ;;  %s1205_s0 = inlined_call_operand.vmem [shape: bf16[9,512,128], index: 0, kind: input, shape index: {}]   ;;  %s1206_s1 = inlined_call_operand.vmem [shape: bf16[9,128,128], index: 1, kind: input, shape index: {}]   ;;  %s1207_s2 = inlined_call_operand.vmem [shape: f32[512,128], index: 2, kind: output, shape index: {}]  }
   0x1   :  { %s1087_s11 = smov 0   ;;  %s1089_s12 = smov 0  }
   0x2   :  { %s1091_s13 = smov 0  }
   0x3 LB: > { %s21_s14 = sadd.s32 1, %s1057_s11  ;;  %s24_s15 = sadd.s32 1, %s1061_s12  ;;  %s1065_s13 = sphi %s1091_s13, %s12_s13   ;;  %s1061_s12 = sphi %s1089_s12, %s1211_s12   ;;  %s1057_s11 = sphi %s1087_s11, %s1210_s11   ;;  %s1053_s10 = sphi %s1085_s10, %s1209_s10   ;;  %s1049_s9 = sphi %s1083_s9, %s1208_s9  }
   0x4   : > { %p22_p0 = scmp.ge.s32.totalorder %s21_s14, 9  ;;  %p837_p1 = scmp.ge.s32.totalorder %s1065_s13, 1 }
   0x5   : > { %p141_p2 = scmp.lt.s32.totalorder %s1065_s13, 19 }
   0x6   : > { %s1213_s14 = smov (%p22_p0, %s21_s14), 0  ;;  %s1215_s15 = smov (!%p22_p0, %s24_s15), %s1061_s12 }
   0x7   : > { %p142_p3 = pnand %p837_p1, %p141_p2  ;;  %p26_p4 = scmp.ge.s32.totalorder %s1215_s15, 2 }
   0x8   : > { %s838_s16 = sshll.u32 (!%p142_p3), %s1053_s10, 5  ;;  %p173_p5 = scmp.lt.s32.totalorder (!%p142_p3), %s1049_s9, 8 }
   0x9   : > { %s1217_s15 = smov (%p26_p4, %s1215_s15), 0  ;;  %145 = sbr.rel (%p142_p3) target bundleno = 319 (0x13f), region = 28 }
   0xa   : > { %p175_p6 = scmp.lt.s32.totalorder (!%p142_p3), %s838_s16, 63  ;;  %p845_p7 = scmp.ne.s32.totalorder (!%p142_p3), %s1049_s9, 0 }
  0x10   : > { %s174_s17 = scalar_select %p173_p5, %s1049_s9, 8 }
  0x11   : > { %s1219_s16 = smov (!%p175_p6, %s838_s16), 63  ;;  %197 = sbr.rel (%p845_p7) target bundleno = 35 (0x23), region = 32 }
  0x12   : > { %s839_s18 = sshll.u32 %s174_s17, 6  ;;  %s844_s24 = sshll.u32 %s1219_s16, 3  ;;  %v1067_v0 = vmov (!%p845_p7), 0.0  }
  0x13   : > { %s178_s19 = sadd.s32 %s839_s18, %s1219_s16  ;;  %s1120_s22 = scalar_lea.vmem %s1206_s1, %s839_s18  ;;  %198 = vst [vmem:[#allocation2] sm:$0xff] (!%p845_p7), %v1067_v0  ;;  %199 = vst [vmem:[#allocation2 + $0x8] sm:$0xff] (!%p845_p7), %v1067_v0 }
  0x14   : > { %s840_s23 = sshll.u32 %s178_s19, 2  ;;  %s1130_s30 = scalar_lea.vmem %s1207_s2, %s844_s24  ;;  %200 = vst [vmem:[#allocation2 + $0x10] sm:$0xff] (!%p845_p7), %v1067_v0  ;;  %201 = vst [vmem:[#allocation2 + $0x18] sm:$0xff] (!%p845_p7), %v1067_v0 }
  0x15   : > { %s1125_s27 = scalar_lea.vmem %s1205_s0, %s840_s23  ;;  %202 = vst [vmem:[#allocation2 + $0x20] sm:$0xff] (!%p845_p7), %v1067_v0  ;;  %203 = vst [vmem:[#allocation2 + $0x28] sm:$0xff] (!%p845_p7), %v1067_v0 }
  0x16   : > { %204 = vst [vmem:[#allocation2 + $0x30] sm:$0xff] (!%p845_p7), %v1067_v0  ;;  %205 = vst [vmem:[#allocation2 + $0x38] sm:$0xff] (!%p845_p7), %v1067_v0 }
  0x17   : > { %206 = vst [vmem:[#allocation2 + $0x40] sm:$0xff] (!%p845_p7), %v1067_v0  ;;  %207 = vst [vmem:[#allocation2 + $0x48] sm:$0xff] (!%p845_p7), %v1067_v0 }
  0x18   : > { %208 = vst [vmem:[#allocation2 + $0x50] sm:$0xff] %v1067_v0  ;;  %209 = vst [vmem:[#allocation2 + $0x58] sm:$0xff] %v1067_v0 }
  0x19   : > { %210 = vst [vmem:[#allocation2 + $0x60] sm:$0xff] %v1067_v0  ;;  %211 = vst [vmem:[#allocation2 + $0x68] sm:$0xff] %v1067_v0 }
  0x1a   : > { %212 = vst [vmem:[#allocation2 + $0x70] sm:$0xff] %v1067_v0  ;;  %213 = vst [vmem:[#allocation2 + $0x78] sm:$0xff] %v1067_v0 }
  0x1b   : > { %214 = vst [vmem:[#allocation2 + $0x80] sm:$0xff] %v1067_v0  ;;  %215 = vst [vmem:[#allocation2 + $0x88] sm:$0xff] %v1067_v0 }
  0x1c   : > { %216 = vst [vmem:[#allocation2 + $0x90] sm:$0xff] %v1067_v0  ;;  %217 = vst [vmem:[#allocation2 + $0x98] sm:$0xff] %v1067_v0 }
  0x1d   : > { %218 = vst [vmem:[#allocation2 + $0xa0] sm:$0xff] %v1067_v0  ;;  %219 = vst [vmem:[#allocation2 + $0xa8] sm:$0xff] %v1067_v0 }
  0x1e   : > { %220 = vst [vmem:[#allocation2 + $0xb0] sm:$0xff] %v1067_v0  ;;  %221 = vst [vmem:[#allocation2 + $0xb8] sm:$0xff] %v1067_v0 }
  0x1f   : > { %222 = vst [vmem:[#allocation2 + $0xc0] sm:$0xff] %v1067_v0  ;;  %223 = vst [vmem:[#allocation2 + $0xc8] sm:$0xff] %v1067_v0 }
  0x20   : > { %224 = vst [vmem:[#allocation2 + $0xd0] sm:$0xff] %v1067_v0  ;;  %225 = vst [vmem:[#allocation2 + $0xd8] sm:$0xff] %v1067_v0 }
  0x21   : > { %226 = vst [vmem:[#allocation2 + $0xe0] sm:$0xff] %v1067_v0  ;;  %227 = vst [vmem:[#allocation2 + $0xe8] sm:$0xff] %v1067_v0 }
  0x22   : > { %228 = vst [vmem:[#allocation2 + $0xf0] sm:$0xff] %v1067_v0  ;;  %229 = vst [vmem:[#allocation2 + $0xf8] sm:$0xff] %v1067_v0 }
  0x23 PF: > { %v1003_v1 = vld [vmem:[%s1120_s22] sm:$0xff]   ;;  %v1004_v2 = vld [vmem:[%s1120_s22 + $0x8] sm:$0xff]   ;;  %v1005_v3 = vld [vmem:[%s1120_s22 + $0x10] sm:$0xff]   ;;  %p870_p8 = scmp.ne.s32.totalorder %s1049_s9, 8 }
  0x24   : > { %898 = vmatprep.subr.bf16.mxu0 %v1003_v1  ;;  %946 = vmatprep.subr.bf16.mxu1 %v1003_v1  ;;  %v1006_v4 = vld [vmem:[%s1120_s22 + $0x18] sm:$0xff]   ;;  %v1011_v5 = vld [vmem:[%s1125_s27] sm:$0xff]   ;;  %v1008_v8 = vld [vmem:[%s1120_s22 + $0x28] sm:$0xff]  }
  0x25   : > { %899 = vmatpush3.bf16.msra.mxu0 %v1003_v1  ;;  %954 = vmatpush3.bf16.msra.mxu1 %v1003_v1  ;;  %v1012_v6 = vld [vmem:[%s1125_s27 + $0x40] sm:$0xff]   ;;  %v1009_v9 = vld [vmem:[%s1120_s22 + $0x30] sm:$0xff]   ;;  %v1010_v10 = vld [vmem:[%s1120_s22 + $0x38] sm:$0xff]  }
  0x26   : > { %900 = vmatprep.subr.bf16.mxu0 %v1004_v2  ;;  %947 = vmatprep.subr.bf16.mxu1 %v1004_v2  ;;  %v1007_v7 = vld [vmem:[%s1120_s22 + $0x20] sm:$0xff]   ;;  %v1013_v11 = vld [vmem:[%s1125_s27 + $0x8] sm:$0xff]   ;;  %v1015_v13 = vld [vmem:[%s1125_s27 + $0x10] sm:$0xff]  }
  0x27   : > { %914 = vmatprep.mubr.bf16.mxu0 %v1011_v5  ;;  %930 = vmatprep.mubr.bf16.mxu1 %v1012_v6  ;;  %v1014_v12 = vld [vmem:[%s1125_s27 + $0x48] sm:$0xff]   ;;  %v1016_v14 = vld [vmem:[%s1125_s27 + $0x50] sm:$0xff]   ;;  %v1017_v15 = vld [vmem:[%s1125_s27 + $0x18] sm:$0xff]  }
  0x28   : > { %v1018_v16 = vld [vmem:[%s1125_s27 + $0x58] sm:$0xff]   ;;  %v1019_v17 = vld [vmem:[%s1125_s27 + $0x20] sm:$0xff]   ;;  %v1021_v19 = vld [vmem:[%s1125_s27 + $0x28] sm:$0xff]  }
  0x29   : > { %901 = vmatpush3.bf16.msra.mxu0 %v1004_v2  ;;  %955 = vmatpush3.bf16.msra.mxu1 %v1004_v2  ;;  %v1020_v18 = vld [vmem:[%s1125_s27 + $0x60] sm:$0xff]   ;;  %v1022_v20 = vld [vmem:[%s1125_s27 + $0x68] sm:$0xff]   ;;  %v1023_v21 = vld [vmem:[%s1125_s27 + $0x30] sm:$0xff]  }
  0x2a   : > { %902 = vmatprep.subr.bf16.mxu0 %v1005_v3  ;;  %948 = vmatprep.subr.bf16.mxu1 %v1005_v3  ;;  %v1024_v22 = vld [vmem:[%s1125_s27 + $0x70] sm:$0xff]   ;;  %v1025_v23 = vld [vmem:[%s1125_s27 + $0x38] sm:$0xff]   ;;  %v230_v27 = vld [vmem:[#allocation2] sm:$0xff] }
  0x2b   : > { %v1026_v24 = vld [vmem:[%s1125_s27 + $0x78] sm:$0xff]   ;;  %v232_v25 = vld [vmem:[#allocation2 + $0x10] sm:$0xff]  ;;  %v246_v28 = vld [vmem:[#allocation2 + $0x80] sm:$0xff] }
  0x2c   : > { %v248_v26 = vld [vmem:[#allocation2 + $0x90] sm:$0xff]  ;;  %v233_v31 = vld [vmem:[#allocation2 + $0x18] sm:$0xff]  ;;  %v231_v37 = vld [vmem:[#allocation2 + $0x8] sm:$0xff] }
  0x2d   : > { %903 = vmatpush3.bf16.msra.mxu0 %v1005_v3  ;;  %956 = vmatpush3.bf16.msra.mxu1 %v1005_v3  ;;  %v249_v32 = vld [vmem:[#allocation2 + $0x98] sm:$0xff]  ;;  %v247_v38 = vld [vmem:[#allocation2 + $0x88] sm:$0xff]  ;;  %v236_v49 = vld [vmem:[#allocation2 + $0x30] sm:$0xff] }
  0x2e   : > { %904 = vmatprep.subr.bf16.mxu0 %v1006_v4  ;;  %949 = vmatprep.subr.bf16.mxu1 %v1006_v4  ;;  %v252_v50 = vld [vmem:[#allocation2 + $0xb0] sm:$0xff]  ;;  %v234_v51 = vld [vmem:[#allocation2 + $0x20] sm:$0xff]  ;;  %v237_v55 = vld [vmem:[#allocation2 + $0x38] sm:$0xff] }
  0x2f   : > { %v250_v52 = vld [vmem:[#allocation2 + $0xa0] sm:$0xff]  ;;  %v253_v56 = vld [vmem:[#allocation2 + $0xb8] sm:$0xff]  ;;  %v235_v61 = vld [vmem:[#allocation2 + $0x28] sm:$0xff] }
  0x30   : > { %v251_v62 = vld [vmem:[#allocation2 + $0xa8] sm:$0xff] }
  0x31   : > { %905 = vmatpush3.bf16.msra.mxu0 %v1006_v4  ;;  %957 = vmatpush3.bf16.msra.mxu1 %v1006_v4 }
  0x32   : > { %906 = vmatprep.subr.bf16.mxu0 %v1007_v7  ;;  %950 = vmatprep.subr.bf16.mxu1 %v1007_v7 }
  0x35   : > { %907 = vmatpush3.bf16.msra.mxu0 %v1007_v7  ;;  %958 = vmatpush3.bf16.msra.mxu1 %v1007_v7 }
  0x36   : > { %908 = vmatprep.subr.bf16.mxu0 %v1008_v8  ;;  %951 = vmatprep.subr.bf16.mxu1 %v1008_v8 }
  0x39   : > { %909 = vmatpush3.bf16.msra.mxu0 %v1008_v8  ;;  %959 = vmatpush3.bf16.msra.mxu1 %v1008_v8 }
  0x3a   : > { %910 = vmatprep.subr.bf16.mxu0 %v1009_v9  ;;  %952 = vmatprep.subr.bf16.mxu1 %v1009_v9 }
  0x3d   : > { %911 = vmatpush3.bf16.msra.mxu0 %v1009_v9  ;;  %960 = vmatpush3.bf16.msra.mxu1 %v1009_v9  ;;  %v240_v9 = vld [vmem:[#allocation2 + $0x50] sm:$0xff] }
  0x3e   : > { %912 = vmatprep.subr.bf16.mxu0 %v1010_v10  ;;  %953 = vmatprep.subr.bf16.mxu1 %v1010_v10 }
  0x41   : > { %913 = vmatpush3.bf16.msra.mxu0 %v1010_v10  ;;  %961 = vmatpush3.bf16.msra.mxu1 %v1010_v10  ;;  %v256_v10 = vld [vmem:[#allocation2 + $0xd0] sm:$0xff] }
  0x44   : > { %915 = vmatmul.mubr.bf16.vlgmr.msra.gmra.mrb[0].mxu0 %v1013_v11  ;;  %931 = vmatmul.mubr.bf16.vlgmr.msra.gmra.mrb[0].mxu1 %v1014_v12  ;;  %v238_v11 = vld [vmem:[#allocation2 + $0x40] sm:$0xff] }
  0x45   : > { %918 = vmatprep.mubr.bf16.mxu0 %v1015_v13  ;;  %934 = vmatprep.mubr.bf16.mxu1 %v1016_v14  ;;  %v254_v12 = vld [vmem:[#allocation2 + $0xc0] sm:$0xff] }
  0x4c   : > { %919 = vmatmul.mubr.bf16.gmra.mrb[4].mxu0 %v1017_v15  ;;  %935 = vmatmul.mubr.bf16.gmra.mrb[4].mxu1 %v1018_v16  ;;  %v241_v15 = vld [vmem:[#allocation2 + $0x58] sm:$0xff] }
  0x4d   : > { %922 = vmatprep.mubr.bf16.mxu0 %v1019_v17  ;;  %938 = vmatprep.mubr.bf16.mxu1 %v1020_v18  ;;  %v257_v16 = vld [vmem:[#allocation2 + $0xd8] sm:$0xff] }
  0x54   : > { %923 = vmatmul.mubr.bf16.gmra.mrb[8].mxu0 %v1021_v19  ;;  %939 = vmatmul.mubr.bf16.gmra.mrb[8].mxu1 %v1022_v20 }
  0x55   : > { %926 = vmatprep.mubr.bf16.mxu0 %v1023_v21  ;;  %942 = vmatprep.mubr.bf16.mxu1 %v1024_v22  ;;  %v239_v21 = vld [vmem:[#allocation2 + $0x48] sm:$0xff] }
  0x56   : > { %v255_v22 = vld [vmem:[#allocation2 + $0xc8] sm:$0xff] }
  0x5c   : > { %927 = vmatmul.mubr.bf16.gmra.mrb[12].mxu0 %v1025_v23  ;;  %943 = vmatmul.mubr.bf16.gmra.mrb[12].mxu1 %v1026_v24 }
 0x117   : > { %v916_v29 = vpop.f32.mrb[0].mxu0  ;;  %v932_v30 = vpop.f32.mrb[0].mxu1 }
 0x118   : > { %v617_v33 = vadd.f32 %v916_v29, %v232_v25  ;;  %v633_v34 = vadd.f32 %v932_v30, %v248_v26  ;;  %v488_v35 = vpop.f32.mrb[1].mxu0  ;;  %v552_v36 = vpop.f32.mrb[1].mxu1 }
 0x119   : > { %v615_v39 = vadd.f32 %v488_v35, %v230_v27  ;;  %v631_v40 = vadd.f32 %v552_v36, %v246_v28  ;;  %v917_v41 = vpop.f32.mrb[2].mxu0  ;;  %v933_v42 = vpop.f32.mrb[2].mxu1  ;;  %v242_v35 = vld [vmem:[#allocation2 + $0x60] sm:$0xff] }
 0x11a   : > { %649 = vst [vmem:[#allocation2 + $0x10] sm:$0xff] %v617_v33  ;;  %665 = vst [vmem:[#allocation2 + $0x90] sm:$0xff] %v633_v34  ;;  %v618_v43 = vadd.f32 %v917_v41, %v233_v31  ;;  %v634_v44 = vadd.f32 %v933_v42, %v249_v32  ;;  %v491_v45 = vpop.f32.mrb[3].mxu0  ;;  %v555_v46 = vpop.f32.mrb[3].mxu1  ;;  %v244_v33 = vld [vmem:[#allocation2 + $0x70] sm:$0xff]  ;;  %v258_v36 = vld [vmem:[#allocation2 + $0xe0] sm:$0xff] }
 0x11b   : > { %647 = vst [vmem:[#allocation2] sm:$0xff] %v615_v39  ;;  %663 = vst [vmem:[#allocation2 + $0x80] sm:$0xff] %v631_v40  ;;  %v616_v47 = vadd.f32 %v491_v45, %v231_v37  ;;  %v632_v48 = vadd.f32 %v555_v46, %v247_v38  ;;  %v260_v34 = vld [vmem:[#allocation2 + $0xf0] sm:$0xff]  ;;  %v245_v39 = vld [vmem:[#allocation2 + $0x78] sm:$0xff] }
 0x11c   : > { %650 = vst [vmem:[#allocation2 + $0x18] sm:$0xff] %v618_v43  ;;  %666 = vst [vmem:[#allocation2 + $0x98] sm:$0xff] %v634_v44  ;;  %v261_v40 = vld [vmem:[#allocation2 + $0xf8] sm:$0xff]  ;;  %v243_v45 = vld [vmem:[#allocation2 + $0x68] sm:$0xff] }
 0x11d   : > { %648 = vst [vmem:[#allocation2 + $0x8] sm:$0xff] %v616_v47  ;;  %664 = vst [vmem:[#allocation2 + $0x88] sm:$0xff] %v632_v48  ;;  %v259_v46 = vld [vmem:[#allocation2 + $0xe8] sm:$0xff] }
 0x11f   : > { %v920_v53 = vpop.f32.mrb[4].mxu0  ;;  %v936_v54 = vpop.f32.mrb[4].mxu1 }
 0x120   : > { %v621_v57 = vadd.f32 %v920_v53, %v236_v49  ;;  %v637_v58 = vadd.f32 %v936_v54, %v252_v50  ;;  %v504_v59 = vpop.f32.mrb[5].mxu0  ;;  %v568_v60 = vpop.f32.mrb[5].mxu1 }
 0x121   : > { %v619_v63 = vadd.f32 %v504_v59, %v234_v51  ;;  %v635_v0 = vadd.f32 %v568_v60, %v250_v52  ;;  %v921_v1 = vpop.f32.mrb[6].mxu0  ;;  %v937_v2 = vpop.f32.mrb[6].mxu1  ;;  %v685_v59 = vld [vmem:[#allocation2 + $0x10] sm:$0xff] (!%p870_p8) }
 0x122   : > { %653 = vst [vmem:[#allocation2 + $0x30] sm:$0xff] %v621_v57  ;;  %669 = vst [vmem:[#allocation2 + $0xb0] sm:$0xff] %v637_v58  ;;  %v622_v3 = vadd.f32 %v921_v1, %v237_v55  ;;  %v638_v4 = vadd.f32 %v937_v2, %v253_v56  ;;  %v507_v5 = vpop.f32.mrb[7].mxu0  ;;  %v571_v6 = vpop.f32.mrb[7].mxu1  ;;  %v683_v57 = vld [vmem:[#allocation2] sm:$0xff] (!%p870_p8) }
 0x123   : > { %651 = vst [vmem:[#allocation2 + $0x20] sm:$0xff] %v619_v63  ;;  %667 = vst [vmem:[#allocation2 + $0xa0] sm:$0xff] %v635_v0  ;;  %v620_v7 = vadd.f32 %v507_v5, %v235_v61  ;;  %v636_v8 = vadd.f32 %v571_v6, %v251_v62  ;;  %v686_v60 = vld [vmem:[#allocation2 + $0x18] sm:$0xff] (!%p870_p8) }
 0x124   : > { %654 = vst [vmem:[#allocation2 + $0x38] sm:$0xff] %v622_v3  ;;  %670 = vst [vmem:[#allocation2 + $0xb8] sm:$0xff] %v638_v4  ;;  %v684_v58 = vld [vmem:[#allocation2 + $0x8] sm:$0xff] (!%p870_p8) }
 0x125   : > { %652 = vst [vmem:[#allocation2 + $0x28] sm:$0xff] %v620_v7  ;;  %668 = vst [vmem:[#allocation2 + $0xa8] sm:$0xff] %v636_v8 }
 0x126   : > { %715 = vst [vmem:[%s1130_s30] sm:$0xff] (!%p870_p8), %v683_v57  ;;  %716 = vst [vmem:[%s1130_s30 + $0x8] sm:$0xff] (!%p870_p8), %v684_v58 }
 0x127   : > { %v924_v13 = vpop.f32.mrb[8].mxu0  ;;  %v940_v14 = vpop.f32.mrb[8].mxu1  ;;  %717 = vst [vmem:[%s1130_s30 + $0x10] sm:$0xff] (!%p870_p8), %v685_v59  ;;  %718 = vst [vmem:[%s1130_s30 + $0x18] sm:$0xff] (!%p870_p8), %v686_v60 }
 0x128   : > { %v625_v17 = vadd.f32 %v924_v13, %v240_v9  ;;  %v641_v18 = vadd.f32 %v940_v14, %v256_v10  ;;  %v520_v19 = vpop.f32.mrb[9].mxu0  ;;  %v584_v20 = vpop.f32.mrb[9].mxu1  ;;  %v699_v9 = vld [vmem:[#allocation2 + $0x80] sm:$0xff] (!%p870_p8)  ;;  %v700_v10 = vld [vmem:[#allocation2 + $0x88] sm:$0xff] (!%p870_p8) }
 0x129   : > { %v623_v23 = vadd.f32 %v520_v19, %v238_v11  ;;  %v639_v24 = vadd.f32 %v584_v20, %v254_v12  ;;  %v925_v25 = vpop.f32.mrb[10].mxu0  ;;  %v941_v26 = vpop.f32.mrb[10].mxu1  ;;  %v689_v63 = vld [vmem:[#allocation2 + $0x30] sm:$0xff] (!%p870_p8)  ;;  %731 = vst [vmem:[%s1130_s30 + $0x80] sm:$0xff] (!%p870_p8), %v699_v9  ;;  %732 = vst [vmem:[%s1130_s30 + $0x88] sm:$0xff] (!%p870_p8), %v700_v10  ;;  %v702_v12 = vld [vmem:[#allocation2 + $0x98] sm:$0xff] (!%p870_p8) }
 0x12a   : > { %657 = vst [vmem:[#allocation2 + $0x50] sm:$0xff] %v625_v17  ;;  %673 = vst [vmem:[#allocation2 + $0xd0] sm:$0xff] %v641_v18  ;;  %v626_v27 = vadd.f32 %v925_v25, %v241_v15  ;;  %v642_v28 = vadd.f32 %v941_v26, %v257_v16  ;;  %v523_v29 = vpop.f32.mrb[11].mxu0  ;;  %v587_v30 = vpop.f32.mrb[11].mxu1  ;;  %v687_v61 = vld [vmem:[#allocation2 + $0x20] sm:$0xff] (!%p870_p8)  ;;  %v701_v11 = vld [vmem:[#allocation2 + $0x90] sm:$0xff] (!%p870_p8) }
 0x12b   : > { %655 = vst [vmem:[#allocation2 + $0x40] sm:$0xff] %v623_v23  ;;  %671 = vst [vmem:[#allocation2 + $0xc0] sm:$0xff] %v639_v24  ;;  %v624_v31 = vadd.f32 %v523_v29, %v239_v21  ;;  %v640_v32 = vadd.f32 %v587_v30, %v255_v22  ;;  %v690_v0 = vld [vmem:[#allocation2 + $0x38] sm:$0xff] (!%p870_p8)  ;;  %v703_v13 = vld [vmem:[#allocation2 + $0xa0] sm:$0xff] (!%p870_p8) }
 0x12c   : > { %658 = vst [vmem:[#allocation2 + $0x58] sm:$0xff] %v626_v27  ;;  %674 = vst [vmem:[#allocation2 + $0xd8] sm:$0xff] %v642_v28  ;;  %v688_v62 = vld [vmem:[#allocation2 + $0x28] sm:$0xff] (!%p870_p8)  ;;  %v705_v15 = vld [vmem:[#allocation2 + $0xb0] sm:$0xff] (!%p870_p8) }
 0x12d   : > { %656 = vst [vmem:[#allocation2 + $0x48] sm:$0xff] %v624_v31  ;;  %672 = vst [vmem:[#allocation2 + $0xc8] sm:$0xff] %v640_v32  ;;  %v704_v14 = vld [vmem:[#allocation2 + $0xa8] sm:$0xff] (!%p870_p8)  ;;  %v706_v16 = vld [vmem:[#allocation2 + $0xb8] sm:$0xff] (!%p870_p8) }
 0x12e   : > { %719 = vst [vmem:[%s1130_s30 + $0x20] sm:$0xff] (!%p870_p8), %v687_v61  ;;  %720 = vst [vmem:[%s1130_s30 + $0x28] sm:$0xff] (!%p870_p8), %v688_v62 }
 0x12f   : > { %v928_v37 = vpop.f32.mrb[12].mxu0  ;;  %v944_v38 = vpop.f32.mrb[12].mxu1  ;;  %682 = sbr.rel (%p870_p8) target bundleno = 319 (0x13f), region = 36  ;;  %721 = vst [vmem:[%s1130_s30 + $0x30] sm:$0xff] (!%p870_p8), %v689_v63  ;;  %722 = vst [vmem:[%s1130_s30 + $0x38] sm:$0xff] (!%p870_p8), %v690_v0 }
 0x130   : > { %v629_v41 = vadd.f32 %v928_v37, %v244_v33  ;;  %v645_v42 = vadd.f32 %v944_v38, %v260_v34  ;;  %v536_v43 = vpop.f32.mrb[13].mxu0  ;;  %v600_v44 = vpop.f32.mrb[13].mxu1  ;;  %733 = vst [vmem:[%s1130_s30 + $0x90] sm:$0xff] (!%p870_p8), %v701_v11  ;;  %734 = vst [vmem:[%s1130_s30 + $0x98] sm:$0xff] (!%p870_p8), %v702_v12 }
 0x131   : > { %v627_v47 = vadd.f32 %v536_v43, %v242_v35  ;;  %v643_v48 = vadd.f32 %v600_v44, %v258_v36  ;;  %v929_v49 = vpop.f32.mrb[14].mxu0  ;;  %v945_v50 = vpop.f32.mrb[14].mxu1  ;;  %v693_v3 = vld [vmem:[#allocation2 + $0x50] sm:$0xff] (!%p870_p8)  ;;  %735 = vst [vmem:[%s1130_s30 + $0xa0] sm:$0xff] (!%p870_p8), %v703_v13  ;;  %736 = vst [vmem:[%s1130_s30 + $0xa8] sm:$0xff] (!%p870_p8), %v704_v14 }
 0x132   : > { %661 = vst [vmem:[#allocation2 + $0x70] sm:$0xff] %v629_v41  ;;  %677 = vst [vmem:[#allocation2 + $0xf0] sm:$0xff] %v645_v42  ;;  %v630_v51 = vadd.f32 %v929_v49, %v245_v39  ;;  %v646_v52 = vadd.f32 %v945_v50, %v261_v40  ;;  %v539_v53 = vpop.f32.mrb[15].mxu0  ;;  %v603_v54 = vpop.f32.mrb[15].mxu1  ;;  %v691_v1 = vld [vmem:[#allocation2 + $0x40] sm:$0xff] (!%p870_p8)  ;;  %v709_v19 = vld [vmem:[#allocation2 + $0xd0] sm:$0xff] (!%p870_p8) }
 0x133   : > { %659 = vst [vmem:[#allocation2 + $0x60] sm:$0xff] %v627_v47  ;;  %675 = vst [vmem:[#allocation2 + $0xe0] sm:$0xff] %v643_v48  ;;  %v628_v55 = vadd.f32 %v539_v53, %v243_v45  ;;  %v644_v56 = vadd.f32 %v603_v54, %v259_v46  ;;  %v694_v4 = vld [vmem:[#allocation2 + $0x58] sm:$0xff] (!%p870_p8)  ;;  %v707_v17 = vld [vmem:[#allocation2 + $0xc0] sm:$0xff] (!%p870_p8) }
 0x134   : > { %662 = vst [vmem:[#allocation2 + $0x78] sm:$0xff] %v630_v51  ;;  %678 = vst [vmem:[#allocation2 + $0xf8] sm:$0xff] %v646_v52  ;;  %v692_v2 = vld [vmem:[#allocation2 + $0x48] sm:$0xff] (!%p870_p8)  ;;  %v710_v20 = vld [vmem:[#allocation2 + $0xd8] sm:$0xff] (!%p870_p8) }
 0x135   : > { %660 = vst [vmem:[#allocation2 + $0x68] sm:$0xff] %v628_v55  ;;  %676 = vst [vmem:[#allocation2 + $0xe8] sm:$0xff] %v644_v56  ;;  %v708_v18 = vld [vmem:[#allocation2 + $0xc8] sm:$0xff] (!%p870_p8) }
 0x136   : > { %723 = vst [vmem:[%s1130_s30 + $0x40] sm:$0xff] %v691_v1  ;;  %724 = vst [vmem:[%s1130_s30 + $0x48] sm:$0xff] %v692_v2 }
 0x137   : > { %725 = vst [vmem:[%s1130_s30 + $0x50] sm:$0xff] %v693_v3  ;;  %726 = vst [vmem:[%s1130_s30 + $0x58] sm:$0xff] %v694_v4 }
 0x138   : > { %737 = vst [vmem:[%s1130_s30 + $0xb0] sm:$0xff] %v705_v15  ;;  %738 = vst [vmem:[%s1130_s30 + $0xb8] sm:$0xff] %v706_v16 }
 0x139   : > { %v697_v7 = vld [vmem:[#allocation2 + $0x70] sm:$0xff]  ;;  %739 = vst [vmem:[%s1130_s30 + $0xc0] sm:$0xff] %v707_v17  ;;  %740 = vst [vmem:[%s1130_s30 + $0xc8] sm:$0xff] %v708_v18 }
 0x13a   : > { %v695_v5 = vld [vmem:[#allocation2 + $0x60] sm:$0xff]  ;;  %729 = vst [vmem:[%s1130_s30 + $0x70] sm:$0xff] %v697_v7  ;;  %741 = vst [vmem:[%s1130_s30 + $0xd0] sm:$0xff] %v709_v19  ;;  %v713_v23 = vld [vmem:[#allocation2 + $0xf0] sm:$0xff] }
 0x13b   : > { %727 = vst [vmem:[%s1130_s30 + $0x60] sm:$0xff] %v695_v5  ;;  %v698_v8 = vld [vmem:[#allocation2 + $0x78] sm:$0xff]  ;;  %v711_v21 = vld [vmem:[#allocation2 + $0xe0] sm:$0xff]  ;;  %742 = vst [vmem:[%s1130_s30 + $0xd8] sm:$0xff] %v710_v20 }
 0x13c   : > { %v696_v6 = vld [vmem:[#allocation2 + $0x68] sm:$0xff]  ;;  %730 = vst [vmem:[%s1130_s30 + $0x78] sm:$0xff] %v698_v8  ;;  %743 = vst [vmem:[%s1130_s30 + $0xe0] sm:$0xff] %v711_v21  ;;  %v714_v24 = vld [vmem:[#allocation2 + $0xf8] sm:$0xff] }
 0x13d   : > { %728 = vst [vmem:[%s1130_s30 + $0x68] sm:$0xff] %v696_v6  ;;  %v712_v22 = vld [vmem:[#allocation2 + $0xe8] sm:$0xff]  ;;  %745 = vst [vmem:[%s1130_s30 + $0xf0] sm:$0xff] %v713_v23 }
 0x13e   : > { %744 = vst [vmem:[%s1130_s30 + $0xe8] sm:$0xff] %v712_v22  ;;  %746 = vst [vmem:[%s1130_s30 + $0xf8] sm:$0xff] %v714_v24 }
 0x13f PF: > { %s12_s13 = sadd.s32 1, %s1065_s13   ;;  %s1208_s9 = smov %s1057_s11 }
 0x140   : > { %p9_p9 = scmp.ge.s32.totalorder %s12_s13, 20   ;;  %s1209_s10 = smov %s1061_s12 }
 0x141   : > { %s1210_s11 = smov %s1213_s14  ;;  %s1211_s12 = smov %s1217_s15 }
 0x142   :  { %11 = sbr.rel (!%p9_p9) target bundleno = 3 (0x3), region = 69 }

// kernel: _lambda_.20
= control target key start
LH: loop header
LB: loop body
LE: loop exit
PB: predicated region body
PF: predicated region fallthrough
CT: control target
= control target key end

     0   :  { %s607_s18 = smov 0   ;;  %s674_s0 = inlined_call_operand.vmem [shape: f32[128,128], index: 0, kind: input, shape index: {}]   ;;  %s675_s1 = inlined_call_operand.vmem [shape: f32[1,128], index: 1, kind: input, shape index: {}]   ;;  %s676_s2 = inlined_call_operand.vmem [shape: f32[1,128], index: 2, kind: input, shape index: {}]   ;;  %s677_s3 = inlined_call_operand.vmem [shape: bf16[128,128], index: 3, kind: input, shape index: {}]   ;;  %s678_s4 = inlined_call_operand.vmem [shape: f32[1,128], index: 4, kind: input, shape index: {}]   ;;  %s679_s5 = inlined_call_operand.vmem [shape: f32[128,128], index: 5, kind: output, shape index: {}]  }
   0x1 LB: > { %s479_s19 = sadd.s32 4294967295, %s575_s18   ;;  %p483_p0 = scmp.ge.s32.totalorder %s575_s18, 1  ;;  %s575_s18 = sphi %s607_s18, %s15_s18  }
   0x2   : > { %p188_p1 = scmp.lt.s32.totalorder %s575_s18, 3 }
   0x4   : > { %p189_p2 = pnand %p483_p0, %p188_p1 }
   0x5   : > { %v561_v0 = vld [vmem:[%s677_s3] sm:$0xff] (!%p189_p2)   ;;  %s484_s22 = sshll.u32 (!%p189_p2), %s479_s19, 3  ;;  %v562_v1 = vld [vmem:[%s677_s3 + $0x8] sm:$0xff] (!%p189_p2)   ;;  %v563_v2 = vld [vmem:[%s677_s3 + $0x10] sm:$0xff] (!%p189_p2)  }
   0x6   : > { %192 = sbr.rel (%p189_p2) target bundleno = 256 (0x100), region = 40  ;;  %p217_p3 = scmp.lt.s32.totalorder (!%p189_p2), %s484_s22, 15  ;;  %513 = vmatprep.subr.bf16.mxu0 (!%p189_p2), %v561_v0  ;;  %537 = vmatprep.subr.bf16.mxu1 (!%p189_p2), %v561_v0  ;;  %v564_v3 = vld [vmem:[%s677_s3 + $0x18] sm:$0xff] (!%p189_p2)   ;;  %v488_v6 = vld [vmem:[%s675_s1] ss:$0 sm:$0xff] (!%p189_p2)  ;;  %v566_v28 = vld [vmem:[%s677_s3 + $0x28] sm:$0xff] (!%p189_p2)  }
   0x7   : > { %514 = vmatpush3.bf16.msra.mxu0 (!%p189_p2), %v561_v0  ;;  %545 = vmatpush3.bf16.msra.mxu1 (!%p189_p2), %v561_v0  ;;  %v489_v9 = vld [vmem:[%s676_s2] ss:$0 sm:$0xff] (!%p189_p2)  ;;  %v567_v34 = vld [vmem:[%s677_s3 + $0x30] sm:$0xff] (!%p189_p2)   ;;  %v568_v39 = vld [vmem:[%s677_s3 + $0x38] sm:$0xff] (!%p189_p2)  }
   0x8   : > { %515 = vmatprep.subr.bf16.mxu0 (!%p189_p2), %v562_v1  ;;  %538 = vmatprep.subr.bf16.mxu1 (!%p189_p2), %v562_v1  ;;  %v565_v16 = vld [vmem:[%s677_s3 + $0x20] sm:$0xff] (!%p189_p2)  }
   0x9   : > { %v490_v46 = vld [vmem:[%s678_s4] ss:$0 sm:$0xff] (!%p189_p2) }
   0xb   : > { %516 = vmatpush3.bf16.msra.mxu0 (!%p189_p2), %v562_v1  ;;  %546 = vmatpush3.bf16.msra.mxu1 (!%p189_p2), %v562_v1 }
   0xc   : > { %517 = vmatprep.subr.bf16.mxu0 (!%p189_p2), %v563_v2  ;;  %539 = vmatprep.subr.bf16.mxu1 (!%p189_p2), %v563_v2 }
   0xd   : > { %s681_s22 = smov (!%p217_p3, %s484_s22), 15 }
   0xe   : > { %s485_s27 = sshll.u32 %s681_s22, 3 }
   0xf   : > { %s632_s30 = scalar_lea.vmem %s674_s0, %s485_s27  ;;  %518 = vmatpush3.bf16.msra.mxu0 %v563_v2  ;;  %547 = vmatpush3.bf16.msra.mxu1 %v563_v2  ;;  %s226_s26 = scalar_lea.vmem %s679_s5, %s485_s27 }
  0x10   : > { %v229_v4 = vld [vmem:[%s632_s30] sm:$0xff]  ;;  %v230_v5 = vld [vmem:[%s632_s30 + $0x8] sm:$0xff]  ;;  %519 = vmatprep.subr.bf16.mxu0 %v564_v3  ;;  %540 = vmatprep.subr.bf16.mxu1 %v564_v3  ;;  %v231_v23 = vld [vmem:[%s632_s30 + $0x10] sm:$0xff] }
  0x11   : > { %v244_v7 = vmul.f32 %v488_v6, %v229_v4  ;;  %v245_v8 = vmul.f32 %v488_v6, %v230_v5  ;;  %v233_v10 = vld [vmem:[%s632_s30 + $0x20] sm:$0xff]  ;;  %v234_v11 = vld [vmem:[%s632_s30 + $0x28] sm:$0xff]  ;;  %v232_v25 = vld [vmem:[%s632_s30 + $0x18] sm:$0xff]  ;;  %v246_v30 = vmul.f32 %v488_v6, %v231_v23 }
  0x12   : > { %v248_v12 = vmul.f32 %v488_v6, %v233_v10  ;;  %v249_v13 = vmul.f32 %v488_v6, %v234_v11  ;;  %v235_v26 = vld [vmem:[%s632_s30 + $0x30] sm:$0xff]  ;;  %v236_v27 = vld [vmem:[%s632_s30 + $0x38] sm:$0xff]  ;;  %v247_v31 = vmul.f32 %v488_v6, %v232_v25 }
  0x13   : > { %v259_v14 = vadd.f32 %v489_v9, %v244_v7  ;;  %v260_v15 = vadd.f32 %v489_v9, %v245_v8  ;;  %520 = vmatpush3.bf16.msra.mxu0 %v564_v3  ;;  %548 = vmatpush3.bf16.msra.mxu1 %v564_v3  ;;  %v250_v32 = vmul.f32 %v488_v6, %v235_v26 }
  0x14   : > { %v263_v17 = vadd.f32 %v489_v9, %v248_v12  ;;  %v264_v18 = vadd.f32 %v489_v9, %v249_v13  ;;  %521 = vmatprep.subr.bf16.mxu0 %v565_v16  ;;  %541 = vmatprep.subr.bf16.mxu1 %v565_v16  ;;  %v251_v33 = vmul.f32 %v488_v6, %v236_v27 }
  0x15   : > { %v267_v19 = vmax.f32 %v259_v14, 0.0  ;;  %v268_v20 = vmax.f32 %v260_v15, 0.0  ;;  %v261_v35 = vadd.f32 %v489_v9, %v246_v30  ;;  %v262_v36 = vadd.f32 %v489_v9, %v247_v31 }
  0x16   : > { %v271_v21 = vmax.f32 %v263_v17, 0.0  ;;  %v272_v22 = vmax.f32 %v264_v18, 0.0  ;;  %v265_v37 = vadd.f32 %v489_v9, %v250_v32  ;;  %v266_v38 = vadd.f32 %v489_v9, %v251_v33 }
  0x17   : > { %v275_v24 = vpack.c.bf16 %v268_v20, %v267_v19  ;;  %522 = vmatpush3.bf16.msra.mxu0 %v565_v16  ;;  %549 = vmatpush3.bf16.msra.mxu1 %v565_v16  ;;  %v269_v40 = vmax.f32 %v261_v35, 0.0  ;;  %v270_v41 = vmax.f32 %v262_v36, 0.0 }
  0x18   : > { %v277_v29 = vpack.c.bf16 %v272_v22, %v271_v21  ;;  %523 = vmatprep.subr.bf16.mxu0 %v566_v28  ;;  %542 = vmatprep.subr.bf16.mxu1 %v566_v28  ;;  %v273_v42 = vmax.f32 %v265_v37, 0.0  ;;  %v274_v43 = vmax.f32 %v266_v38, 0.0 }
  0x19   : > { %529 = vmatprep.mubr.bf16.mxu0 %v275_v24  ;;  %v276_v44 = vpack.c.bf16 %v270_v41, %v269_v40 }
  0x1a   : > { %533 = vmatprep.mubr.bf16.mxu1 %v277_v29  ;;  %v278_v45 = vpack.c.bf16 %v274_v43, %v273_v42 }
  0x1b   : > { %524 = vmatpush3.bf16.msra.mxu0 %v566_v28  ;;  %550 = vmatpush3.bf16.msra.mxu1 %v566_v28 }
  0x1c   : > { %525 = vmatprep.subr.bf16.mxu0 %v567_v34  ;;  %543 = vmatprep.subr.bf16.mxu1 %v567_v34 }
  0x1f   : > { %526 = vmatpush3.bf16.msra.mxu0 %v567_v34  ;;  %551 = vmatpush3.bf16.msra.mxu1 %v567_v34 }
  0x20   : > { %527 = vmatprep.subr.bf16.mxu0 %v568_v39  ;;  %544 = vmatprep.subr.bf16.mxu1 %v568_v39 }
  0x23   : > { %528 = vmatpush3.bf16.msra.mxu0 %v568_v39  ;;  %552 = vmatpush3.bf16.msra.mxu1 %v568_v39 }
  0x26   : > { %530 = vmatmul.mubr.bf16.vlgmr.msra.gmra.mrb[0].mxu0 %v276_v44  ;;  %534 = vmatmul.mubr.bf16.vlgmr.msra.gmra.mrb[0].mxu1 %v278_v45 }
  0xf9   : > { %v531_v47 = vpop.f32.mrb[0].mxu0  ;;  %v535_v48 = vpop.f32.mrb[0].mxu1 }
  0xfa   : > { %v393_v49 = vadd.f32 %v531_v47, %v490_v46  ;;  %v409_v50 = vadd.f32 %v535_v48, %v490_v46  ;;  %v384_v51 = vpop.f32.mrb[1].mxu0  ;;  %v400_v52 = vpop.f32.mrb[1].mxu1 }
  0xfb   : > { %v385_v53 = vadd.f32 %v490_v46, %v384_v51  ;;  %v401_v54 = vadd.f32 %v490_v46, %v400_v52  ;;  %v532_v55 = vpop.f32.mrb[2].mxu0  ;;  %v536_v56 = vpop.f32.mrb[2].mxu1 }
  0xfc   : > { %417 = vst [vmem:[%s226_s26 + $0x10] sm:$0xff] %v393_v49  ;;  %421 = vst [vmem:[%s226_s26 + $0x30] sm:$0xff] %v409_v50  ;;  %v396_v57 = vadd.f32 %v532_v55, %v490_v46  ;;  %v412_v58 = vadd.f32 %v536_v56, %v490_v46  ;;  %v387_v59 = vpop.f32.mrb[3].mxu0  ;;  %v403_v60 = vpop.f32.mrb[3].mxu1 }
  0xfd   : > { %415 = vst [vmem:[%s226_s26] sm:$0xff] %v385_v53  ;;  %419 = vst [vmem:[%s226_s26 + $0x20] sm:$0xff] %v401_v54  ;;  %v388_v61 = vadd.f32 %v490_v46, %v387_v59  ;;  %v404_v62 = vadd.f32 %v490_v46, %v403_v60 }
  0xfe   : > { %418 = vst [vmem:[%s226_s26 + $0x18] sm:$0xff] %v396_v57  ;;  %422 = vst [vmem:[%s226_s26 + $0x38] sm:$0xff] %v412_v58 }
  0xff   : > { %416 = vst [vmem:[%s226_s26 + $0x8] sm:$0xff] %v388_v61  ;;  %420 = vst [vmem:[%s226_s26 + $0x28] sm:$0xff] %v404_v62 }
 0x100 PF: > { %s15_s18 = sadd.s32 1, %s575_s18  }
 0x101   : > { %p12_p4 = scmp.ge.s32.totalorder %s15_s18, 4  }
 0x103   :  { %14 = sbr.rel (!%p12_p4) target bundleno = 1 (0x1), region = 70 }

// kernel: _lambda_.21
= control target key start
LH: loop header
LB: loop body
LE: loop exit
PB: predicated region body
PF: predicated region fallthrough
CT: control target
= control target key end

     0   :  { %s687_s9 = smov 0   ;;  %s689_s10 = smov 0   ;;  %s773_s0 = inlined_call_operand.vmem [shape: bf16[9,128,128], index: 0, kind: input, shape index: {}]   ;;  %s774_s1 = inlined_call_operand.vmem [shape: bf16[9,128,128], index: 1, kind: input, shape index: {}]   ;;  %s775_s2 = inlined_call_operand.vmem [shape: f32[128,128], index: 2, kind: output, shape index: {}]  }
   0x1   :  { %s691_s11 = smov 0   ;;  %s693_s12 = smov 0  }
   0x2   :  { %s695_s13 = smov 0  }
   0x3 LB: > { %s21_s14 = sadd.s32 1, %s661_s11  ;;  %s24_s15 = sadd.s32 1, %s665_s12  ;;  %s669_s13 = sphi %s695_s13, %s12_s13   ;;  %s665_s12 = sphi %s693_s12, %s779_s12   ;;  %s661_s11 = sphi %s691_s11, %s778_s11   ;;  %s657_s10 = sphi %s689_s10, %s777_s10   ;;  %s653_s9 = sphi %s687_s9, %s776_s9  }
   0x4   : > { %p22_p0 = scmp.ge.s32.totalorder %s21_s14, 9  ;;  %p501_p1 = scmp.ge.s32.totalorder %s669_s13, 1 }
   0x5   : > { %p141_p2 = scmp.lt.s32.totalorder %s669_s13, 19 }
   0x6   : > { %s781_s14 = smov (%p22_p0, %s21_s14), 0  ;;  %s783_s15 = smov (!%p22_p0, %s24_s15), %s665_s12 }
   0x7   : > { %p142_p3 = pnand %p501_p1, %p141_p2  ;;  %p26_p4 = scmp.ge.s32.totalorder %s783_s15, 2 }
   0x8   : > { %s502_s16 = sshll.u32 (!%p142_p3), %s657_s10, 3  ;;  %p173_p5 = scmp.lt.s32.totalorder (!%p142_p3), %s653_s9, 8 }
   0x9   : > { %s785_s15 = smov (%p26_p4, %s783_s15), 0  ;;  %145 = sbr.rel (%p142_p3) target bundleno = 284 (0x11c), region = 28 }
   0xa   : > { %p175_p6 = scmp.lt.s32.totalorder (!%p142_p3), %s502_s16, 15  ;;  %p509_p7 = scmp.ne.s32.totalorder (!%p142_p3), %s653_s9, 0 }
  0x10   : > { %s174_s17 = scalar_select %p173_p5, %s653_s9, 8 }
  0x11   : > { %s787_s16 = smov (!%p175_p6, %s502_s16), 15  ;;  %197 = sbr.rel (%p509_p7) target bundleno = 24 (0x18), region = 32 }
  0x12   : > { %s503_s18 = sshll.u32 %s174_s17, 4  ;;  %s525_s19 = sshll.u32 %s174_s17, 6  ;;  %v671_v0 = vmov (!%p509_p7), 0.0  }
  0x13   : > { %s178_s20 = sadd.s32 %s503_s18, %s787_s16  ;;  %s724_s23 = scalar_lea.vmem %s774_s1, %s525_s19  ;;  %198 = vst [vmem:[#allocation2] sm:$0xff] (!%p509_p7), %v671_v0  ;;  %199 = vst [vmem:[#allocation2 + $0x8] sm:$0xff] (!%p509_p7), %v671_v0 }
  0x14   : > { %s504_s24 = sshll.u32 %s178_s20, 2  ;;  %s508_s25 = sshll.u32 %s787_s16, 3  ;;  %200 = vst [vmem:[#allocation2 + $0x10] sm:$0xff] (!%p509_p7), %v671_v0  ;;  %201 = vst [vmem:[#allocation2 + $0x18] sm:$0xff] (!%p509_p7), %v671_v0 }
  0x15   : > { %s729_s28 = scalar_lea.vmem %s773_s0, %s504_s24  ;;  %s734_s3 = scalar_lea.vmem %s775_s2, %s508_s25  ;;  %202 = vst [vmem:[#allocation2 + $0x20] sm:$0xff] (!%p509_p7), %v671_v0  ;;  %203 = vst [vmem:[#allocation2 + $0x28] sm:$0xff] (!%p509_p7), %v671_v0 }
  0x16   : > { %204 = vst [vmem:[#allocation2 + $0x30] sm:$0xff] (!%p509_p7), %v671_v0  ;;  %205 = vst [vmem:[#allocation2 + $0x38] sm:$0xff] (!%p509_p7), %v671_v0 }
  0x18 PF: > { %v619_v1 = vld [vmem:[%s724_s23] sm:$0xff]   ;;  %v620_v2 = vld [vmem:[%s724_s23 + $0x8] sm:$0xff]   ;;  %v621_v3 = vld [vmem:[%s724_s23 + $0x10] sm:$0xff]   ;;  %p522_p8 = scmp.ne.s32.totalorder %s653_s9, 8 }
  0x19   : > { %538 = vmatprep.subr.bf16.mxu0 %v619_v1  ;;  %562 = vmatprep.subr.bf16.mxu1 %v619_v1  ;;  %v622_v4 = vld [vmem:[%s724_s23 + $0x18] sm:$0xff]   ;;  %v627_v5 = vld [vmem:[%s729_s28] sm:$0xff]   ;;  %v628_v6 = vld [vmem:[%s729_s28 + $0x10] sm:$0xff]  }
  0x1a   : > { %539 = vmatpush3.bf16.msra.mxu0 %v619_v1  ;;  %570 = vmatpush3.bf16.msra.mxu1 %v619_v1  ;;  %v623_v7 = vld [vmem:[%s724_s23 + $0x20] sm:$0xff]   ;;  %v624_v8 = vld [vmem:[%s724_s23 + $0x28] sm:$0xff]   ;;  %v625_v9 = vld [vmem:[%s724_s23 + $0x30] sm:$0xff]  }
  0x1b   : > { %540 = vmatprep.subr.bf16.mxu0 %v620_v2  ;;  %563 = vmatprep.subr.bf16.mxu1 %v620_v2  ;;  %v626_v10 = vld [vmem:[%s724_s23 + $0x38] sm:$0xff]   ;;  %v629_v11 = vld [vmem:[%s729_s28 + $0x8] sm:$0xff]   ;;  %v208_v13 = vld [vmem:[#allocation2 + $0x10] sm:$0xff] }
  0x1c   : > { %554 = vmatprep.mubr.bf16.mxu0 %v627_v5  ;;  %558 = vmatprep.mubr.bf16.mxu1 %v628_v6  ;;  %v630_v12 = vld [vmem:[%s729_s28 + $0x18] sm:$0xff]   ;;  %v206_v15 = vld [vmem:[#allocation2] sm:$0xff]  ;;  %v207_v25 = vld [vmem:[#allocation2 + $0x8] sm:$0xff] }
  0x1d   : > { %v212_v14 = vld [vmem:[#allocation2 + $0x30] sm:$0xff]  ;;  %v210_v16 = vld [vmem:[#allocation2 + $0x20] sm:$0xff]  ;;  %v209_v19 = vld [vmem:[#allocation2 + $0x18] sm:$0xff] }
  0x1e   : > { %541 = vmatpush3.bf16.msra.mxu0 %v620_v2  ;;  %571 = vmatpush3.bf16.msra.mxu1 %v620_v2  ;;  %v213_v20 = vld [vmem:[#allocation2 + $0x38] sm:$0xff]  ;;  %v211_v26 = vld [vmem:[#allocation2 + $0x28] sm:$0xff] }
  0x1f   : > { %542 = vmatprep.subr.bf16.mxu0 %v621_v3  ;;  %564 = vmatprep.subr.bf16.mxu1 %v621_v3 }
  0x22   : > { %543 = vmatpush3.bf16.msra.mxu0 %v621_v3  ;;  %572 = vmatpush3.bf16.msra.mxu1 %v621_v3 }
  0x23   : > { %544 = vmatprep.subr.bf16.mxu0 %v622_v4  ;;  %565 = vmatprep.subr.bf16.mxu1 %v622_v4 }
  0x26   : > { %545 = vmatpush3.bf16.msra.mxu0 %v622_v4  ;;  %573 = vmatpush3.bf16.msra.mxu1 %v622_v4 }
  0x27   : > { %546 = vmatprep.subr.bf16.mxu0 %v623_v7  ;;  %566 = vmatprep.subr.bf16.mxu1 %v623_v7 }
  0x2a   : > { %547 = vmatpush3.bf16.msra.mxu0 %v623_v7  ;;  %574 = vmatpush3.bf16.msra.mxu1 %v623_v7 }
  0x2b   : > { %548 = vmatprep.subr.bf16.mxu0 %v624_v8  ;;  %567 = vmatprep.subr.bf16.mxu1 %v624_v8 }
  0x2e   : > { %549 = vmatpush3.bf16.msra.mxu0 %v624_v8  ;;  %575 = vmatpush3.bf16.msra.mxu1 %v624_v8 }
  0x2f   : > { %550 = vmatprep.subr.bf16.mxu0 %v625_v9  ;;  %568 = vmatprep.subr.bf16.mxu1 %v625_v9 }
  0x32   : > { %551 = vmatpush3.bf16.msra.mxu0 %v625_v9  ;;  %576 = vmatpush3.bf16.msra.mxu1 %v625_v9 }
  0x33   : > { %552 = vmatprep.subr.bf16.mxu0 %v626_v10  ;;  %569 = vmatprep.subr.bf16.mxu1 %v626_v10 }
  0x36   : > { %553 = vmatpush3.bf16.msra.mxu0 %v626_v10  ;;  %577 = vmatpush3.bf16.msra.mxu1 %v626_v10 }
  0x39   : > { %555 = vmatmul.mubr.bf16.vlgmr.msra.gmra.mrb[0].mxu0 %v629_v11  ;;  %559 = vmatmul.mubr.bf16.vlgmr.msra.gmra.mrb[0].mxu1 %v630_v12 }
 0x10c   : > { %v556_v17 = vpop.f32.mrb[0].mxu0  ;;  %v560_v18 = vpop.f32.mrb[0].mxu1  ;;  %394 = sbr.rel (%p522_p8) target bundleno = 284 (0x11c), region = 36 }
 0x10d   : > { %v377_v21 = vadd.f32 %v556_v17, %v208_v13  ;;  %v381_v22 = vadd.f32 %v560_v18, %v212_v14  ;;  %v344_v23 = vpop.f32.mrb[1].mxu0  ;;  %v360_v24 = vpop.f32.mrb[1].mxu1 }
 0x10e   : > { %v375_v27 = vadd.f32 %v344_v23, %v206_v15  ;;  %v379_v28 = vadd.f32 %v360_v24, %v210_v16  ;;  %v557_v29 = vpop.f32.mrb[2].mxu0  ;;  %v561_v30 = vpop.f32.mrb[2].mxu1 }
 0x10f   : > { %385 = vst [vmem:[#allocation2 + $0x10] sm:$0xff] %v377_v21  ;;  %389 = vst [vmem:[#allocation2 + $0x30] sm:$0xff] %v381_v22  ;;  %v378_v31 = vadd.f32 %v557_v29, %v209_v19  ;;  %v382_v32 = vadd.f32 %v561_v30, %v213_v20  ;;  %v347_v33 = vpop.f32.mrb[3].mxu0  ;;  %v363_v34 = vpop.f32.mrb[3].mxu1 }
 0x110   : > { %383 = vst [vmem:[#allocation2] sm:$0xff] %v375_v27  ;;  %387 = vst [vmem:[#allocation2 + $0x20] sm:$0xff] %v379_v28  ;;  %v376_v35 = vadd.f32 %v347_v33, %v207_v25  ;;  %v380_v36 = vadd.f32 %v363_v34, %v211_v26 }
 0x111   : > { %386 = vst [vmem:[#allocation2 + $0x18] sm:$0xff] %v378_v31  ;;  %390 = vst [vmem:[#allocation2 + $0x38] sm:$0xff] %v382_v32 }
 0x112   : > { %384 = vst [vmem:[#allocation2 + $0x8] sm:$0xff] %v376_v35  ;;  %388 = vst [vmem:[#allocation2 + $0x28] sm:$0xff] %v380_v36 }
 0x116   : > { %v397_v39 = vld [vmem:[#allocation2 + $0x10] sm:$0xff] }
 0x117   : > { %v395_v37 = vld [vmem:[#allocation2] sm:$0xff]  ;;  %405 = vst [vmem:[%s734_s3 + $0x10] sm:$0xff] %v397_v39  ;;  %v401_v43 = vld [vmem:[#allocation2 + $0x30] sm:$0xff] }
 0x118   : > { %403 = vst [vmem:[%s734_s3] sm:$0xff] %v395_v37  ;;  %v398_v40 = vld [vmem:[#allocation2 + $0x18] sm:$0xff]  ;;  %v399_v41 = vld [vmem:[#allocation2 + $0x20] sm:$0xff]  ;;  %409 = vst [vmem:[%s734_s3 + $0x30] sm:$0xff] %v401_v43 }
 0x119   : > { %v396_v38 = vld [vmem:[#allocation2 + $0x8] sm:$0xff]  ;;  %406 = vst [vmem:[%s734_s3 + $0x18] sm:$0xff] %v398_v40  ;;  %407 = vst [vmem:[%s734_s3 + $0x20] sm:$0xff] %v399_v41  ;;  %v402_v44 = vld [vmem:[#allocation2 + $0x38] sm:$0xff] }
 0x11a   : > { %404 = vst [vmem:[%s734_s3 + $0x8] sm:$0xff] %v396_v38  ;;  %v400_v42 = vld [vmem:[#allocation2 + $0x28] sm:$0xff]  ;;  %410 = vst [vmem:[%s734_s3 + $0x38] sm:$0xff] %v402_v44 }
 0x11b   : > { %408 = vst [vmem:[%s734_s3 + $0x28] sm:$0xff] %v400_v42 }
 0x11c PF: > { %s12_s13 = sadd.s32 1, %s669_s13   ;;  %s776_s9 = smov %s661_s11 }
 0x11d   : > { %p9_p9 = scmp.ge.s32.totalorder %s12_s13, 20   ;;  %s777_s10 = smov %s665_s12 }
 0x11e   : > { %s778_s11 = smov %s781_s14  ;;  %s779_s12 = smov %s785_s15 }
 0x11f   :  { %11 = sbr.rel (!%p9_p9) target bundleno = 3 (0x3), region = 69 }

// kernel: _lambda_.23
= control target key start
LH: loop header
LB: loop body
LE: loop exit
PB: predicated region body
PF: predicated region fallthrough
CT: control target
= control target key end

     0   :  { %s531_s18 = smov 0   ;;  %s588_s0 = inlined_call_operand.vmem [shape: f32[32,128], index: 0, kind: input, shape index: {}]   ;;  %s589_s1 = inlined_call_operand.vmem [shape: f32[1,128], index: 1, kind: input, shape index: {}]   ;;  %s590_s2 = inlined_call_operand.vmem [shape: f32[1,128], index: 2, kind: input, shape index: {}]   ;;  %s591_s3 = inlined_call_operand.vmem [shape: bf16[128,128], index: 3, kind: input, shape index: {}]   ;;  %s592_s4 = inlined_call_operand.vmem [shape: f32[1,128], index: 4, kind: input, shape index: {}]   ;;  %s593_s5 = inlined_call_operand.vmem [shape: f32[32,128], index: 5, kind: output, shape index: {}]  }
   0x1 LB: > { %s422_s19 = sadd.s32 4294967295, %s497_s18   ;;  %p426_p0 = scmp.ge.s32.totalorder %s497_s18, 1  ;;  %s497_s18 = sphi %s531_s18, %s15_s18  }
   0x2   : > { %p188_p1 = scmp.lt.s32.totalorder %s497_s18, 3 }
   0x4   : > { %p189_p2 = pnand %p426_p0, %p188_p1 }
   0x5   : > { %v483_v0 = vld [vmem:[%s591_s3] sm:$0xff] (!%p189_p2)   ;;  %v499_v1 = vmov (!%p189_p2), 0.0   ;;  %v484_v2 = vld [vmem:[%s591_s3 + $0x8] sm:$0xff] (!%p189_p2)   ;;  %vm500_vm0 = vmmov (!%p189_p2), 0   ;;  %s427_s24 = sshll.u32 (!%p189_p2), %s422_s19, 1  ;;  %v485_v3 = vld [vmem:[%s591_s3 + $0x10] sm:$0xff] (!%p189_p2)  }
   0x6   : > { %192 = sbr.rel (%p189_p2) target bundleno = 255 (0xff), region = 40  ;;  %453 = vmatprep.subr.bf16.mxu0 (!%p189_p2), %v499_v1  ;;  %469 = vmatprep.mubr.msk.bf16.mxu0 (!%p189_p2), %vm500_vm0, %v499_v1  ;;  %p217_p3 = scmp.lt.s32.totalorder (!%p189_p2), %s427_s24, 3  ;;  %v486_v4 = vld [vmem:[%s591_s3 + $0x18] sm:$0xff] (!%p189_p2)   ;;  %v487_v5 = vld [vmem:[%s591_s3 + $0x20] sm:$0xff] (!%p189_p2)   ;;  %v488_v11 = vld [vmem:[%s591_s3 + $0x28] sm:$0xff] (!%p189_p2)  }
   0x7   : > { %454 = vmatpush3.bf16.msra.mxu0 (!%p189_p2), %v483_v0  ;;  %v431_v8 = vld [vmem:[%s589_s1] ss:$0 sm:$0xff] (!%p189_p2)  ;;  %v489_v15 = vld [vmem:[%s591_s3 + $0x30] sm:$0xff] (!%p189_p2)   ;;  %v490_v18 = vld [vmem:[%s591_s3 + $0x38] sm:$0xff] (!%p189_p2)  }
   0x8   : > { %455 = vmatprep.subr.bf16.mxu0 (!%p189_p2), %v499_v1  ;;  %v432_v12 = vld [vmem:[%s590_s2] ss:$0 sm:$0xff] (!%p189_p2) }
   0x9   : > { %v433_v20 = vld [vmem:[%s592_s4] ss:$0 sm:$0xff] (!%p189_p2) }
   0xb   : > { %456 = vmatpush3.bf16.msra.mxu0 (!%p189_p2), %v484_v2 }
   0xc   : > { %457 = vmatprep.subr.bf16.mxu0 (!%p189_p2), %v499_v1 }
   0xd   : > { %s595_s24 = smov (!%p217_p3, %s427_s24), 3 }
   0xe   : > { %s428_s27 = sshll.u32 %s595_s24, 3 }
   0xf   : > { %458 = vmatpush3.bf16.msra.mxu0 %v485_v3  ;;  %s220_s7 = scalar_lea.vmem %s588_s0, %s428_s27  ;;  %s226_s26 = scalar_lea.vmem %s593_s5, %s428_s27 }
  0x10   : > { %459 = vmatprep.subr.bf16.mxu0 %v499_v1  ;;  %v229_v6 = vld [vmem:[%s220_s7] sm:$0xff]  ;;  %v230_v7 = vld [vmem:[%s220_s7 + $0x8] sm:$0xff] }
  0x11   : > { %v238_v9 = vmul.f32 %v431_v8, %v229_v6  ;;  %v239_v10 = vmul.f32 %v431_v8, %v230_v7 }
  0x13   : > { %460 = vmatpush3.bf16.msra.mxu0 %v486_v4  ;;  %v247_v13 = vadd.f32 %v432_v12, %v238_v9  ;;  %v248_v14 = vadd.f32 %v432_v12, %v239_v10 }
  0x14   : > { %461 = vmatprep.subr.bf16.mxu0 %v499_v1 }
  0x15   : > { %v249_v16 = vmax.f32 %v247_v13, 0.0  ;;  %v250_v17 = vmax.f32 %v248_v14, 0.0 }
  0x17   : > { %462 = vmatpush3.bf16.msra.mxu0 %v487_v5  ;;  %v251_v19 = vpack.c.bf16 %v250_v17, %v249_v16 }
  0x18   : > { %463 = vmatprep.subr.bf16.mxu0 %v499_v1 }
  0x1b   : > { %464 = vmatpush3.bf16.msra.mxu0 %v488_v11 }
  0x1c   : > { %465 = vmatprep.subr.bf16.mxu0 %v499_v1 }
  0x1f   : > { %466 = vmatpush3.bf16.msra.mxu0 %v489_v15 }
  0x20   : > { %467 = vmatprep.subr.bf16.mxu0 %v499_v1 }
  0x23   : > { %468 = vmatpush3.bf16.msra.mxu0 %v490_v18 }
  0x26   : > { %470 = vmatmul.mubr.bf16.vlgmr.msra.gmra.mrb[0].mxu0 %v251_v19 }
  0xf9   : > { %v357_v21 = vpop.f32.mrb[0].mxu0 }
  0xfa   : > { %v358_v22 = vadd.f32 %v433_v20, %v357_v21  ;;  %v471_v23 = vpop.f32.mrb[1].mxu0 }
  0xfb   : > { %v360_v24 = vpop.f32.mrb[2].mxu0 }
  0xfc   : > { %364 = vst [vmem:[%s226_s26] sm:$0xff] %v358_v22  ;;  %v361_v25 = vadd.f32 %v433_v20, %v360_v24  ;;  %v472_v26 = vpop.f32.mrb[3].mxu0 }
  0xfe   : > { %365 = vst [vmem:[%s226_s26 + $0x8] sm:$0xff] %v361_v25 }
  0xff PF: > { %s15_s18 = sadd.s32 1, %s497_s18  }
 0x100   : > { %p12_p4 = scmp.ge.s32.totalorder %s15_s18, 4  }
 0x102   :  { %14 = sbr.rel (!%p12_p4) target bundleno = 1 (0x1), region = 70 }

// kernel: _lambda_.24
= control target key start
LH: loop header
LB: loop body
LE: loop exit
PB: predicated region body
PF: predicated region fallthrough
CT: control target
= control target key end

     0   :  { %s578_s9 = smov 0   ;;  %s580_s10 = smov 0   ;;  %s655_s0 = inlined_call_operand.vmem [shape: bf16[9,32,128], index: 0, kind: input, shape index: {}]   ;;  %s656_s1 = inlined_call_operand.vmem [shape: bf16[9,128,128], index: 1, kind: input, shape index: {}]   ;;  %s657_s2 = inlined_call_operand.vmem [shape: f32[32,128], index: 2, kind: output, shape index: {}]  }
   0x1   :  { %s582_s11 = smov 0   ;;  %s584_s12 = smov 0  }
   0x2   :  { %s586_s13 = smov 0  }
   0x3 LB: > { %s21_s14 = sadd.s32 1, %s550_s11  ;;  %s24_s15 = sadd.s32 1, %s554_s12  ;;  %s558_s13 = sphi %s586_s13, %s12_s13   ;;  %s554_s12 = sphi %s584_s12, %s661_s12   ;;  %s550_s11 = sphi %s582_s11, %s660_s11   ;;  %s546_s10 = sphi %s580_s10, %s659_s10   ;;  %s542_s9 = sphi %s578_s9, %s658_s9  }
   0x4   : > { %p22_p0 = scmp.ge.s32.totalorder %s21_s14, 9  ;;  %p417_p1 = scmp.ge.s32.totalorder %s558_s13, 1 }
   0x5   : > { %p141_p2 = scmp.lt.s32.totalorder %s558_s13, 19 }
   0x6   : > { %s663_s14 = smov (%p22_p0, %s21_s14), 0  ;;  %s665_s15 = smov (!%p22_p0, %s24_s15), %s554_s12 }
   0x7   : > { %p142_p3 = pnand %p417_p1, %p141_p2  ;;  %p26_p4 = scmp.ge.s32.totalorder %s665_s15, 2 }
   0x8   : > { %s418_s16 = sshll.u32 (!%p142_p3), %s546_s10, 1  ;;  %p173_p5 = scmp.lt.s32.totalorder (!%p142_p3), %s542_s9, 8 }
   0x9   : > { %s667_s15 = smov (%p26_p4, %s665_s15), 0  ;;  %145 = sbr.rel (%p142_p3) target bundleno = 282 (0x11a), region = 28 }
   0xa   : > { %p175_p6 = scmp.lt.s32.totalorder (!%p142_p3), %s418_s16, 3  ;;  %p425_p7 = scmp.ne.s32.totalorder (!%p142_p3), %s542_s9, 0 }
  0x10   : > { %s174_s17 = scalar_select %p173_p5, %s542_s9, 8 }
  0x11   : > { %s669_s16 = smov (!%p175_p6, %s418_s16), 3  ;;  %197 = sbr.rel (%p425_p7) target bundleno = 24 (0x18), region = 32 }
  0x12   : > { %s419_s18 = sshll.u32 %s174_s17, 2  ;;  %s438_s19 = sshll.u32 %s174_s17, 6  ;;  %v560_v0 = vmov (!%p425_p7), 0.0  }
  0x13   : > { %s178_s20 = sadd.s32 %s419_s18, %s669_s16  ;;  %s615_s23 = scalar_lea.vmem %s656_s1, %s438_s19  ;;  %198 = vst [vmem:[#allocation2] sm:$0xff] (!%p425_p7), %v560_v0  ;;  %199 = vst [vmem:[#allocation2 + $0x8] sm:$0xff] (!%p425_p7), %v560_v0 }
  0x14   : > { %s420_s24 = sshll.u32 %s178_s20, 2  ;;  %s424_s25 = sshll.u32 %s669_s16, 3 }
  0x15   : > { %s620_s28 = scalar_lea.vmem %s655_s0, %s420_s24  ;;  %s625_s3 = scalar_lea.vmem %s657_s2, %s424_s25 }
  0x18 PF: > { %v511_v1 = vld [vmem:[%s615_s23] sm:$0xff]   ;;  %v561_v2 = vmov 0.0   ;;  %v512_v3 = vld [vmem:[%s615_s23 + $0x8] sm:$0xff]   ;;  %vm562_vm0 = vmmov 0   ;;  %v513_v4 = vld [vmem:[%s615_s23 + $0x10] sm:$0xff]   ;;  %p435_p8 = scmp.ne.s32.totalorder %s542_s9, 8 }
  0x19   : > { %448 = vmatprep.subr.bf16.mxu0 %v561_v2  ;;  %464 = vmatprep.mubr.msk.bf16.mxu0 %vm562_vm0, %v561_v2  ;;  %v514_v5 = vld [vmem:[%s615_s23 + $0x18] sm:$0xff]   ;;  %v515_v6 = vld [vmem:[%s615_s23 + $0x20] sm:$0xff]   ;;  %v516_v7 = vld [vmem:[%s615_s23 + $0x28] sm:$0xff]  }
  0x1a   : > { %449 = vmatpush3.bf16.msra.mxu0 %v511_v1  ;;  %v517_v8 = vld [vmem:[%s615_s23 + $0x30] sm:$0xff]   ;;  %v518_v9 = vld [vmem:[%s615_s23 + $0x38] sm:$0xff]   ;;  %v519_v10 = vld [vmem:[%s620_s28] sm:$0xff]  }
  0x1b   : > { %450 = vmatprep.subr.bf16.mxu0 %v561_v2  ;;  %v200_v11 = vld [vmem:[#allocation2] sm:$0xff]  ;;  %v201_v13 = vld [vmem:[#allocation2 + $0x8] sm:$0xff] }
  0x1e   : > { %451 = vmatpush3.bf16.msra.mxu0 %v512_v3 }
  0x1f   : > { %452 = vmatprep.subr.bf16.mxu0 %v561_v2 }
  0x22   : > { %453 = vmatpush3.bf16.msra.mxu0 %v513_v4 }
  0x23   : > { %454 = vmatprep.subr.bf16.mxu0 %v561_v2 }
  0x26   : > { %455 = vmatpush3.bf16.msra.mxu0 %v514_v5 }
  0x27   : > { %456 = vmatprep.subr.bf16.mxu0 %v561_v2 }
  0x2a   : > { %457 = vmatpush3.bf16.msra.mxu0 %v515_v6 }
  0x2b   : > { %458 = vmatprep.subr.bf16.mxu0 %v561_v2 }
  0x2e   : > { %459 = vmatpush3.bf16.msra.mxu0 %v516_v7 }
  0x2f   : > { %460 = vmatprep.subr.bf16.mxu0 %v561_v2 }
  0x32   : > { %461 = vmatpush3.bf16.msra.mxu0 %v517_v8 }
  0x33   : > { %462 = vmatprep.subr.bf16.mxu0 %v561_v2 }
  0x36   : > { %463 = vmatpush3.bf16.msra.mxu0 %v518_v9 }
  0x39   : > { %465 = vmatmul.mubr.bf16.vlgmr.msra.gmra.mrb[0].mxu0 %v519_v10 }
 0x10b   : > { %322 = sbr.rel (%p435_p8) target bundleno = 282 (0x11a), region = 36 }
 0x10c   : > { %v308_v12 = vpop.f32.mrb[0].mxu0 }
 0x10d   : > { %v315_v14 = vadd.f32 %v308_v12, %v200_v11  ;;  %v466_v15 = vpop.f32.mrb[1].mxu0 }
 0x10e   : > { %v311_v16 = vpop.f32.mrb[2].mxu0 }
 0x10f   : > { %317 = vst [vmem:[#allocation2] sm:$0xff] %v315_v14  ;;  %v316_v17 = vadd.f32 %v311_v16, %v201_v13  ;;  %v467_v18 = vpop.f32.mrb[3].mxu0 }
 0x111   : > { %318 = vst [vmem:[#allocation2 + $0x8] sm:$0xff] %v316_v17 }
 0x116   : > { %v323_v19 = vld [vmem:[#allocation2] sm:$0xff] }
 0x117   : > { %325 = vst [vmem:[%s625_s3] sm:$0xff] %v323_v19 }
 0x118   : > { %v324_v20 = vld [vmem:[#allocation2 + $0x8] sm:$0xff] }
 0x119   : > { %326 = vst [vmem:[%s625_s3 + $0x8] sm:$0xff] %v324_v20 }
 0x11a PF: > { %s12_s13 = sadd.s32 1, %s558_s13   ;;  %s658_s9 = smov %s550_s11 }
 0x11b   : > { %p9_p9 = scmp.ge.s32.totalorder %s12_s13, 20   ;;  %s659_s10 = smov %s554_s12 }
 0x11c   : > { %s660_s11 = smov %s663_s14  ;;  %s661_s12 = smov %s667_s15 }
 0x11d   :  { %11 = sbr.rel (!%p9_p9) target bundleno = 3 (0x3), region = 69 }

</bundles_post_ra>
